<compile_context>
chip_gen: v5e
topology: v5e:2x2
jax: 0.10.0
libtpu: 0.0.40
codegen_flags: <defaults>
</compile_context>

<pallas_src>
import jax
import jax.numpy as jnp
import numpy as np
from jax import lax
from jax.experimental import pallas as pl
from jax.experimental.pallas import tpu as pltpu

K = 4  # kernel_size
S = 2  # stride
P = 1  # padding

_TAPS = tuple((dh, dw) for dh in range(3) for dw in range(3))


def _phase_taps(p):
    # Output parity p uses (patch offset d, kernel index k):
    #   p=0 -> (d=0,k=3),(d=1,k=1);   p=1 -> (d=1,k=2),(d=2,k=0)
    return ((0, 3), (1, 1)) if p == 0 else ((1, 2), (2, 0))


def _make_kernel(TH, W_pad, Cin):
    """Kernel over one (batch, row-band) grid step."""

    def kernel(xm_ref, xh_ref, w_ref, b_ref, alpha_ref, o_ref, pmat_ref):
        # ---- in-VMEM im2col: assemble the (TH*W_pad, 9*Cin) patch block ------
        # xm_ref: (1, TH, W_pad+2, Cin)  padded rows [r*TH, r*TH+TH)
        # xh_ref: (1, 2,  W_pad+2, Cin)  padded rows [r*TH+TH, r*TH+TH+2) (halo)
        for t, (dh, dw) in enumerate(_TAPS):
            if dh < TH:
                top = xm_ref[0, dh:TH, dw:dw + W_pad, :]          # (TH-dh, W_pad, Cin)
                xt = top.reshape((TH - dh) * W_pad, Cin)
                if dh > 0:
                    bot = xh_ref[0, 0:dh, dw:dw + W_pad, :]        # (dh, W_pad, Cin)
                    xt = jnp.concatenate(
                        [xt, bot.reshape(dh * W_pad, Cin)], axis=0)
            else:  # only possible when TH == 2 and dh == 2
                xt = xh_ref[0, 0:dh, dw:dw + W_pad, :].reshape(dh * W_pad, Cin)
            pmat_ref[:, t * Cin:(t + 1) * Cin] = xt

        # ---- one deep GEMM (K = 9*Cin) + bias + PReLU, bf16 store ------------
        acc = jnp.dot(pmat_ref[...], w_ref[...],
                      preferred_element_type=jnp.float32)
        acc = acc + b_ref[...]                    # resident f32 bias row
        alpha = alpha_ref[0]                      # PReLU slope from SMEM
        o_ref[0, 0] = jnp.where(acc >= 0.0, acc, alpha * acc).astype(o_ref.dtype)

    return kernel


def _resident_spec(shape, nbytes):
    """BlockSpec for a grid-invariant operand.  Single-buffer it when big enough
    to matter for VMEM; fall back silently if pipeline_mode is unsupported."""
    index_map = lambda n, r: tuple(0 for _ in shape)
    if nbytes > (2 << 20):
        try:
            return pl.BlockSpec(shape, index_map, pipeline_mode=pl.Buffered(1))
        except Exception:
            pass
    return pl.BlockSpec(shape, index_map)


def deconv_block_forward(x, weight, bias, alpha, *, target_block_rows=2048):
    """x: [N, Cin, H, W] f32 (NCHW); weight: [Cin, Cout, 4, 4] (PyTorch
    ConvTranspose2d layout); bias: [Cout]; alpha: scalar PReLU slope.
    Returns [N, Cout, 2H, 2W] f32."""
    N, Cin, H, W = x.shape
    Cout = weight.shape[1]
    assert weight.shape == (Cin, Cout, K, K)

    W_pad = ((W + 7) // 8) * 8       # sublane-aligned patch-rows per image row
    Wp2 = W_pad + 2
    Kc = 9 * Cin
    Ncol = 4 * Cout                  # GEMM columns = (py, px, co); not padded to
                                     # 128 -> no wasted writeback for small Cout

    # ---- generation-aware tile selection (v5e/v6e: 128 MiB, v7x: 64 MiB) ------
    try:
        vmem_cap = int(pltpu.get_tpu_info().vmem_capacity_bytes)
    except Exception:
        vmem_cap = 64 * 1024 * 1024
    budget = int(vmem_cap * 0.7)

    def vmem_need(th):
        m = th * W_pad
        return (2 * th * Wp2 * Cin * 2       # main row-band, double-buffered bf16
                + 2 * 2 * Wp2 * Cin * 2      # 2-row halo head, double-buffered
                + Kc * Ncol * 2              # resident bf16 weight
                + Ncol * 4                   # resident f32 bias row
                + m * Kc * 2                 # bf16 patch scratch
                + 3 * m * Ncol * 4           # f32 GEMM result + elementwise temps
                + 2 * m * Ncol * 2           # bf16 output tile, double-buffered
                + (1 << 20))                 # slack

    def _even_floor(v):
        return max(2, (v // 2) * 2)

    th = _even_floor(min(2 * ((H + 1) // 2),
                         max(2, target_block_rows // W_pad)))
    while th > 2 and vmem_need(th) > budget:
        th = _even_floor(th // 2)
    # v7x megacore: prefer >= 4 grid steps if tiles stay reasonably large
    while N * pl.cdiv(H, th) < 4 and th > 2 and (th // 2) * W_pad >= 512:
        th = _even_floor(th // 2)
    nb = pl.cdiv(H, th)
    th = min(th, ((pl.cdiv(H, nb) + 1) // 2) * 2)   # balance bands, limit waste
    nb = pl.cdiv(H, th)
    H_pad = nb * th
    M_tile = th * W_pad

    # ---- glue pass 1 (single read of x): NCHW f32 -> padded NHWC bf16 ---------
    xb = jnp.transpose(x.astype(jnp.bfloat16), (0, 2, 3, 1))          # [N,H,W,Cin]
    xp = jnp.pad(xb, ((0, 0), (1, H_pad - H + 1), (1, W_pad - W + 1), (0, 0)))
    # xp: [N, H_pad + 2, W_pad + 2, Cin]

    # ---- phase-grouped weights: rows (dh, dw, ci), cols (py, px, co) ----------
    wg = jnp.zeros((3, 3, Cin, 2, 2, Cout), jnp.float32)
    for py in range(2):
        for dh, kh in _phase_taps(py):
            for px in range(2):
                for dw, kw in _phase_taps(px):
                    wg = wg.at[dh, dw, :, py, px, :].set(
                        weight[:, :, kh, kw].astype(jnp.float32))
    wm = wg.reshape(Kc, Ncol).astype(jnp.bfloat16)
    bm = jnp.tile(bias.astype(jnp.float32), 4).reshape(1, Ncol)
    am = jnp.asarray(alpha, jnp.float32).reshape(1)

    vmem_limit = int(min(int(vmem_cap * 0.9),
                         max(vmem_need(th) * 5 // 4, 8 * 1024 * 1024)))

    cost = pl.CostEstimate(
        flops=2 * N * nb * M_tile * Kc * Ncol,
        transcendentals=0,
        bytes_accessed=(N * (H_pad + 2 + 2 * nb) * (W_pad + 2) * Cin * 2
                        + Kc * Ncol * 2 + Ncol * 4
                        + N * nb * M_tile * Ncol * 2))

    kernel = _make_kernel(th, W_pad, Cin)

    out_bands = pl.pallas_call(
        kernel,
        out_shape=jax.ShapeDtypeStruct((N, nb, M_tile, Ncol), jnp.bfloat16),
        grid=(N, nb),
        in_specs=[
            # main row band: padded rows [r*th, r*th + th)
            pl.BlockSpec((1, th, Wp2, Cin), lambda n, r: (n, r, 0, 0)),
            # 2-row halo head: padded rows [r*th + th, r*th + th + 2)
            pl.BlockSpec((1, 2, Wp2, Cin),
                         lambda n, r: (n, (r + 1) * (th // 2), 0, 0)),
            _resident_spec((Kc, Ncol), Kc * Ncol * 2),           # bf16 weight
            _resident_spec((1, Ncol), Ncol * 4),                 # f32 bias row
            pl.BlockSpec(memory_space=pltpu.MemorySpace.SMEM),   # PReLU slope
        ],
        out_specs=pl.BlockSpec((1, 1, M_tile, Ncol), lambda n, r: (n, r, 0, 0)),
        scratch_shapes=[pltpu.VMEM((M_tile, Kc), jnp.bfloat16)],
        compiler_params=pltpu.CompilerParams(
            dimension_semantics=("parallel", "parallel"),
            vmem_limit_bytes=vmem_limit),
        cost_estimate=cost,
    )(xp, xp, wm, bm, am)

    # ---- depth-to-space is a pure reshape; one final permute to NCHW ----------
    out = out_bands.reshape(N, nb, th, W_pad, 2, 2, Cout)[:, :, :, :W]
    out = out.reshape(N, H_pad, W, 2, 2, Cout)[:, :H]
    # TODO(synk): an NHWC-consuming downstream could skip this transpose.
    out = out.transpose(0, 5, 1, 3, 2, 4).reshape(N, Cout, 2 * H, 2 * W)
    return out.astype(jnp.float32)


def _reference(x, weight, bias, alpha):
    # Pure-JAX f32 reference: ConvTranspose2d == conv with lhs_dilation + flipped kernel.
    w_ref = jnp.flip(weight, (2, 3)).transpose(1, 0, 2, 3)  # IOHW -> OIHW
    y = lax.conv_general_dilated(
        x, w_ref, window_strides=(1, 1),
        padding=((K - 1 - P, K - 1 - P), (K - 1 - P, K - 1 - P)),
        lhs_dilation=(S, S),
        dimension_numbers=("NCHW", "OIHW", "NCHW"))
    y = y + bias.reshape(1, -1, 1, 1)
    return jnp.where(y >= 0, y, alpha * y)


if __name__ == "__main__":
    key = jax.random.PRNGKey(0)
    k_x, k_w, k_b = jax.random.split(key, 3)

    N, Cin, Hs, Ws = 2, 4, 16, 16
    Cout = 8

    x = jax.random.normal(k_x, (N, Cin, Hs, Ws), jnp.float32)
    weight = jax.random.normal(k_w, (Cin, Cout, K, K), jnp.float32) * 0.1
    bias = jax.random.normal(k_b, (Cout,), jnp.float32) * 0.1
    alpha = jnp.float32(0.25)  # torch.nn.PReLU() default init

    fwd = jax.jit(deconv_block_forward)
    out = jax.block_until_ready(fwd(x, weight, bias, alpha))

    ref = jax.block_until_ready(_reference(x, weight, bias, alpha))
    assert out.shape == (N, Cout, 2 * Hs, 2 * Ws), out.shape
    # bf16 GEMM operands (f32 accumulation) -> loosened tolerance vs f32 reference.
    np.testing.assert_allclose(np.asarray(out), np.asarray(ref),
                               rtol=2e-2, atol=2e-2)
    print("KERNEL_OK")
</pallas_src>

<mosaic_0001>
module attributes {stable_mosaic.version = 11 : i64} {
  func.func @kernel(%arg0: i32, %arg1: i32, %arg2: memref<1x16x18x4xbf16, #tpu.memory_space<vmem>>, %arg3: memref<1x2x18x4xbf16, #tpu.memory_space<vmem>>, %arg4: memref<36x32xbf16, #tpu.memory_space<vmem>>, %arg5: memref<1x32xf32, #tpu.memory_space<vmem>>, %arg6: memref<1xf32, #tpu.memory_space<smem>>, %arg7: memref<1x1x256x32xbf16, #tpu.memory_space<vmem>>, %arg8: memref<256x36xbf16, #tpu.memory_space<vmem>>) attributes {dimension_semantics = [#tpu.dimension_semantics<parallel>, #tpu.dimension_semantics<parallel>], iteration_bounds = array<i64: 2, 1>, scalar_prefetch = 0 : i64, scratch_operands = 1 : i64, tpu.core_type = #tpu.core_type<tc>, window_params = [{transform_indices = @transform_0, window_bounds = array<i64: 1, 16, 18, 4>}, {transform_indices = @transform_1, window_bounds = array<i64: 1, 2, 18, 4>}, {pipeline_mode = #tpu.pipeline_mode<synchronous>, transform_indices = @transform_2, window_bounds = array<i64: 36, 32>}, {pipeline_mode = #tpu.pipeline_mode<synchronous>, transform_indices = @transform_3, window_bounds = array<i64: 1, 32>}, {transform_indices = @transform_4, window_bounds = array<i64: 1>}, {transform_indices = @transform_5, window_bounds = array<i64: 1, 1, 256, 32>}]} {
    %c0 = arith.constant 0 : index
    %c0_0 = arith.constant 0 : index
    %c0_1 = arith.constant 0 : index
    %c0_2 = arith.constant 0 : index
    %0 = vector.load %arg2[%c0, %c0_0, %c0_1, %c0_2] : memref<1x16x18x4xbf16, #tpu.memory_space<vmem>>, vector<1x16x16x4xbf16>
    %1 = vector.shape_cast %0 : vector<1x16x16x4xbf16> to vector<16x16x4xbf16>
    %2 = vector.shape_cast %1 : vector<16x16x4xbf16> to vector<256x4xbf16>
    %c0_3 = arith.constant 0 : index
    %c0_4 = arith.constant 0 : index
    %3 = vector.load %arg8[%c0_3, %c0_4] : memref<256x36xbf16, #tpu.memory_space<vmem>>, vector<256x4xbf16>
    tpu.vector_store %arg8[%c0_3, %c0_4], %2 {strides = array<i32>} : memref<256x36xbf16, #tpu.memory_space<vmem>>, vector<256x4xbf16>,
    %c0_5 = arith.constant 0 : index
    %c0_6 = arith.constant 0 : index
    %c1 = arith.constant 1 : index
    %c0_7 = arith.constant 0 : index
    %4 = vector.load %arg2[%c0_5, %c0_6, %c1, %c0_7] : memref<1x16x18x4xbf16, #tpu.memory_space<vmem>>, vector<1x16x16x4xbf16>
    %5 = vector.shape_cast %4 : vector<1x16x16x4xbf16> to vector<16x16x4xbf16>
    %6 = vector.shape_cast %5 : vector<16x16x4xbf16> to vector<256x4xbf16>
    %c0_8 = arith.constant 0 : index
    %c4 = arith.constant 4 : index
    %7 = vector.load %arg8[%c0_8, %c4] : memref<256x36xbf16, #tpu.memory_space<vmem>>, vector<256x4xbf16>
    tpu.vector_store %arg8[%c0_8, %c4], %6 {strides = array<i32>} : memref<256x36xbf16, #tpu.memory_space<vmem>>, vector<256x4xbf16>,
    %c0_9 = arith.constant 0 : index
    %c0_10 = arith.constant 0 : index
    %c2 = arith.constant 2 : index
    %c0_11 = arith.constant 0 : index
    %8 = vector.load %arg2[%c0_9, %c0_10, %c2, %c0_11] : memref<1x16x18x4xbf16, #tpu.memory_space<vmem>>, vector<1x16x16x4xbf16>
    %9 = vector.shape_cast %8 : vector<1x16x16x4xbf16> to vector<16x16x4xbf16>
    %10 = vector.shape_cast %9 : vector<16x16x4xbf16> to vector<256x4xbf16>
    %c0_12 = arith.constant 0 : index
    %c8 = arith.constant 8 : index
    %11 = vector.load %arg8[%c0_12, %c8] : memref<256x36xbf16, #tpu.memory_space<vmem>>, vector<256x4xbf16>
    tpu.vector_store %arg8[%c0_12, %c8], %10 {strides = array<i32>} : memref<256x36xbf16, #tpu.memory_space<vmem>>, vector<256x4xbf16>,
    %c0_13 = arith.constant 0 : index
    %c1_14 = arith.constant 1 : index
    %c0_15 = arith.constant 0 : index
    %c0_16 = arith.constant 0 : index
    %12 = vector.load %arg2[%c0_13, %c1_14, %c0_15, %c0_16] : memref<1x16x18x4xbf16, #tpu.memory_space<vmem>>, vector<1x15x16x4xbf16>
    %13 = vector.shape_cast %12 : vector<1x15x16x4xbf16> to vector<15x16x4xbf16>
    %14 = vector.shape_cast %13 : vector<15x16x4xbf16> to vector<240x4xbf16>
    %c0_17 = arith.constant 0 : index
    %c0_18 = arith.constant 0 : index
    %c0_19 = arith.constant 0 : index
    %c0_20 = arith.constant 0 : index
    %15 = vector.load %arg3[%c0_17, %c0_18, %c0_19, %c0_20] : memref<1x2x18x4xbf16, #tpu.memory_space<vmem>>, vector<1x1x16x4xbf16>
    %16 = vector.shape_cast %15 : vector<1x1x16x4xbf16> to vector<1x16x4xbf16>
    %17 = vector.shape_cast %16 : vector<1x16x4xbf16> to vector<16x4xbf16>
    %18 = tpu.concatenate %14, %17 in 0 : vector<240x4xbf16>, vector<16x4xbf16> -> vector<256x4xbf16>
    %c0_21 = arith.constant 0 : index
    %c12 = arith.constant 12 : index
    %19 = vector.load %arg8[%c0_21, %c12] : memref<256x36xbf16, #tpu.memory_space<vmem>>, vector<256x4xbf16>
    tpu.vector_store %arg8[%c0_21, %c12], %18 {strides = array<i32>} : memref<256x36xbf16, #tpu.memory_space<vmem>>, vector<256x4xbf16>,
    %c0_22 = arith.constant 0 : index
    %c1_23 = arith.constant 1 : index
    %c1_24 = arith.constant 1 : index
    %c0_25 = arith.constant 0 : index
    %20 = vector.load %arg2[%c0_22, %c1_23, %c1_24, %c0_25] : memref<1x16x18x4xbf16, #tpu.memory_space<vmem>>, vector<1x15x16x4xbf16>
    %21 = vector.shape_cast %20 : vector<1x15x16x4xbf16> to vector<15x16x4xbf16>
    %22 = vector.shape_cast %21 : vector<15x16x4xbf16> to vector<240x4xbf16>
    %c0_26 = arith.constant 0 : index
    %c0_27 = arith.constant 0 : index
    %c1_28 = arith.constant 1 : index
    %c0_29 = arith.constant 0 : index
    %23 = vector.load %arg3[%c0_26, %c0_27, %c1_28, %c0_29] : memref<1x2x18x4xbf16, #tpu.memory_space<vmem>>, vector<1x1x16x4xbf16>
    %24 = vector.shape_cast %23 : vector<1x1x16x4xbf16> to vector<1x16x4xbf16>
    %25 = vector.shape_cast %24 : vector<1x16x4xbf16> to vector<16x4xbf16>
    %26 = tpu.concatenate %22, %25 in 0 : vector<240x4xbf16>, vector<16x4xbf16> -> vector<256x4xbf16>
    %c0_30 = arith.constant 0 : index
    %c16 = arith.constant 16 : index
    %27 = vector.load %arg8[%c0_30, %c16] : memref<256x36xbf16, #tpu.memory_space<vmem>>, vector<256x4xbf16>
    tpu.vector_store %arg8[%c0_30, %c16], %26 {strides = array<i32>} : memref<256x36xbf16, #tpu.memory_space<vmem>>, vector<256x4xbf16>,
    %c0_31 = arith.constant 0 : index
    %c1_32 = arith.constant 1 : index
    %c2_33 = arith.constant 2 : index
    %c0_34 = arith.constant 0 : index
    %28 = vector.load %arg2[%c0_31, %c1_32, %c2_33, %c0_34] : memref<1x16x18x4xbf16, #tpu.memory_space<vmem>>, vector<1x15x16x4xbf16>
    %29 = vector.shape_cast %28 : vector<1x15x16x4xbf16> to vector<15x16x4xbf16>
    %30 = vector.shape_cast %29 : vector<15x16x4xbf16> to vector<240x4xbf16>
    %c0_35 = arith.constant 0 : index
    %c0_36 = arith.constant 0 : index
    %c2_37 = arith.constant 2 : index
    %c0_38 = arith.constant 0 : index
    %31 = vector.load %arg3[%c0_35, %c0_36, %c2_37, %c0_38] : memref<1x2x18x4xbf16, #tpu.memory_space<vmem>>, vector<1x1x16x4xbf16>
    %32 = vector.shape_cast %31 : vector<1x1x16x4xbf16> to vector<1x16x4xbf16>
    %33 = vector.shape_cast %32 : vector<1x16x4xbf16> to vector<16x4xbf16>
    %34 = tpu.concatenate %30, %33 in 0 : vector<240x4xbf16>, vector<16x4xbf16> -> vector<256x4xbf16>
    %c0_39 = arith.constant 0 : index
    %c20 = arith.constant 20 : index
    %35 = vector.load %arg8[%c0_39, %c20] : memref<256x36xbf16, #tpu.memory_space<vmem>>, vector<256x4xbf16>
    tpu.vector_store %arg8[%c0_39, %c20], %34 {strides = array<i32>} : memref<256x36xbf16, #tpu.memory_space<vmem>>, vector<256x4xbf16>,
    %c0_40 = arith.constant 0 : index
    %c2_41 = arith.constant 2 : index
    %c0_42 = arith.constant 0 : index
    %c0_43 = arith.constant 0 : index
    %36 = vector.load %arg2[%c0_40, %c2_41, %c0_42, %c0_43] : memref<1x16x18x4xbf16, #tpu.memory_space<vmem>>, vector<1x14x16x4xbf16>
    %37 = vector.shape_cast %36 : vector<1x14x16x4xbf16> to vector<14x16x4xbf16>
    %38 = vector.shape_cast %37 : vector<14x16x4xbf16> to vector<224x4xbf16>
    %c0_44 = arith.constant 0 : index
    %c0_45 = arith.constant 0 : index
    %c0_46 = arith.constant 0 : index
    %c0_47 = arith.constant 0 : index
    %39 = vector.load %arg3[%c0_44, %c0_45, %c0_46, %c0_47] : memref<1x2x18x4xbf16, #tpu.memory_space<vmem>>, vector<1x2x16x4xbf16>
    %40 = vector.shape_cast %39 : vector<1x2x16x4xbf16> to vector<2x16x4xbf16>
    %41 = vector.shape_cast %40 : vector<2x16x4xbf16> to vector<32x4xbf16>
    %42 = tpu.concatenate %38, %41 in 0 : vector<224x4xbf16>, vector<32x4xbf16> -> vector<256x4xbf16>
    %c0_48 = arith.constant 0 : index
    %c24 = arith.constant 24 : index
    %43 = vector.load %arg8[%c0_48, %c24] : memref<256x36xbf16, #tpu.memory_space<vmem>>, vector<256x4xbf16>
    tpu.vector_store %arg8[%c0_48, %c24], %42 {strides = array<i32>} : memref<256x36xbf16, #tpu.memory_space<vmem>>, vector<256x4xbf16>,
    %c0_49 = arith.constant 0 : index
    %c2_50 = arith.constant 2 : index
    %c1_51 = arith.constant 1 : index
    %c0_52 = arith.constant 0 : index
    %44 = vector.load %arg2[%c0_49, %c2_50, %c1_51, %c0_52] : memref<1x16x18x4xbf16, #tpu.memory_space<vmem>>, vector<1x14x16x4xbf16>
    %45 = vector.shape_cast %44 : vector<1x14x16x4xbf16> to vector<14x16x4xbf16>
    %46 = vector.shape_cast %45 : vector<14x16x4xbf16> to vector<224x4xbf16>
    %c0_53 = arith.constant 0 : index
    %c0_54 = arith.constant 0 : index
    %c1_55 = arith.constant 1 : index
    %c0_56 = arith.constant 0 : index
    %47 = vector.load %arg3[%c0_53, %c0_54, %c1_55, %c0_56] : memref<1x2x18x4xbf16, #tpu.memory_space<vmem>>, vector<1x2x16x4xbf16>
    %48 = vector.shape_cast %47 : vector<1x2x16x4xbf16> to vector<2x16x4xbf16>
    %49 = vector.shape_cast %48 : vector<2x16x4xbf16> to vector<32x4xbf16>
    %50 = tpu.concatenate %46, %49 in 0 : vector<224x4xbf16>, vector<32x4xbf16> -> vector<256x4xbf16>
    %c0_57 = arith.constant 0 : index
    %c28 = arith.constant 28 : index
    %51 = vector.load %arg8[%c0_57, %c28] : memref<256x36xbf16, #tpu.memory_space<vmem>>, vector<256x4xbf16>
    tpu.vector_store %arg8[%c0_57, %c28], %50 {strides = array<i32>} : memref<256x36xbf16, #tpu.memory_space<vmem>>, vector<256x4xbf16>,
    %c0_58 = arith.constant 0 : index
    %c2_59 = arith.constant 2 : index
    %c2_60 = arith.constant 2 : index
    %c0_61 = arith.constant 0 : index
    %52 = vector.load %arg2[%c0_58, %c2_59, %c2_60, %c0_61] : memref<1x16x18x4xbf16, #tpu.memory_space<vmem>>, vector<1x14x16x4xbf16>
    %53 = vector.shape_cast %52 : vector<1x14x16x4xbf16> to vector<14x16x4xbf16>
    %54 = vector.shape_cast %53 : vector<14x16x4xbf16> to vector<224x4xbf16>
    %c0_62 = arith.constant 0 : index
    %c0_63 = arith.constant 0 : index
    %c2_64 = arith.constant 2 : index
    %c0_65 = arith.constant 0 : index
    %55 = vector.load %arg3[%c0_62, %c0_63, %c2_64, %c0_65] : memref<1x2x18x4xbf16, #tpu.memory_space<vmem>>, vector<1x2x16x4xbf16>
    %56 = vector.shape_cast %55 : vector<1x2x16x4xbf16> to vector<2x16x4xbf16>
    %57 = vector.shape_cast %56 : vector<2x16x4xbf16> to vector<32x4xbf16>
    %58 = tpu.concatenate %54, %57 in 0 : vector<224x4xbf16>, vector<32x4xbf16> -> vector<256x4xbf16>
    %c0_66 = arith.constant 0 : index
    %c32 = arith.constant 32 : index
    %59 = vector.load %arg8[%c0_66, %c32] : memref<256x36xbf16, #tpu.memory_space<vmem>>, vector<256x4xbf16>
    tpu.vector_store %arg8[%c0_66, %c32], %58 {strides = array<i32>} : memref<256x36xbf16, #tpu.memory_space<vmem>>, vector<256x4xbf16>,
    %c0_67 = arith.constant 0 : index
    %c0_68 = arith.constant 0 : index
    %60 = vector.load %arg8[%c0_67, %c0_68] : memref<256x36xbf16, #tpu.memory_space<vmem>>, vector<256x36xbf16>
    %c0_69 = arith.constant 0 : index
    %c0_70 = arith.constant 0 : index
    %61 = vector.load %arg4[%c0_69, %c0_70] : memref<36x32xbf16, #tpu.memory_space<vmem>>, vector<36x32xbf16>
    %cst = arith.constant dense<0.000000e+00> : vector<256x32xf32>
    %62 = tpu.matmul %60, %61, %cst {dimension_numbers = #tpu.dot_dimension_numbers<[1], [0], [0], [1], [0, 0, 1, 1], [], []>} : vector<256x36xbf16>, vector<36x32xbf16>, vector<256x32xf32> -> vector<256x32xf32>
    %c0_71 = arith.constant 0 : index
    %c0_72 = arith.constant 0 : index
    %63 = vector.load %arg5[%c0_71, %c0_72] : memref<1x32xf32, #tpu.memory_space<vmem>>, vector<1x32xf32>
    %64 = vector.broadcast %63 : vector<1x32xf32> to vector<256x32xf32>
    %65 = arith.addf %62, %64 : vector<256x32xf32>
    %c0_73 = arith.constant 0 : index
    %66 = memref.load %arg6[%c0_73] : memref<1xf32, #tpu.memory_space<smem>>
    %cst_74 = arith.constant 0.000000e+00 : f32
    %67 = vector.broadcast %cst_74 : f32 to vector<256x32xf32>
    %68 = arith.cmpf oge, %65, %67 : vector<256x32xf32>
    %69 = vector.broadcast %66 : f32 to vector<256x32xf32>
    %70 = arith.mulf %69, %65 : vector<256x32xf32>
    %71 = arith.select %68, %65, %70 : vector<256x32xi1>, vector<256x32xf32>
    %72 = arith.truncf %71 : vector<256x32xf32> to vector<256x32xbf16>
    %c0_75 = arith.constant 0 : index
    %c0_76 = arith.constant 0 : index
    %c0_77 = arith.constant 0 : index
    %c0_78 = arith.constant 0 : index
    %73 = vector.load %arg7[%c0_75, %c0_76, %c0_77, %c0_78] : memref<1x1x256x32xbf16, #tpu.memory_space<vmem>>, vector<1x1x256x32xbf16>
    %74 = vector.shape_cast %73 : vector<1x1x256x32xbf16> to vector<256x32xbf16>
    %75 = vector.shape_cast %72 : vector<256x32xbf16> to vector<1x1x256x32xbf16>
    tpu.vector_store %arg7[%c0_75, %c0_76, %c0_77, %c0_78], %75 {strides = array<i32>} : memref<1x1x256x32xbf16, #tpu.memory_space<vmem>>, vector<1x1x256x32xbf16>,
    return
  }
  func.func @transform_0(%arg0: i32, %arg1: i32) -> (i32, i32, i32, i32) {
    %c0_i32 = arith.constant 0 : i32
    %c0_i32_0 = arith.constant 0 : i32
    %c0_i32_1 = arith.constant 0 : i32
    return %arg0, %arg1, %c0_i32, %c0_i32_0 : i32, i32, i32, i32
  }
  func.func @transform_1(%arg0: i32, %arg1: i32) -> (i32, i32, i32, i32) {
    %c1_i32 = arith.constant 1 : i32
    %0 = arith.addi %arg1, %c1_i32 : i32
    %c8_i32 = arith.constant 8 : i32
    %1 = arith.muli %0, %c8_i32 : i32
    %c0_i32 = arith.constant 0 : i32
    %c0_i32_0 = arith.constant 0 : i32
    %c0_i32_1 = arith.constant 0 : i32
    return %arg0, %1, %c0_i32, %c0_i32_0 : i32, i32, i32, i32
  }
  func.func @transform_2(%arg0: i32, %arg1: i32) -> (i32, i32) {
    %c0_i32 = arith.constant 0 : i32
    %c0_i32_0 = arith.constant 0 : i32
    %c0_i32_1 = arith.constant 0 : i32
    return %c0_i32, %c0_i32_0 : i32, i32
  }
  func.func @transform_3(%arg0: i32, %arg1: i32) -> (i32, i32) {
    %c0_i32 = arith.constant 0 : i32
    %c0_i32_0 = arith.constant 0 : i32
    %c0_i32_1 = arith.constant 0 : i32
    return %c0_i32, %c0_i32_0 : i32, i32
  }
  func.func @transform_4(%arg0: i32, %arg1: i32) -> i32 {
    %c0_i32 = arith.constant 0 : i32
    %c0_i32_0 = arith.constant 0 : i32
    return %c0_i32 : i32
  }
  func.func @transform_5(%arg0: i32, %arg1: i32) -> (i32, i32, i32, i32) {
    %c0_i32 = arith.constant 0 : i32
    %c0_i32_0 = arith.constant 0 : i32
    %c0_i32_1 = arith.constant 0 : i32
    return %arg0, %arg1, %c0_i32, %c0_i32_0 : i32, i32, i32, i32
  }
}

</mosaic_0001>

<bundles_post_ra>
// kernel: tile.9
= control target key start
LH: loop header
LB: loop body
LE: loop exit
PB: predicated region body
PF: predicated region fallthrough
CT: control target
= control target key end

     0   :  { %s37_s8 = smov 8   ;;  %s38_s9 = smov 16   ;;  %vm7_vm0 = vcmask 64512   ;;  %vm13_vm1 = vcmask 261312   ;;  %vm19_vm2 = vcmask 195712   ;;  %vm25_vm3 = vcmask 130112   ;;  %s55_s0 = inlined_call_operand.vmem [shape: f32[4,8], index: 0, kind: input, shape index: {}]   ;;  %s56_s1 = inlined_call_operand.vmem [shape: f32[1,32], index: 1, kind: output, shape index: {}]  }
   0x1   :  { %v4_v0 = vld [vmem:[%s55_s0] sm:$0xf]  ;;  %s36_s0 = smov 24  }
   0x2   :  { %5 = vst [vmem:[#allocation1] sm:$0xf] %v4_v0 }
   0x9   :  { %v10_v1 = vld [vmem:[#allocation1 + $0x3] sm:$0x1]   ;;  %v22_v2 = vld [vmem:[#allocation1 + $0x1] sm:$0x1]   ;;  %v16_v3 = vld [vmem:[#allocation1 + $0x2] sm:$0x1]  }
   0xa   :  { %11 = vrot.lane.b32.xlu0 %v10_v1, %s36_s0  ;;  %23 = vrot.lane.b32.xlu1 %v22_v2, %s37_s8  ;;  %v6_v4 = vld [vmem:[#allocation1] sm:$0x1]  }
   0xb   :  { %8 = vst.msk [vmem:[#allocation0] sm:$0x1] %vm7_vm0, %v6_v4  }
  0x12   :  { %17 = vrot.lane.b32.xlu0 %v16_v3, %s38_s9 }
  0x7c   :  { %v12_v5 = vpop.permute.xlu0 %11   ;;  %v24_v6 = vpop.permute.xlu1 %23  }
  0x7d   :  { %14 = vst.msk [vmem:[#allocation0] sm:$0x1] %vm13_vm1, %v12_v5  }
  0x84   :  { %v18_v7 = vpop.permute.xlu0 %17  }
  0x85   :  { %20 = vst.msk [vmem:[#allocation0] sm:$0x1] %vm19_vm2, %v18_v7  }
  0x86   :  { %26 = vst.msk [vmem:[#allocation0] sm:$0x1] %vm25_vm3, %v24_v6  }
  0x8d   :  { %v29_v8 = vld [vmem:[#allocation0] sm:$0x1] }
  0x8e   :  { %32 = vst [vmem:[%s56_s1] sm:$0x1] %v29_v8 }

// kernel: tile.8
= control target key start
LH: loop header
LB: loop body
LE: loop exit
PB: predicated region body
PF: predicated region fallthrough
CT: control target
= control target key end

     0   :  { %s22_s0 = inlined_call_operand.vmem [shape: f32[8], index: 0, kind: input, shape index: {}]   ;;  %s23_s1 = inlined_call_operand.vmem [shape: f32[4,8], index: 1, kind: output, shape index: {}]  }
   0x1   :  { %v4_v0 = vld [vmem:[%s22_s0] ss:$0 sm:$0xff] }
   0x2   :  { %5 = vst [vmem:[%s23_s1] sm:$0xf] %v4_v0 }

// kernel: deconv_block_forward.1
= control target key start
LH: loop header
LB: loop body
LE: loop exit
PB: predicated region body
PF: predicated region fallthrough
CT: control target
= control target key end

     0   :  { %s5033_s20 = smov 0   ;;  %s5035_s21 = smov 0   ;;  %s6677_s0 = inlined_call_operand.vmem [shape: bf16[2,18,18,4], index: 0, kind: input, shape index: {}, may-alias: {0,1}]   ;;  %s6678_s1 = inlined_call_operand.vmem [shape: bf16[2,18,18,4], index: 1, kind: input, shape index: {}, may-alias: {0,1}]   ;;  %s6679_s2 = inlined_call_operand.vmem [shape: bf16[36,32], index: 2, kind: input, shape index: {}]   ;;  %s6680_s3 = inlined_call_operand.vmem [shape: f32[1,32], index: 3, kind: input, shape index: {}]   ;;  %s6681_s4 = inlined_call_operand.<no memory space> [shape: f32[1], index: 4, kind: input, shape index: {}]   ;;  %s6682_s5 = inlined_call_operand.vmem [shape: bf16[2,1,256,32], index: 5, kind: output, shape index: {}]  }
   0x1   :  { %10 = sst [smem:[#allocation3]] %s6681_s4  ;;  %s5037_s22 = smov 0  }
   0x2 LB: > { %s28_s4 = sadd.s32 1, %s4986_s21  ;;  %p4440_p0 = scmp.ge.s32.totalorder %s4990_s22, 1  ;;  %s4990_s22 = sphi %s5037_s22, %s16_s22   ;;  %s4986_s21 = sphi %s5035_s21, %s6688_s21   ;;  %s4982_s20 = sphi %s5033_s20, %s6687_s20  }
   0x3   : > { %p30_p1 = scmp.ge.s32.totalorder %s28_s4, 2  ;;  %p246_p2 = scmp.lt.s32.totalorder %s4990_s22, 3 }
   0x5   : > { %s6690_s4 = smov (%p30_p1, %s28_s4), 0  ;;  %p247_p3 = pnand %p4440_p0, %p246_p2 }
   0x6   : > { %p306_p4 = scmp.lt.s32.totalorder (!%p247_p3), %s4982_s20, 1  ;;  %s4992_s27 = smov (!%p247_p3), 4  }
   0x7   : > { %250 = sbr.rel (%p247_p3) target bundleno = 972 (0x3cc), region = 40  ;;  %s4993_s28 = smov (!%p247_p3), 8  }
   0x8   : > { %s4994_s29 = smov (!%p247_p3), 12   ;;  %s4995_s9 = smov (!%p247_p3), 16  }
   0x9   : > { %s4996_s10 = smov (!%p247_p3), 20   ;;  %s4997_s11 = smov (!%p247_p3), 24  }
   0xa   : > { %s4998_s12 = smov (!%p247_p3), 28   ;;  %s4999_s13 = smov (!%p247_p3), 32  }
   0xc   : > { %s6692_s20 = smov (!%p306_p4, %s4982_s20), 1  ;;  %vm459_vm0 = vsmask.f32 3328  ;;  %vm460_vm1 = vsmask.f32 7440  ;;  %vm1071_vm3 = vcmask 1042432  }
   0xd   : > { %s4932_s23 = smul.u32 216, %s6692_s20  ;;  %vm5070_vm2 = vmor %vm459_vm0, %vm460_vm1  ;;  %vm1072_vm4 = vcmask 1046532   ;;  %vm378_vm5 = vcmask 27648   ;;  %vm942_vm7 = vcmask 60448   ;;  %vm1282_vm8 = vcmask 93248  }
   0xe   : > { %vm5245_vm6 = vmor %vm1071_vm3, %vm1072_vm4  ;;  %vm1540_vm9 = vcmask 126048   ;;  %vm2019_vm10 = vsmask.f32 7424  ;;  %vm2162_vm11 = vcmask 158848   ;;  %vm2431_vm12 = vcmask 1046528  }
   0xf   : > { %s5059_s26 = scalar_lea.vmem %s6677_s0, %s4932_s23  ;;  %s4823_s30 = sadd.s32 192, %s4932_s23  ;;  %vm2565_vm13 = vcmask 191648   ;;  %vm2823_vm14 = vcmask 224448   ;;  %vm4067_vm15 = vcmask 1041408   ;;  %vm3448_vm0 = vcmask 257248  }
  0x10   : > { %v414_v0 = vld [vmem:[%s5059_s26 + $0xc] sm:$0xf]  ;;  %v415_v1 = vld [vmem:[%s5059_s26 + $0x10] sm:$0xf]  ;;  %v411_v2 = vld [vmem:[%s5059_s26] sm:$0xf]  ;;  %s5547_s8 = scalar_lea.vmem %s6678_s1, %s4823_s30 }
  0x11   : > { %v487_v3 = vshrl.u32 %v414_v0, 16  ;;  %v490_v4 = vshll.u32 %v414_v0, 16  ;;  %v496_v5 = vshll.u32 %v415_v1, 16  ;;  %v500_v6 = vshrl.u32 %v415_v1, 16  ;;  %v412_v7 = vld [vmem:[%s5059_s26 + $0x4] sm:$0xf] }
  0x12   : > { %v463_v8 = vshrl.u32 %v411_v2, 16  ;;  %v466_v9 = vshll.u32 %v411_v2, 16  ;;  %v472_v10 = vshll.u32 %v412_v7, 16  ;;  %v476_v11 = vshrl.u32 %v412_v7, 16  ;;  %v416_v12 = vld [vmem:[%s5059_s26 + $0x14] sm:$0x1] }
  0x13   : > { %v489_v13 = vrot.slane %v487_v3, 4  ;;  %v492_v14 = vrot.slane %v490_v4, 5  ;;  %v498_v15 = vrot.slane %v496_v5, 5  ;;  %v502_v16 = vrot.slane %v500_v6, 4  ;;  %v413_v17 = vld [vmem:[%s5059_s26 + $0x8] sm:$0x1] }
  0x14   : > { %v465_v18 = vrot.slane %v463_v8, 4  ;;  %v468_v19 = vrot.slane %v466_v9, 5  ;;  %v478_v20 = vrot.slane %v476_v11, 4  ;;  %v421_v21 = vld [vmem:[%s5059_s26 + $0x28] sm:$0xf]  ;;  %v506_v24 = vshll.u32 %v416_v12, 16 }
  0x15   : > { %v493_v22 = vor.u32 %v492_v14, %v489_v13  ;;  %v503_v23 = vor.u32 %v502_v16, %v498_v15  ;;  %v474_v27 = vrot.slane %v472_v10, 5  ;;  %v544_v28 = vshll.u32 %v421_v21, 16  ;;  %v420_v30 = vld [vmem:[%s5059_s26 + $0x24] sm:$0xf]  ;;  %v417_v35 = vld [vmem:[%s5059_s26 + $0x18] sm:$0xf] }
  0x16   : > { %v469_v26 = vor.u32 %v468_v19, %v465_v18  ;;  %v548_v29 = vshrl.u32 %v421_v21, 16  ;;  %v482_v32 = vshll.u32 %v413_v17, 16  ;;  %v508_v38 = vrot.slane %v506_v24, 5  ;;  %v418_v40 = vld [vmem:[%s5059_s26 + $0x1c] sm:$0xf]  ;;  %s4160_s23 = sld [smem:[#allocation3]] }
  0x17   : > { %v494_v31 = vrot.slane %v493_v22, 4  ;;  %v479_v34 = vor.u32 %v478_v20, %v474_v27  ;;  %v504_v37 = vrot.slane %v503_v23, 4  ;;  %v535_v39 = vshrl.u32 %v420_v30, 16  ;;  %v422_v42 = vld [vmem:[%s5059_s26 + $0x2c] sm:$0x1] }
  0x18   : > { %v470_v33 = vrot.slane %v469_v26, 4  ;;  %v5083_v43 = vrot.slane %v544_v28, 5  ;;  %v550_v44 = vrot.slane %v548_v29, 4  ;;  %v538_v45 = vshll.u32 %v420_v30, 16  ;;  %v426_v50 = vld [vmem:[%s5059_s26 + $0x3c] sm:$0xf] }
  0x19   : > { %v499_v36 = vsel %vm5070_vm2, %v494_v31, %v498_v15  ;;  %v484_v46 = vrot.slane %v482_v32, 5  ;;  %v537_v47 = vrot.slane %v535_v39, 4  ;;  %v511_v48 = vshrl.u32 %v417_v35, 16  ;;  %v424_v58 = vld [vmem:[%s5059_s26 + $0x34] sm:$0xf] }
  0x1a   : > { %850 = vrot.lane.b32.xlu1 %v499_v36, %s4992_s27  ;;  %v475_v41 = vsel %vm5070_vm2, %v470_v33, %v474_v27  ;;  %v514_v49 = vshll.u32 %v417_v35, 16  ;;  %v480_v51 = vrot.slane %v479_v34, 4  ;;  %v540_v52 = vrot.slane %v538_v45, 5  ;;  %v419_v6 = vld [vmem:[%s5059_s26 + $0x20] sm:$0x1] }
  0x1b   : > { %846 = vrot.lane.b32.xlu0 %v475_v41, %s4992_s27  ;;  %v520_v53 = vshll.u32 %v418_v40, 16  ;;  %v524_v54 = vshrl.u32 %v418_v40, 16  ;;  %v554_v55 = vshll.u32 %v422_v42, 16  ;;  %v513_v56 = vrot.slane %v511_v48, 4  ;;  %v427_v15 = vld [vmem:[%s5059_s26 + $0x40] sm:$0xf] }
  0x1c   : > { %v516_v57 = vrot.slane %v514_v49, 5  ;;  %v551_v59 = vor.u32 %v550_v44, %v5083_v43  ;;  %v583_v61 = vshrl.u32 %v426_v50, 16  ;;  %v586_v62 = vshll.u32 %v426_v50, 16  ;;  %v425_v16 = vld [vmem:[%s5059_s26 + $0x38] sm:$0x1] }
  0x1d   : > { %v526_v60 = vrot.slane %v524_v54, 4  ;;  %v509_v63 = vsel %vm5070_vm2, %v504_v37, %v508_v38  ;;  %v541_v0 = vor.u32 %v540_v52, %v537_v47  ;;  %v522_v2 = vrot.slane %v520_v53, 5  ;;  %v430_v20 = vld [vmem:[%s5059_s26 + $0x4c] sm:$0xf]  ;;  %v423_v21 = vld [vmem:[%s5059_s26 + $0x30] sm:$0xf] }
  0x1e   : > { %v517_v1 = vor.u32 %v516_v57, %v513_v56  ;;  %v485_v3 = vsel %vm5070_vm2, %v480_v51, %v484_v46  ;;  %v568_v4 = vshll.u32 %v424_v58, 16  ;;  %v572_v5 = vshrl.u32 %v424_v58, 16  ;;  %v429_v24 = vld [vmem:[%s5059_s26 + $0x48] sm:$0xf]  ;;  %v435_v47 = vld [vmem:[%s5059_s26 + $0x60] sm:$0xf] }
  0x1f   : > { %v556_v7 = vrot.slane %v554_v55, 5  ;;  %v552_v9 = vrot.slane %v551_v59, 4  ;;  %v585_v10 = vrot.slane %v583_v61, 4  ;;  %v588_v11 = vrot.slane %v586_v62, 5  ;;  %v431_v49 = vld [vmem:[%s5059_s26 + $0x50] sm:$0x1] }
  0x20   : > { %v518_v8 = vrot.slane %v517_v1, 4  ;;  %v527_v12 = vor.u32 %v526_v60, %v522_v2  ;;  %v542_v13 = vrot.slane %v541_v0, 4  ;;  %v530_v17 = vshll.u32 %v419_v6, 16  ;;  %v433_v53 = vld [vmem:[%s5059_s26 + $0x58] sm:$0xf] }
  0x21   : > { %v5101_v18 = vrot.slane %v568_v4, 5  ;;  %v574_v19 = vrot.slane %v572_v5, 4  ;;  %v557_v26 = vsel %vm5070_vm2, %v552_v9, %v556_v7  ;;  %v589_v27 = vor.u32 %v588_v11, %v585_v10  ;;  %v428_v58 = vld [vmem:[%s5059_s26 + $0x44] sm:$0x1]  ;;  %v439_v11 = vld [vmem:[%s5059_s26 + $0x70] sm:$0xf] }
  0x22   : > { %852 = vrot.lane.b32.xlu1 %v509_v63, %s4992_s27  ;;  %v523_v14 = vsel %vm5070_vm2, %v518_v8, %v522_v2  ;;  %v528_v22 = vrot.slane %v527_v12, 4  ;;  %v532_v23 = vrot.slane %v530_v17, 5  ;;  %v592_v28 = vshll.u32 %v427_v15, 16  ;;  %v432_v2 = vld [vmem:[%s5059_s26 + $0x54] sm:$0xf] }
  0x23   : > { %848 = vrot.lane.b32.xlu0 %v485_v3, %s4992_s27  ;;  %854 = vrot.lane.b32.xlu2 %v523_v14, %s4992_s27  ;;  %v578_v29 = vshll.u32 %v425_v16, 16  ;;  %v547_v30 = vsel %vm5070_vm2, %v542_v13, %v5083_v43  ;;  %v616_v31 = vshll.u32 %v430_v20, 16  ;;  %v620_v32 = vshrl.u32 %v430_v20, 16  ;;  %v436_v6 = vld [vmem:[%s5059_s26 + $0x64] sm:$0xf] }
  0x24   : > { %v559_v33 = vshrl.u32 %v423_v21, 16  ;;  %v575_v34 = vor.u32 %v574_v19, %v5101_v18  ;;  %v607_v35 = vshrl.u32 %v429_v24, 16  ;;  %v610_v36 = vshll.u32 %v429_v24, 16  ;;  %v438_v20 = vld [vmem:[%s5059_s26 + $0x6c] sm:$0xf] }
  0x25   : > { %v562_v37 = vshll.u32 %v423_v21, 16  ;;  %v596_v38 = vshrl.u32 %v427_v15, 16  ;;  %v533_v39 = vsel %vm5070_vm2, %v528_v22, %v532_v23  ;;  %v594_v41 = vrot.slane %v592_v28, 5  ;;  %v434_v15 = vld [vmem:[%s5059_s26 + $0x5c] sm:$0x1] }
  0x26   : > { %v561_v40 = vrot.slane %v559_v33, 4  ;;  %v590_v43 = vrot.slane %v589_v27, 4  ;;  %v580_v44 = vrot.slane %v578_v29, 5  ;;  %v5116_v45 = vrot.slane %v616_v31, 5 }
  0x27   : > { %v564_v42 = vrot.slane %v562_v37, 5  ;;  %v622_v46 = vrot.slane %v620_v32, 4  ;;  %v576_v48 = vrot.slane %v575_v34, 4  ;;  %v609_v50 = vrot.slane %v607_v35, 4 }
  0x28   : > { %v612_v51 = vrot.slane %v610_v36, 5  ;;  %v598_v54 = vrot.slane %v596_v38, 4  ;;  %v655_v56 = vshrl.u32 %v435_v47, 16  ;;  %v658_v57 = vshll.u32 %v435_v47, 16  ;;  %v442_v47 = vld [vmem:[%s5059_s26 + $0x7c] sm:$0xf] }
  0x29   : > { %v565_v52 = vor.u32 %v564_v42, %v561_v40  ;;  %v595_v59 = vsel %vm5070_vm2, %v590_v43, %v594_v41  ;;  %v623_v60 = vor.u32 %v622_v46, %v5116_v45  ;;  %v626_v61 = vshll.u32 %v431_v49, 16  ;;  %v444_v42 = vld [vmem:[%s5059_s26 + $0x84] sm:$0xf]  ;;  %v437_v49 = vld [vmem:[%s5059_s26 + $0x68] sm:$0x1] }
  0x2a   : > { %860 = vrot.lane.b32.xlu1 %v557_v26, %s4992_s27  ;;  %v581_v62 = vsel %vm5070_vm2, %v576_v48, %v580_v44  ;;  %v613_v63 = vor.u32 %v612_v51, %v609_v50  ;;  %v640_v0 = vshll.u32 %v433_v53, 16  ;;  %v644_v1 = vshrl.u32 %v433_v53, 16 }
  0x2b   : > { %858 = vrot.lane.b32.xlu0 %v547_v30, %s4992_s27  ;;  %856 = vrot.lane.b32.xlu2 %v533_v39, %s4992_s27  ;;  %v566_v55 = vrot.slane %v565_v52, 4  ;;  %v599_v4 = vor.u32 %v598_v54, %v594_v41  ;;  %v602_v5 = vshll.u32 %v428_v58, 16  ;;  %v657_v7 = vrot.slane %v655_v56, 4  ;;  %v440_v41 = vld [vmem:[%s5059_s26 + $0x74] sm:$0x1] }
  0x2c   : > { %v660_v8 = vrot.slane %v658_v57, 5  ;;  %v624_v9 = vrot.slane %v623_v60, 4  ;;  %v628_v10 = vrot.slane %v626_v61, 5  ;;  %v631_v12 = vshrl.u32 %v432_v2, 16  ;;  %v441_v54 = vld [vmem:[%s5059_s26 + $0x78] sm:$0xf] }
  0x2d   : > { %v571_v3 = vsel %vm5070_vm2, %v566_v55, %v5101_v18  ;;  %v634_v13 = vshll.u32 %v432_v2, 16  ;;  %v614_v14 = vrot.slane %v613_v63, 4  ;;  %v5138_v16 = vrot.slane %v640_v0, 5 }
  0x2e   : > { %v646_v17 = vrot.slane %v644_v1, 4  ;;  %v600_v18 = vrot.slane %v599_v4, 4  ;;  %v604_v19 = vrot.slane %v602_v5, 5  ;;  %v633_v21 = vrot.slane %v631_v12, 4  ;;  %v445_v4 = vld [vmem:[%s5059_s26 + $0x88] sm:$0xf] }
  0x2f   : > { %v636_v22 = vrot.slane %v634_v13, 5  ;;  %v661_v23 = vor.u32 %v660_v8, %v657_v7  ;;  %v664_v24 = vshll.u32 %v436_v6, 16  ;;  %v688_v26 = vshll.u32 %v439_v11, 16 }
  0x30   : > { %v692_v27 = vshrl.u32 %v439_v11, 16  ;;  %v629_v28 = vsel %vm5070_vm2, %v624_v9, %v628_v10  ;;  %v650_v29 = vshll.u32 %v434_v15, 16  ;;  %v619_v30 = vsel %vm5070_vm2, %v614_v14, %v5116_v45  ;;  %v448_v9 = vld [vmem:[%s5059_s26 + $0x94] sm:$0xf]  ;;  %v443_v11 = vld [vmem:[%s5059_s26 + $0x80] sm:$0x1] }
  0x31   : > { %v647_v31 = vor.u32 %v646_v17, %v5138_v16  ;;  %v679_v32 = vshrl.u32 %v438_v20, 16  ;;  %v682_v33 = vshll.u32 %v438_v20, 16  ;;  %v668_v34 = vshrl.u32 %v436_v6, 16  ;;  %v447_v14 = vld [vmem:[%s5059_s26 + $0x90] sm:$0xf] }
  0x32   : > { %866 = vrot.lane.b32.xlu1 %v595_v59, %s4992_s27  ;;  %v605_v35 = vsel %vm5070_vm2, %v600_v18, %v604_v19  ;;  %v637_v36 = vor.u32 %v636_v22, %v633_v21  ;;  %v662_v37 = vrot.slane %v661_v23, 4  ;;  %v666_v38 = vrot.slane %v664_v24, 5 }
  0x33   : > { %864 = vrot.lane.b32.xlu0 %v581_v62, %s4992_s27  ;;  %862 = vrot.lane.b32.xlu2 %v571_v3, %s4992_s27  ;;  %v5150_v39 = vrot.slane %v688_v26, 5  ;;  %v694_v40 = vrot.slane %v692_v27, 4  ;;  %v648_v43 = vrot.slane %v647_v31, 4  ;;  %v652_v44 = vrot.slane %v650_v29, 5 }
  0x34   : > { %v681_v45 = vrot.slane %v679_v32, 4  ;;  %v684_v46 = vrot.slane %v682_v33, 5  ;;  %v638_v48 = vrot.slane %v637_v36, 4  ;;  %v670_v50 = vrot.slane %v668_v34, 4 }
  0x35   : > { %v667_v51 = vsel %vm5070_vm2, %v662_v37, %v666_v38  ;;  %v695_v52 = vor.u32 %v694_v40, %v5150_v39  ;;  %v698_v53 = vshll.u32 %v440_v41, 16  ;;  %v727_v55 = vshrl.u32 %v444_v42, 16  ;;  %v449_v37 = vld [vmem:[%s5059_s26 + $0x98] sm:$0x1]  ;;  %v453_v40 = vld [vmem:[%s5059_s26 + $0xa8] sm:$0xf] }
  0x36   : > { %v730_v56 = vshll.u32 %v444_v42, 16  ;;  %v712_v57 = vshll.u32 %v442_v47, 16  ;;  %v716_v58 = vshrl.u32 %v442_v47, 16  ;;  %v653_v59 = vsel %vm5070_vm2, %v648_v43, %v652_v44  ;;  %v451_v42 = vld [vmem:[%s5059_s26 + $0xa0] sm:$0xf] }
  0x37   : > { %v685_v60 = vor.u32 %v684_v46, %v681_v45  ;;  %v674_v61 = vshll.u32 %v437_v49, 16  ;;  %v643_v62 = vsel %vm5070_vm2, %v638_v48, %v5138_v16  ;;  %v671_v63 = vor.u32 %v670_v50, %v666_v38  ;;  %v446_v43 = vld [vmem:[%s5059_s26 + $0x8c] sm:$0x1]  ;;  %v450_v47 = vld [vmem:[%s5059_s26 + $0x9c] sm:$0xf] }
  0x38   : > { %v703_v0 = vshrl.u32 %v441_v54, 16  ;;  %v706_v1 = vshll.u32 %v441_v54, 16  ;;  %v696_v2 = vrot.slane %v695_v52, 4  ;;  %v700_v3 = vrot.slane %v698_v53, 5 }
  0x39   : > { %v729_v5 = vrot.slane %v727_v55, 4  ;;  %v732_v6 = vrot.slane %v730_v56, 5  ;;  %v5170_v7 = vrot.slane %v712_v57, 5  ;;  %v718_v8 = vrot.slane %v716_v58, 4 }
  0x3a   : > { %872 = vrot.lane.b32.xlu1 %v629_v28, %s4992_s27  ;;  %v686_v10 = vrot.slane %v685_v60, 4  ;;  %v672_v12 = vrot.slane %v671_v63, 4  ;;  %v676_v13 = vrot.slane %v674_v61, 5  ;;  %v705_v15 = vrot.slane %v703_v0, 4 }
  0x3b   : > { %870 = vrot.lane.b32.xlu0 %v619_v30, %s4992_s27  ;;  %868 = vrot.lane.b32.xlu2 %v605_v35, %s4992_s27  ;;  %v708_v16 = vrot.slane %v706_v1, 5  ;;  %v736_v17 = vshll.u32 %v445_v4, 16  ;;  %v760_v18 = vshll.u32 %v448_v9, 16  ;;  %v764_v19 = vshrl.u32 %v448_v9, 16  ;;  %v452_v1 = vld [vmem:[%s5059_s26 + $0xa4] sm:$0x1] }
  0x3c   : > { %v701_v20 = vsel %vm5070_vm2, %v696_v2, %v700_v3  ;;  %v733_v21 = vor.u32 %v732_v6, %v729_v5  ;;  %v719_v22 = vor.u32 %v718_v8, %v5170_v7  ;;  %v722_v23 = vshll.u32 %v443_v11, 16  ;;  %v457_v5 = vld [vmem:[%s5059_s26 + $0xb8] sm:$0xf]  ;;  %v456_v8 = vld [vmem:[%s5059_s26 + $0xb4] sm:$0xf] }
  0x3d   : > { %v691_v24 = vsel %vm5070_vm2, %v686_v10, %v5150_v39  ;;  %v751_v26 = vshrl.u32 %v447_v14, 16  ;;  %v754_v27 = vshll.u32 %v447_v14, 16  ;;  %v740_v28 = vshrl.u32 %v445_v4, 16 }
  0x3e   : > { %v677_v29 = vsel %vm5070_vm2, %v672_v12, %v676_v13  ;;  %v709_v30 = vor.u32 %v708_v16, %v705_v15  ;;  %v5185_v31 = vrot.slane %v760_v18, 5  ;;  %v766_v32 = vrot.slane %v764_v19, 4 }
  0x3f   : > { %v734_v33 = vrot.slane %v733_v21, 4  ;;  %v738_v34 = vrot.slane %v736_v17, 5  ;;  %v720_v35 = vrot.slane %v719_v22, 4  ;;  %v724_v36 = vrot.slane %v722_v23, 5 }
  0x40   : > { %v753_v38 = vrot.slane %v751_v26, 4  ;;  %v756_v39 = vrot.slane %v754_v27, 5  ;;  %v710_v41 = vrot.slane %v709_v30, 4  ;;  %v742_v44 = vrot.slane %v740_v28, 4 }
  0x41   : > { %v767_v45 = vor.u32 %v766_v32, %v5185_v31  ;;  %v770_v46 = vshll.u32 %v449_v37, 16  ;;  %v739_v48 = vsel %vm5070_vm2, %v734_v33, %v738_v34  ;;  %v725_v49 = vsel %vm5070_vm2, %v720_v35, %v724_v36  ;;  %v455_v36 = vld [vmem:[%s5059_s26 + $0xb0] sm:$0x1] }
  0x42   : > { %878 = vrot.lane.b32.xlu1 %v667_v51, %s4992_s27  ;;  %v799_v50 = vshrl.u32 %v453_v40, 16  ;;  %v802_v51 = vshll.u32 %v453_v40, 16  ;;  %v757_v52 = vor.u32 %v756_v39, %v753_v38  ;;  %v784_v53 = vshll.u32 %v451_v42, 16 }
  0x43   : > { %876 = vrot.lane.b32.xlu0 %v653_v59, %s4992_s27  ;;  %874 = vrot.lane.b32.xlu2 %v643_v62, %s4992_s27  ;;  %v788_v54 = vshrl.u32 %v451_v42, 16  ;;  %v746_v55 = vshll.u32 %v446_v43, 16  ;;  %v715_v56 = vsel %vm5070_vm2, %v710_v41, %v5170_v7  ;;  %v743_v57 = vor.u32 %v742_v44, %v738_v34  ;;  %v454_v62 = vld [vmem:[%s5059_s26 + $0xac] sm:$0xf] }
  0x44   : > { %v775_v58 = vshrl.u32 %v450_v47, 16  ;;  %v778_v59 = vshll.u32 %v450_v47, 16  ;;  %v768_v60 = vrot.slane %v767_v45, 4  ;;  %v772_v61 = vrot.slane %v770_v46, 5 }
  0x45   : > { %v801_v63 = vrot.slane %v799_v50, 4  ;;  %v804_v0 = vrot.slane %v802_v51, 5  ;;  %v758_v2 = vrot.slane %v757_v52, 4  ;;  %v786_v3 = vrot.slane %v784_v53, 5  ;;  %v978_v51 = vld [vmem:[%s5059_s26 + $0xc] sm:$0xe] }
  0x46   : > { %v790_v4 = vrot.slane %v788_v54, 4  ;;  %v744_v6 = vrot.slane %v743_v57, 4  ;;  %v748_v7 = vrot.slane %v746_v55, 5  ;;  %v777_v9 = vrot.slane %v775_v58, 4  ;;  %v979_v53 = vld [vmem:[%s5059_s26 + $0x10] sm:$0xf] }
  0x47   : > { %v780_v10 = vrot.slane %v778_v59, 5  ;;  %v773_v11 = vsel %vm5070_vm2, %v768_v60, %v772_v61  ;;  %v808_v12 = vshll.u32 %v454_v62, 16  ;;  %v805_v13 = vor.u32 %v804_v0, %v801_v63  ;;  %v977_v54 = vld [vmem:[%s5059_s26 + $0x8] sm:$0x1]  ;;  %v975_v61 = vld [vmem:[%s5059_s26] sm:$0xe] }
  0x48   : > { %v794_v14 = vshll.u32 %v452_v1, 16  ;;  %v832_v15 = vshll.u32 %v457_v5, 16  ;;  %v836_v16 = vshrl.u32 %v457_v5, 16  ;;  %v763_v17 = vsel %vm5070_vm2, %v758_v2, %v5185_v31  ;;  %v458_v31 = vld [vmem:[%s5059_s26 + $0xbc] sm:$0x1] }
  0x49   : > { %v791_v18 = vor.u32 %v790_v4, %v786_v3  ;;  %v823_v19 = vshrl.u32 %v456_v8, 16  ;;  %v812_v21 = vshrl.u32 %v454_v62, 16  ;;  %v749_v22 = vsel %vm5070_vm2, %v744_v6, %v748_v7  ;;  %v982_v63 = vld [vmem:[%s5059_s26 + $0x1c] sm:$0xf]  ;;  %v350_v0 = vld [vmem:[%s5059_s26 + $0x18] sm:$0xf] }
  0x4a   : > { %884 = vrot.lane.b32.xlu1 %v701_v20, %s4992_s27  ;;  %v826_v20 = vshll.u32 %v456_v8, 16  ;;  %v781_v23 = vor.u32 %v780_v10, %v777_v9  ;;  %v810_v26 = vrot.slane %v808_v12, 5  ;;  %v834_v27 = vrot.slane %v832_v15, 5  ;;  %383 = vst.msk [vmem:[#allocation2 + $0x10] sm:$0xf] %vm378_vm5, %v350_v0 }
  0x4b   : > { %882 = vrot.lane.b32.xlu0 %v691_v24, %s4992_s27  ;;  %880 = vrot.lane.b32.xlu2 %v677_v29, %s4992_s27  ;;  %v806_v24 = vrot.slane %v805_v13, 4  ;;  %v838_v28 = vrot.slane %v836_v16, 4  ;;  %v792_v29 = vrot.slane %v791_v18, 4  ;;  %v796_v30 = vrot.slane %v794_v14, 5  ;;  %v348_v2 = vld [vmem:[%s5059_s26 + $0xc] sm:$0xf] }
  0x4c   : > { %v825_v32 = vrot.slane %v823_v19, 4  ;;  %v828_v33 = vrot.slane %v826_v20, 5  ;;  %v782_v34 = vrot.slane %v781_v23, 4  ;;  %v814_v35 = vrot.slane %v812_v21, 4  ;;  %381 = vst.msk [vmem:[#allocation2 + $0x8] sm:$0xf] %vm378_vm5, %v348_v2 }
  0x4d   : > { %v811_v37 = vsel %vm5070_vm2, %v806_v24, %v810_v26  ;;  %v839_v38 = vor.u32 %v838_v28, %v834_v27  ;;  %v842_v39 = vshll.u32 %v458_v31, 16  ;;  %v797_v40 = vsel %vm5070_vm2, %v792_v29, %v796_v30  ;;  %v983_v6 = vld [vmem:[%s5059_s26 + $0x20] sm:$0x1]  ;;  %v981_v9 = vld [vmem:[%s5059_s26 + $0x18] sm:$0xe] }
  0x4e   : > { %v829_v41 = vor.u32 %v828_v33, %v825_v32  ;;  %v787_v42 = vsel %vm5070_vm2, %v782_v34, %v786_v3  ;;  %v815_v43 = vor.u32 %v814_v35, %v810_v26  ;;  %v818_v44 = vshll.u32 %v455_v36, 16  ;;  %v346_v3 = vld [vmem:[%s5059_s26] sm:$0xf]  ;;  %v980_v12 = vld [vmem:[%s5059_s26 + $0x14] sm:$0x1] }
  0x4f   : > { %v840_v45 = vrot.slane %v839_v38, 4  ;;  %v844_v46 = vrot.slane %v842_v39, 5  ;;  %v4446_v58 = vrot.slane %v978_v51, 9  ;;  %v1083_v59 = vrot.slane %v979_v53, 5  ;;  %379 = vst.msk [vmem:[#allocation2] sm:$0xf] %vm378_vm5, %v346_v3 }
  0x50   : > { %v830_v47 = vrot.slane %v829_v41, 4  ;;  %v820_v50 = vrot.slane %v818_v44, 5  ;;  %v1079_v60 = vrot.slane %v977_v54, 5  ;;  %v4445_v4 = vrot.slane %v975_v61, 9  ;;  %v985_v15 = vld [vmem:[%s5059_s26 + $0x28] sm:$0xf] }
  0x51   : > { %v845_v52 = vsel %vm5070_vm2, %v840_v45, %v844_v46  ;;  %v1084_v5 = vsel %vm5245_vm6, %v4446_v58, %v1083_v59  ;;  %v1090_v7 = vrot.slane %v982_v63, 5  ;;  %v4447_v14 = vrot.slane %v981_v9, 9  ;;  %v351_v16 = vld [vmem:[%s5059_s26 + $0x1c] sm:$0xf]  ;;  %v347_v18 = vld [vmem:[%s5059_s26 + $0x4] sm:$0xf] }
  0x52   : > { %890 = vrot.lane.b32.xlu1 %v739_v48, %s4992_s27  ;;  %v976_v48 = vld [vmem:[%s5059_s26 + $0x4] sm:$0xf]  ;;  %384 = vst.msk [vmem:[#allocation2 + $0x14] sm:$0xf] %vm378_vm5, %v351_v16  ;;  %v1085_v19 = vrot.slane %v1083_v59, 4  ;;  %v1086_v20 = vrot.slane %v980_v12, 5 }
  0x53   : > { %888 = vrot.lane.b32.xlu0 %v725_v49, %s4992_s27  ;;  %886 = vrot.lane.b32.xlu2 %v715_v56, %s4992_s27  ;;  %v816_v49 = vrot.slane %v815_v43, 4  ;;  %v1076_v55 = vrot.slane %v976_v48, 5  ;;  %v835_v56 = vsel %vm5070_vm2, %v830_v47, %v834_v27  ;;  %v1092_v13 = vrot.slane %v1090_v7, 4  ;;  %380 = vst.msk [vmem:[#allocation2 + $0x4] sm:$0xf] %vm378_vm5, %v347_v18 }
  0x54   : > { %v988_v23 = vld [vmem:[%s5059_s26 + $0x34] sm:$0xf]  ;;  %v1097_v24 = vrot.slane %v985_v15, 5  ;;  %v1091_v26 = vsel %vm5245_vm6, %v4447_v14, %v1090_v7  ;;  %v986_v27 = vld [vmem:[%s5059_s26 + $0x2c] sm:$0x1]  ;;  %v1087_v28 = vsel %vm5245_vm6, %v1085_v19, %v1086_v20  ;;  %vm3849_vm1 = vcmask 290048  }
  0x55   : > { %v821_v57 = vsel %vm5070_vm2, %v816_v49, %v820_v50  ;;  %v1078_v62 = vrot.slane %v1076_v55, 4  ;;  %v1077_v10 = vsel %vm5245_vm6, %v4445_v4, %v1076_v55  ;;  %v1104_v30 = vrot.slane %v988_v23, 5  ;;  %v984_v31 = vld [vmem:[%s5059_s26 + $0x24] sm:$0xe]  ;;  %v991_v34 = vld [vmem:[%s5059_s26 + $0x40] sm:$0xf] }
  0x56   : > { %v1099_v32 = vrot.slane %v1097_v24, 4  ;;  %v1100_v33 = vrot.slane %v986_v27, 5  ;;  %v354_v35 = vld [vmem:[%s5059_s26 + $0x30] sm:$0xf]  ;;  %v353_v36 = vld [vmem:[%s5059_s26 + $0x28] sm:$0xf] }
  0x57   : > { %v1080_v8 = vsel %vm5245_vm6, %v1078_v62, %v1079_v60  ;;  %387 = vst.msk [vmem:[#allocation2 + $0x20] sm:$0xf] %vm378_vm5, %v354_v35  ;;  %v4448_v38 = vrot.slane %v984_v31, 9  ;;  %v1111_v41 = vrot.slane %v991_v34, 5  ;;  %v992_v43 = vld [vmem:[%s5059_s26 + $0x44] sm:$0x1] }
  0x58   : > { %386 = vst.msk [vmem:[#allocation2 + $0x1c] sm:$0xf] %vm378_vm5, %v353_v36  ;;  %v990_v44 = vld [vmem:[%s5059_s26 + $0x3c] sm:$0xe]  ;;  %v989_v46 = vld [vmem:[%s5059_s26 + $0x38] sm:$0x1] }
  0x59   : > { %v1098_v45 = vsel %vm5245_vm6, %v4448_v38, %v1097_v24  ;;  %v1113_v47 = vrot.slane %v1111_v41, 4  ;;  %v1114_v48 = vrot.slane %v992_v43, 5  ;;  %v4450_v49 = vrot.slane %v990_v44, 9  ;;  %v357_v50 = vld [vmem:[%s5059_s26 + $0x40] sm:$0xf] }
  0x5a   : > { %896 = vrot.lane.b32.xlu1 %v773_v11, %s4992_s27  ;;  %v1093_v11 = vrot.slane %v983_v6, 5  ;;  %390 = vst.msk [vmem:[#allocation2 + $0x2c] sm:$0xf] %vm378_vm5, %v357_v50  ;;  %v356_v51 = vld [vmem:[%s5059_s26 + $0x3c] sm:$0xf]  ;;  %v1106_v54 = vrot.slane %v1104_v30, 4 }
  0x5b   : > { %894 = vrot.lane.b32.xlu0 %v763_v17, %s4992_s27  ;;  %892 = vrot.lane.b32.xlu2 %v749_v22, %s4992_s27  ;;  %v349_v17 = vld [vmem:[%s5059_s26 + $0x10] sm:$0xf]  ;;  %v994_v53 = vld [vmem:[%s5059_s26 + $0x4c] sm:$0xf]  ;;  %v1107_v55 = vrot.slane %v989_v46, 5  ;;  %v1112_v58 = vsel %vm5245_vm6, %v4450_v49, %v1111_v41  ;;  %vm4018_vm3 = vcmask 293888  }
  0x5c   : > { %382 = vst.msk [vmem:[#allocation2 + $0xc] sm:$0xf] %vm378_vm5, %v349_v17  ;;  %v1094_v21 = vsel %vm5245_vm6, %v1092_v13, %v1093_v11  ;;  %v987_v22 = vld [vmem:[%s5059_s26 + $0x30] sm:$0xe]  ;;  %v996_v59 = vld [vmem:[%s5059_s26 + $0x54] sm:$0xe] }
  0x5d   : > { %v4449_v29 = vrot.slane %v987_v22, 9  ;;  %389 = vst.msk [vmem:[#allocation2 + $0x28] sm:$0xf] %vm378_vm5, %v356_v51  ;;  %v997_v60 = vld [vmem:[%s5059_s26 + $0x58] sm:$0xf]  ;;  %v1118_v61 = vrot.slane %v994_v53, 5  ;;  %v1108_v63 = vsel %vm5245_vm6, %v1106_v54, %v1107_v55 }
  0x5e   : > { %v995_v62 = vld [vmem:[%s5059_s26 + $0x50] sm:$0x1]  ;;  %v993_v0 = vld [vmem:[%s5059_s26 + $0x48] sm:$0xe]  ;;  %v4452_v2 = vrot.slane %v996_v59, 9  ;;  %v1125_v3 = vrot.slane %v997_v60, 5 }
  0x5f   : > { %v360_v4 = vld [vmem:[%s5059_s26 + $0x54] sm:$0xf]  ;;  %v1120_v6 = vrot.slane %v1118_v61, 4  ;;  %v1121_v7 = vrot.slane %v995_v62, 5  ;;  %v359_v11 = vld [vmem:[%s5059_s26 + $0x4c] sm:$0xf] }
  0x60   : > { %393 = vst.msk [vmem:[#allocation2 + $0x38] sm:$0xf] %vm378_vm5, %v360_v4  ;;  %v358_v13 = vld [vmem:[%s5059_s26 + $0x48] sm:$0xf]  ;;  %v1126_v14 = vsel %vm5245_vm6, %v4452_v2, %v1125_v3  ;;  %v999_v18 = vld [vmem:[%s5059_s26 + $0x60] sm:$0xe] }
  0x61   : > { %v1122_v16 = vsel %vm5245_vm6, %v1120_v6, %v1121_v7  ;;  %v1001_v17 = vld [vmem:[%s5059_s26 + $0x68] sm:$0x1]  ;;  %392 = vst.msk [vmem:[#allocation2 + $0x34] sm:$0xf] %vm378_vm5, %v359_v11  ;;  %v998_v20 = vld [vmem:[%s5059_s26 + $0x5c] sm:$0x1] }
  0x62   : > { %902 = vrot.lane.b32.xlu1 %v811_v37, %s4992_s27  ;;  %v352_v37 = vld [vmem:[%s5059_s26 + $0x24] sm:$0xf]  ;;  %391 = vst.msk [vmem:[#allocation2 + $0x30] sm:$0xf] %vm378_vm5, %v358_v13  ;;  %v1135_v22 = vrot.slane %v1001_v17, 5 }
  0x63   : > { %900 = vrot.lane.b32.xlu0 %v797_v40, %s4992_s27  ;;  %898 = vrot.lane.b32.xlu2 %v787_v42, %s4992_s27  ;;  %385 = vst.msk [vmem:[#allocation2 + $0x18] sm:$0xf] %vm378_vm5, %v352_v37  ;;  %v1105_v40 = vsel %vm5245_vm6, %v4449_v29, %v1104_v30  ;;  %v1101_v42 = vsel %vm5245_vm6, %v1099_v32, %v1100_v33  ;;  %v363_v23 = vld [vmem:[%s5059_s26 + $0x64] sm:$0xf]  ;;  %v1003_v27 = vld [vmem:[%s5059_s26 + $0x70] sm:$0xf] }
  0x64   : > { %396 = vst.msk [vmem:[#allocation2 + $0x44] sm:$0xf] %vm378_vm5, %v363_v23  ;;  %v1127_v29 = vrot.slane %v1125_v3, 4  ;;  %v1128_v30 = vrot.slane %v998_v20, 5  ;;  %v362_v31 = vld [vmem:[%s5059_s26 + $0x60] sm:$0xf] }
  0x65   : > { %v361_v33 = vld [vmem:[%s5059_s26 + $0x58] sm:$0xf]  ;;  %v1006_v37 = vld [vmem:[%s5059_s26 + $0x7c] sm:$0xf]  ;;  %v1139_v38 = vrot.slane %v1003_v27, 5 }
  0x66   : > { %v1005_v35 = vld [vmem:[%s5059_s26 + $0x78] sm:$0xe]  ;;  %395 = vst.msk [vmem:[#allocation2 + $0x40] sm:$0xf] %vm378_vm5, %v362_v31  ;;  %v1002_v41 = vld [vmem:[%s5059_s26 + $0x6c] sm:$0xe] }
  0x67   : > { %394 = vst.msk [vmem:[#allocation2 + $0x3c] sm:$0xf] %vm378_vm5, %v361_v33  ;;  %v1146_v43 = vrot.slane %v1006_v37, 5  ;;  %v366_v44 = vld [vmem:[%s5059_s26 + $0x78] sm:$0xf]  ;;  %v1141_v46 = vrot.slane %v1139_v38, 4 }
  0x68   : > { %399 = vst.msk [vmem:[#allocation2 + $0x50] sm:$0xf] %vm378_vm5, %v366_v44  ;;  %v4454_v50 = vrot.slane %v1002_v41, 9  ;;  %v365_v51 = vld [vmem:[%s5059_s26 + $0x70] sm:$0xf] }
  0x69   : > { %v364_v53 = vld [vmem:[%s5059_s26 + $0x6c] sm:$0xf]  ;;  %398 = vst.msk [vmem:[#allocation2 + $0x4c] sm:$0xf] %vm378_vm5, %v365_v51  ;;  %v1007_v60 = vld [vmem:[%s5059_s26 + $0x80] sm:$0x1] }
  0x6a   : > { %908 = vrot.lane.b32.xlu1 %v845_v52, %s4992_s27  ;;  %v355_v52 = vld [vmem:[%s5059_s26 + $0x34] sm:$0xf]  ;;  %v1140_v59 = vsel %vm5245_vm6, %v4454_v50, %v1139_v38  ;;  %397 = vst.msk [vmem:[#allocation2 + $0x48] sm:$0xf] %vm378_vm5, %v364_v53  ;;  %v1149_v6 = vrot.slane %v1007_v60, 5  ;;  %v4461_v51 = vld [vmem:[%s5059_s26 + $0xc] sm:$0xff]  }
  0x6b   : > { %906 = vrot.lane.b32.xlu0 %v835_v56, %s4992_s27  ;;  %904 = vrot.lane.b32.xlu2 %v821_v57, %s4992_s27  ;;  %388 = vst.msk [vmem:[#allocation2 + $0x24] sm:$0xf] %vm378_vm5, %v355_v52  ;;  %v1115_v57 = vsel %vm5245_vm6, %v1113_v47, %v1114_v48  ;;  %v1009_v48 = vld [vmem:[%s5059_s26 + $0x88] sm:$0xf]  ;;  %v1012_v3 = vld [vmem:[%s5059_s26 + $0x94] sm:$0xf] }
  0x6c   : > { %v1153_v55 = vrot.slane %v1009_v48, 5  ;;  %v368_v7 = vld [vmem:[%s5059_s26 + $0x84] sm:$0xf]  ;;  %v1014_v11 = vld [vmem:[%s5059_s26 + $0x9c] sm:$0xe] }
  0x6d   : > { %v1015_v13 = vld [vmem:[%s5059_s26 + $0xa0] sm:$0xf]  ;;  %401 = vst.msk [vmem:[#allocation2 + $0x58] sm:$0xf] %vm378_vm5, %v368_v7  ;;  %v1011_v17 = vld [vmem:[%s5059_s26 + $0x90] sm:$0xe] }
  0x6e   : > { %v372_v20 = vld [vmem:[%s5059_s26 + $0x9c] sm:$0xf]  ;;  %v4457_v27 = vrot.slane %v1011_v17, 9  ;;  %v1016_v37 = vld [vmem:[%s5059_s26 + $0xa4] sm:$0x1] }
  0x6f   : > { %405 = vst.msk [vmem:[#allocation2 + $0x68] sm:$0xf] %vm378_vm5, %v372_v20 }
  0x72   : > { %1190 = vrot.lane.b32.xlu1 %v1084_v5, %s4993_s28 }
  0x73   : > { %1188 = vrot.lane.b32.xlu0 %v1080_v8, %s4993_s28  ;;  %1186 = vrot.lane.b32.xlu2 %v1077_v10, %s4993_s28  ;;  %v1000_v8 = vld [vmem:[%s5059_s26 + $0x64] sm:$0xf]  ;;  %v4451_v10 = vrot.slane %v993_v0, 9 }
  0x74   : > { %v1132_v15 = vrot.slane %v1000_v8, 5 }
  0x75   : > { %v1119_v19 = vsel %vm5245_vm6, %v4451_v10, %v1118_v61  ;;  %v1155_v61 = vrot.slane %v1153_v55, 4 }
  0x7a   : > { %1196 = vrot.lane.b32.xlu1 %v1094_v21, %s4993_s28  ;;  %v1134_v21 = vrot.slane %v1132_v15, 4 }
  0x7b   : > { %1194 = vrot.lane.b32.xlu0 %v1091_v26, %s4993_s28  ;;  %1192 = vrot.lane.b32.xlu2 %v1087_v28, %s4993_s28  ;;  %v4453_v26 = vrot.slane %v999_v18, 9  ;;  %v4458_v18 = vrot.slane %v1014_v11, 9 }
  0x7c   : > { %v1136_v34 = vsel %vm5245_vm6, %v1134_v21, %v1135_v22 }
  0x7d   : > { %v855_v39 = vpop.permute.xlu2 %854  ;;  %v1133_v36 = vsel %vm5245_vm6, %v4453_v26, %v1132_v15  ;;  %v1013_v15 = vld [vmem:[%s5059_s26 + $0x98] sm:$0x1] }
  0x7e   : > { %947 = vst.msk [vmem:[#allocation2 + $0x10] sm:$0xf] %vm942_vm7, %v855_v39  ;;  %v1004_v39 = vld [vmem:[%s5059_s26 + $0x74] sm:$0x1]  ;;  %v1163_v23 = vrot.slane %v1013_v15, 5 }
  0x7f   : > { %v1142_v47 = vrot.slane %v1004_v39, 5  ;;  %v4910_v15 = vld [vmem:[%s5059_s26 + $0x30] sm:$0xff]  }
  0x82   : > { %1202 = vrot.lane.b32.xlu1 %v1105_v40, %s4993_s28  ;;  %v1129_v40 = vsel %vm5245_vm6, %v1127_v29, %v1128_v30  ;;  %v370_v30 = vld [vmem:[%s5059_s26 + $0x90] sm:$0xf] }
  0x83   : > { %1200 = vrot.lane.b32.xlu0 %v1101_v42, %s4993_s28  ;;  %1198 = vrot.lane.b32.xlu2 %v1098_v45, %s4993_s28  ;;  %v4455_v42 = vrot.slane %v1005_v35, 9  ;;  %v1017_v35 = vld [vmem:[%s5059_s26 + $0xa8] sm:$0xe]  ;;  %403 = vst.msk [vmem:[#allocation2 + $0x60] sm:$0xf] %vm378_vm5, %v370_v30 }
  0x85   : > { %v857_v56 = vpop.permute.xlu2 %856  ;;  %v1147_v54 = vsel %vm5245_vm6, %v4455_v42, %v1146_v43  ;;  %v4459_v42 = vrot.slane %v1017_v35, 9 }
  0x86   : > { %948 = vst.msk [vmem:[#allocation2 + $0x14] sm:$0xf] %vm942_vm7, %v857_v56  ;;  %v1143_v56 = vsel %vm5245_vm6, %v1141_v46, %v1142_v47  ;;  %v1170_v46 = vrot.slane %v1016_v37, 5  ;;  %v374_v47 = vld [vmem:[%s5059_s26 + $0xa8] sm:$0xf]  ;;  %v4473_v37 = vld [vmem:[%s5059_s26 + $0x54] sm:$0xff]  }
  0x87   : > { %407 = vst.msk [vmem:[#allocation2 + $0x70] sm:$0xf] %vm378_vm5, %v374_v47 }
  0x8a   : > { %1208 = vrot.lane.b32.xlu1 %v1115_v57, %s4993_s28  ;;  %v1010_v57 = vld [vmem:[%s5059_s26 + $0x8c] sm:$0x1] }
  0x8b   : > { %1206 = vrot.lane.b32.xlu0 %v1112_v58, %s4993_s28  ;;  %1204 = vrot.lane.b32.xlu2 %v1108_v63, %s4993_s28  ;;  %v1008_v58 = vld [vmem:[%s5059_s26 + $0x84] sm:$0xe]  ;;  %v1156_v62 = vrot.slane %v1010_v57, 5  ;;  %v369_v63 = vld [vmem:[%s5059_s26 + $0x88] sm:$0xf] }
  0x8c   : > { %v851_v5 = vpop.permute.xlu1 %850  ;;  %v4456_v2 = vrot.slane %v1008_v58, 9  ;;  %402 = vst.msk [vmem:[#allocation2 + $0x5c] sm:$0xf] %vm378_vm5, %v369_v63  ;;  %v1020_v57 = vld [vmem:[%s5059_s26 + $0xb4] sm:$0xe] }
  0x8d   : > { %945 = vst.msk [vmem:[#allocation2 + $0x8] sm:$0xf] %vm942_vm7, %v851_v5  ;;  %v847_v9 = vpop.permute.xlu0 %846  ;;  %v863_v12 = vpop.permute.xlu2 %862  ;;  %v1148_v5 = vrot.slane %v1146_v43, 4  ;;  %v1157_v10 = vsel %vm5245_vm6, %v1155_v61, %v1156_v62  ;;  %v1021_v43 = vld [vmem:[%s5059_s26 + $0xb8] sm:$0xf]  ;;  %v4460_v62 = vrot.slane %v1020_v57, 9 }
  0x8e   : > { %943 = vst.msk [vmem:[#allocation2] sm:$0xf] %vm942_vm7, %v847_v9  ;;  %v367_v9 = vld [vmem:[%s5059_s26 + $0x7c] sm:$0xf]  ;;  %v1181_v53 = vrot.slane %v1021_v43, 5 }
  0x8f   : > { %951 = vst.msk [vmem:[#allocation2 + $0x20] sm:$0xf] %vm942_vm7, %v863_v12  ;;  %v1154_v12 = vsel %vm5245_vm6, %v4456_v2, %v1153_v55  ;;  %v377_v63 = vld [vmem:[%s5059_s26 + $0xb8] sm:$0xf] }
  0x90   : > { %400 = vst.msk [vmem:[#allocation2 + $0x54] sm:$0xf] %vm378_vm5, %v367_v9 }
  0x91   : > { %410 = vst.msk [vmem:[#allocation2 + $0x7c] sm:$0xf] %vm378_vm5, %v377_v63 }
  0x92   : > { %1214 = vrot.lane.b32.xlu1 %v1126_v14, %s4993_s28  ;;  %v1160_v14 = vrot.slane %v1012_v3, 5  ;;  %v376_v3 = vld [vmem:[%s5059_s26 + $0xb4] sm:$0xf] }
  0x93   : > { %1212 = vrot.lane.b32.xlu0 %v1122_v16, %s4993_s28  ;;  %1210 = vrot.lane.b32.xlu2 %v1119_v19, %s4993_s28  ;;  %v1150_v16 = vsel %vm5245_vm6, %v1148_v5, %v1149_v6  ;;  %v1167_v19 = vrot.slane %v1015_v13, 5  ;;  %v1182_v6 = vsel %vm5245_vm6, %v4460_v62, %v1181_v53  ;;  %409 = vst.msk [vmem:[#allocation2 + $0x78] sm:$0xf] %vm378_vm5, %v376_v3 }
  0x94   : > { %v853_v24 = vpop.permute.xlu1 %852  ;;  %v1162_v22 = vrot.slane %v1160_v14, 4 }
  0x95   : > { %946 = vst.msk [vmem:[#allocation2 + $0xc] sm:$0xf] %vm942_vm7, %v853_v24  ;;  %v849_v28 = vpop.permute.xlu0 %848  ;;  %v869_v32 = vpop.permute.xlu2 %868  ;;  %v1018_v24 = vld [vmem:[%s5059_s26 + $0xac] sm:$0xf]  ;;  %v1168_v31 = vsel %vm5245_vm6, %v4458_v18, %v1167_v19  ;;  %v4851_v18 = vunpack.c.l.b16 %v4910_v15 }
  0x96   : > { %944 = vst.msk [vmem:[#allocation2 + $0x4] sm:$0xf] %vm942_vm7, %v849_v28  ;;  %v371_v28 = vld [vmem:[%s5059_s26 + $0x94] sm:$0xf]  ;;  %v1164_v33 = vsel %vm5245_vm6, %v1162_v22, %v1163_v23 }
  0x97   : > { %954 = vst.msk [vmem:[#allocation2 + $0x2c] sm:$0xf] %vm942_vm7, %v869_v32  ;;  %v1174_v32 = vrot.slane %v1018_v24, 5  ;;  %v1418_v23 = vpack.c.b16 %v4851_v18, %v4851_v18 }
  0x98   : > { %404 = vst.msk [vmem:[#allocation2 + $0x64] sm:$0xf] %vm378_vm5, %v371_v28 }
  0x99   : > { %v1176_v38 = vrot.slane %v1174_v32, 4 }
  0x9a   : > { %1220 = vrot.lane.b32.xlu1 %v1136_v34, %s4993_s28  ;;  %v1019_v34 = vld [vmem:[%s5059_s26 + $0xb0] sm:$0x1] }
  0x9b   : > { %1218 = vrot.lane.b32.xlu0 %v1133_v36, %s4993_s28  ;;  %1216 = vrot.lane.b32.xlu2 %v1129_v40, %s4993_s28  ;;  %v1161_v36 = vsel %vm5245_vm6, %v4457_v27, %v1160_v14  ;;  %v1177_v39 = vrot.slane %v1019_v34, 5  ;;  %v375_v40 = vld [vmem:[%s5059_s26 + $0xac] sm:$0xf]  ;;  %v4470_v27 = vld [vmem:[%s5059_s26 + $0x3c] sm:$0xff]  }
  0x9c   : > { %v861_v45 = vpop.permute.xlu1 %860  ;;  %408 = vst.msk [vmem:[#allocation2 + $0x74] sm:$0xf] %vm378_vm5, %v375_v40  ;;  %v1386_v30 = vunpack.c.l.b16 %v4470_v27  ;;  %v1390_v40 = vunpack.c.l.b16 %v4473_v37 }
  0x9d   : > { %950 = vst.msk [vmem:[#allocation2 + $0x1c] sm:$0xf] %vm942_vm7, %v861_v45  ;;  %v859_v49 = vpop.permute.xlu0 %858  ;;  %v875_v52 = vpop.permute.xlu2 %874  ;;  %v1169_v45 = vrot.slane %v1167_v19, 4  ;;  %v1178_v50 = vsel %vm5245_vm6, %v1176_v38, %v1177_v39  ;;  %v4911_v38 = vld [vmem:[%s5059_s26 + $0x48] sm:$0xff]  }
  0x9e   : > { %949 = vst.msk [vmem:[#allocation2 + $0x18] sm:$0xf] %vm942_vm7, %v859_v49  ;;  %v373_v49 = vld [vmem:[%s5059_s26 + $0xa0] sm:$0xf]  ;;  %v4855_v43 = vunpack.c.l.b16 %v4911_v38 }
  0x9f   : > { %957 = vst.msk [vmem:[#allocation2 + $0x38] sm:$0xf] %vm942_vm7, %v875_v52  ;;  %v1175_v52 = vsel %vm5245_vm6, %v4459_v42, %v1174_v32  ;;  %v1171_v55 = vsel %vm5245_vm6, %v1169_v45, %v1170_v46  ;;  %v4852_v32 = vunpack.c.h.b16 %v4910_v15  ;;  %v1424_v45 = vpack.c.b16 %v1390_v40, %v1390_v40 }
  0xa0   : > { %406 = vst.msk [vmem:[#allocation2 + $0x6c] sm:$0xf] %vm378_vm5, %v373_v49  ;;  %v1422_v49 = vpack.c.b16 %v4855_v43, %v4855_v43  ;;  %vm4290_vm5 = vcmask 257024  }
  0xa1   : > { %v1419_v39 = vpack.c.b16 %v4852_v32, %v4852_v32 }
  0xa2   : > { %1226 = vrot.lane.b32.xlu1 %v1147_v54, %s4993_s28  ;;  %v1022_v54 = vld [vmem:[%s5059_s26 + $0xbc] sm:$0x1] }
  0xa3   : > { %1224 = vrot.lane.b32.xlu0 %v1143_v56, %s4993_s28  ;;  %1222 = vrot.lane.b32.xlu2 %v1140_v59, %s4993_s28  ;;  %v1378_v56 = vunpack.c.l.b16 %v4461_v51  ;;  %v1183_v59 = vrot.slane %v1181_v53, 4  ;;  %v1184_v60 = vrot.slane %v1022_v54, 5  ;;  %v1391_v53 = vunpack.c.h.b16 %v4473_v37 }
  0xa4   : > { %v867_v0 = vpop.permute.xlu1 %866 }
  0xa5   : > { %953 = vst.msk [vmem:[#allocation2 + $0x28] sm:$0xf] %vm942_vm7, %v867_v0  ;;  %v865_v4 = vpop.permute.xlu0 %864  ;;  %v881_v8 = vpop.permute.xlu2 %880  ;;  %v1412_v0 = vpack.c.b16 %v1378_v56, %v1378_v56  ;;  %v1185_v5 = vsel %vm5245_vm6, %v1183_v59, %v1184_v60  ;;  %v4478_v59 = vld [vmem:[%s5059_s26 + $0x6c] sm:$0xff]   ;;  %v1425_v60 = vpack.c.b16 %v1391_v53, %v1391_v53 }
  0xa6   : > { %952 = vst.msk [vmem:[#allocation2 + $0x24] sm:$0xf] %vm942_vm7, %v865_v4  ;;  %v4909_v4 = vld [vmem:[%s5059_s26 + $0x18] sm:$0xff]   ;;  %v1395_v62 = vunpack.c.h.b16 %v4478_v59 }
  0xa7   : > { %960 = vst.msk [vmem:[#allocation2 + $0x44] sm:$0xf] %vm942_vm7, %v881_v8  ;;  %v4848_v7 = vunpack.c.h.b16 %v4909_v4  ;;  %v4847_v8 = vunpack.c.l.b16 %v4909_v4 }
  0xa9   : > { %v1414_v14 = vpack.c.b16 %v4847_v8, %v4847_v8 }
  0xaa   : > { %1232 = vrot.lane.b32.xlu1 %v1157_v10, %s4993_s28  ;;  %v1379_v10 = vunpack.c.h.b16 %v4461_v51 }
  0xab   : > { %1230 = vrot.lane.b32.xlu0 %v1154_v12, %s4993_s28  ;;  %1228 = vrot.lane.b32.xlu2 %v1150_v16, %s4993_s28  ;;  %v1415_v12 = vpack.c.b16 %v4848_v7, %v4848_v7  ;;  %v4466_v16 = vld [vmem:[%s5059_s26 + $0x24] sm:$0xff]  }
  0xac   : > { %v873_v21 = vpop.permute.xlu1 %872  ;;  %v1413_v17 = vpack.c.b16 %v1379_v10, %v1379_v10  ;;  %v1383_v19 = vunpack.c.h.b16 %v4466_v16 }
  0xad   : > { %956 = vst.msk [vmem:[#allocation2 + $0x34] sm:$0xf] %vm942_vm7, %v873_v21  ;;  %v871_v26 = vpop.permute.xlu0 %870  ;;  %v887_v29 = vpop.permute.xlu2 %886  ;;  %v1382_v21 = vunpack.c.l.b16 %v4466_v16  ;;  %v5525_v16 = vld [vmem:[%s5059_s26 + $0x9c] sm:$0xff]  }
  0xae   : > { %955 = vst.msk [vmem:[#allocation2 + $0x30] sm:$0xf] %vm942_vm7, %v871_v26  ;;  %v1417_v26 = vpack.c.b16 %v1383_v19, %v1383_v19  ;;  %v4492_v19 = vld [vmem:[%s5059_s26 + $0x10] sm:$0xf] }
  0xaf   : > { %963 = vst.msk [vmem:[#allocation2 + $0x50] sm:$0xf] %vm942_vm7, %v887_v29  ;;  %v1416_v28 = vpack.c.b16 %v1382_v21, %v1382_v21  ;;  %v1387_v29 = vunpack.c.h.b16 %v4470_v27  ;;  %v4491_v21 = vld [vmem:[%s5059_s26 + $0xc] sm:$0xf]  ;;  %v1632_v27 = vshrl.u32 %v4492_v19, 16 }
  0xb1   : > { %v1421_v34 = vpack.c.b16 %v1387_v29, %v1387_v29  ;;  %v1619_v29 = vshrl.u32 %v4491_v21, 16 }
  0xb2   : > { %1238 = vrot.lane.b32.xlu1 %v1168_v31, %s4993_s28 }
  0xb3   : > { %1236 = vrot.lane.b32.xlu0 %v1164_v33, %s4993_s28  ;;  %1234 = vrot.lane.b32.xlu2 %v1161_v36, %s4993_s28  ;;  %v1420_v36 = vpack.c.b16 %v1386_v30, %v1386_v30  ;;  %v1622_v30 = vshll.u32 %v4491_v21, 16 }
  0xb4   : > { %v879_v41 = vpop.permute.xlu1 %878 }
  0xb5   : > { %959 = vst.msk [vmem:[#allocation2 + $0x40] sm:$0xf] %vm942_vm7, %v879_v41  ;;  %v877_v44 = vpop.permute.xlu0 %876  ;;  %v893_v48 = vpop.permute.xlu2 %892  ;;  %v4856_v41 = vunpack.c.h.b16 %v4911_v38  ;;  %v1634_v38 = vrot.slane %v1632_v27, 4  ;;  %v1624_v40 = vrot.slane %v1622_v30, 5 }
  0xb6   : > { %958 = vst.msk [vmem:[#allocation2 + $0x3c] sm:$0xf] %vm942_vm7, %v877_v44 }
  0xb7   : > { %966 = vst.msk [vmem:[#allocation2 + $0x5c] sm:$0xf] %vm942_vm7, %v893_v48  ;;  %v1423_v47 = vpack.c.b16 %v4856_v41, %v4856_v41  ;;  %v4912_v48 = vld [vmem:[%s5059_s26 + $0x60] sm:$0xff]  }
  0xb8   : > { %v4859_v51 = vunpack.c.l.b16 %v4912_v48 }
  0xba   : > { %1244 = vrot.lane.b32.xlu1 %v1178_v50, %s4993_s28  ;;  %v4860_v50 = vunpack.c.h.b16 %v4912_v48  ;;  %v1426_v57 = vpack.c.b16 %v4859_v51, %v4859_v51  ;;  %v5555_v48 = vld [vmem:[%s5547_s8] sm:$0xff]  }
  0xbb   : > { %1242 = vrot.lane.b32.xlu0 %v1175_v52, %s4993_s28  ;;  %1240 = vrot.lane.b32.xlu2 %v1171_v55, %s4993_s28 }
  0xbc   : > { %v885_v58 = vpop.permute.xlu1 %884  ;;  %v1427_v55 = vpack.c.b16 %v4860_v50, %v4860_v50 }
  0xbd   : > { %962 = vst.msk [vmem:[#allocation2 + $0x4c] sm:$0xf] %vm942_vm7, %v885_v58  ;;  %v883_v61 = vpop.permute.xlu0 %882  ;;  %v899_v2 = vpop.permute.xlu2 %898  ;;  %v4913_v58 = vld [vmem:[%s5059_s26 + $0x78] sm:$0xff]  }
  0xbe   : > { %961 = vst.msk [vmem:[#allocation2 + $0x48] sm:$0xf] %vm942_vm7, %v883_v61  ;;  %v4863_v61 = vunpack.c.l.b16 %v4913_v58 }
  0xbf   : > { %969 = vst.msk [vmem:[#allocation2 + $0x68] sm:$0xf] %vm942_vm7, %v899_v2 }
  0xc0   : > { %v1430_v3 = vpack.c.b16 %v4863_v61, %v4863_v61  ;;  %v4494_v61 = vld [vmem:[%s5059_s26 + $0x18] sm:$0xf] }
  0xc2   : > { %1444 = vrot.lane.b32.xlu1 %v1412_v0, %s4994_s29  ;;  %v1394_v0 = vunpack.c.l.b16 %v4478_v59 }
  0xc3   : > { %1248 = vrot.lane.b32.xlu0 %v1185_v5, %s4993_s28  ;;  %1246 = vrot.lane.b32.xlu2 %v1182_v6, %s4993_s28  ;;  %v1429_v5 = vpack.c.b16 %v1395_v62, %v1395_v62  ;;  %v4482_v6 = vld [vmem:[%s5059_s26 + $0x84] sm:$0xff]  }
  0xc4   : > { %v891_v9 = vpop.permute.xlu1 %890  ;;  %v1428_v7 = vpack.c.b16 %v1394_v0, %v1394_v0  ;;  %v1399_v8 = vunpack.c.h.b16 %v4482_v6  ;;  %v4875_v0 = vunpack.c.l.b16 %v5555_v48 }
  0xc5   : > { %965 = vst.msk [vmem:[#allocation2 + $0x58] sm:$0xf] %vm942_vm7, %v891_v9  ;;  %v889_v11 = vpop.permute.xlu0 %888  ;;  %v905_v13 = vpop.permute.xlu2 %904  ;;  %v1398_v9 = vunpack.c.l.b16 %v4482_v6  ;;  %v4500_v6 = vld [vmem:[%s5059_s26 + $0x30] sm:$0xf] }
  0xc6   : > { %964 = vst.msk [vmem:[#allocation2 + $0x54] sm:$0xf] %vm942_vm7, %v889_v11  ;;  %v4864_v11 = vunpack.c.h.b16 %v4913_v58  ;;  %v1442_v21 = vpack.c.b16 %v4875_v0, %v4875_v0 }
  0xc7   : > { %972 = vst.msk [vmem:[#allocation2 + $0x74] sm:$0xf] %vm942_vm7, %v905_v13  ;;  %v1433_v13 = vpack.c.b16 %v1399_v8, %v1399_v8  ;;  %v1432_v15 = vpack.c.b16 %v1398_v9, %v1398_v9  ;;  %v1643_v9 = vshrl.u32 %v4494_v61, 16 }
  0xc8   : > { %v1431_v18 = vpack.c.b16 %v4864_v11, %v4864_v11 }
  0xca   : > { %1450 = vrot.lane.b32.xlu1 %v1415_v12, %s4994_s29 }
  0xcb   : > { %1448 = vrot.lane.b32.xlu0 %v1414_v14, %s4994_s29  ;;  %1446 = vrot.lane.b32.xlu2 %v1413_v17, %s4994_s29  ;;  %v4914_v17 = vld [vmem:[%s5059_s26 + $0x90] sm:$0xff]  }
  0xcc   : > { %v897_v20 = vpop.permute.xlu1 %896 }
  0xcd   : > { %968 = vst.msk [vmem:[#allocation2 + $0x64] sm:$0xf] %vm942_vm7, %v897_v20  ;;  %v895_v22 = vpop.permute.xlu0 %894  ;;  %v1187_v24 = vpop.permute.xlu2 %1186  ;;  %v1402_v20 = vunpack.c.l.b16 %v5525_v16 }
  0xce   : > { %967 = vst.msk [vmem:[#allocation2 + $0x60] sm:$0xf] %vm942_vm7, %v895_v22  ;;  %v4868_v22 = vunpack.c.h.b16 %v4914_v17 }
  0xcf   : > { %1283 = vst.msk [vmem:[#allocation2] sm:$0xf] %vm1282_vm8, %v1187_v24  ;;  %v4867_v24 = vunpack.c.l.b16 %v4914_v17 }
  0xd2   : > { %1456 = vrot.lane.b32.xlu1 %v1418_v23, %s4994_s29 }
  0xd3   : > { %1454 = vrot.lane.b32.xlu0 %v1417_v26, %s4994_s29  ;;  %1452 = vrot.lane.b32.xlu2 %v1416_v28, %s4994_s29  ;;  %v1628_v26 = vshll.u32 %v4492_v19, 16  ;;  %v1694_v19 = vshll.u32 %v4500_v6, 16 }
  0xd4   : > { %v903_v31 = vpop.permute.xlu1 %902 }
  0xd5   : > { %971 = vst.msk [vmem:[#allocation2 + $0x70] sm:$0xf] %vm942_vm7, %v903_v31  ;;  %v901_v33 = vpop.permute.xlu0 %900  ;;  %v1193_v35 = vpop.permute.xlu2 %1192  ;;  %v1436_v31 = vpack.c.b16 %v1402_v20, %v1402_v20  ;;  %v5542_v37 = vrot.slane %v1628_v26, 5 }
  0xd6   : > { %970 = vst.msk [vmem:[#allocation2 + $0x6c] sm:$0xf] %vm942_vm7, %v901_v33  ;;  %v1435_v33 = vpack.c.b16 %v4868_v22, %v4868_v22 }
  0xd7   : > { %1286 = vst.msk [vmem:[#allocation2 + $0xc] sm:$0xf] %vm1282_vm8, %v1193_v35  ;;  %v4497_v35 = vld [vmem:[%s5059_s26 + $0x24] sm:$0xf]  ;;  %v1635_v50 = vor.u32 %v1634_v38, %v5542_v37 }
  0xd8   : > { %v1667_v43 = vshrl.u32 %v4497_v35, 16 }
  0xda   : > { %1462 = vrot.lane.b32.xlu1 %v1421_v34, %s4994_s29  ;;  %v4915_v34 = vld [vmem:[%s5059_s26 + $0xa8] sm:$0xff]   ;;  %v1669_v59 = vrot.slane %v1667_v43, 4 }
  0xdb   : > { %1460 = vrot.lane.b32.xlu0 %v1420_v36, %s4994_s29  ;;  %1458 = vrot.lane.b32.xlu2 %v1419_v39, %s4994_s29  ;;  %v1434_v36 = vpack.c.b16 %v4867_v24, %v4867_v24  ;;  %v1621_v39 = vrot.slane %v1619_v29, 4  ;;  %v4872_v41 = vunpack.c.h.b16 %v4915_v34 }
  0xdc   : > { %v909_v42 = vpop.permute.xlu1 %908 }
  0xdd   : > { %974 = vst.msk [vmem:[#allocation2 + $0x7c] sm:$0xf] %vm942_vm7, %v909_v42  ;;  %v907_v44 = vpop.permute.xlu0 %906  ;;  %v1199_v46 = vpop.permute.xlu2 %1198  ;;  %v4493_v42 = vld [vmem:[%s5059_s26 + $0x14] sm:$0x1] }
  0xde   : > { %973 = vst.msk [vmem:[#allocation2 + $0x78] sm:$0xf] %vm942_vm7, %v907_v44  ;;  %v1670_v44 = vshll.u32 %v4497_v35, 16  ;;  %v1638_v53 = vshll.u32 %v4493_v42, 16 }
  0xdf   : > { %1289 = vst.msk [vmem:[#allocation2 + $0x18] sm:$0xf] %vm1282_vm8, %v1199_v46  ;;  %v4871_v46 = vunpack.c.l.b16 %v4915_v34 }
  0xe1   : > { %v1438_v62 = vpack.c.b16 %v4871_v46, %v4871_v46 }
  0xe2   : > { %1468 = vrot.lane.b32.xlu1 %v1424_v45, %s4994_s29  ;;  %v4495_v45 = vld [vmem:[%s5059_s26 + $0x1c] sm:$0xf] }
  0xe3   : > { %1466 = vrot.lane.b32.xlu0 %v1423_v47, %s4994_s29  ;;  %1464 = vrot.lane.b32.xlu2 %v1422_v49, %s4994_s29  ;;  %v1403_v49 = vunpack.c.h.b16 %v5525_v16 }
  0xe4   : > { %v1191_v52 = vpop.permute.xlu1 %1190 }
  0xe5   : > { %1285 = vst.msk [vmem:[#allocation2 + $0x8] sm:$0xf] %vm1282_vm8, %v1191_v52  ;;  %v1189_v54 = vpop.permute.xlu0 %1188  ;;  %v1205_v56 = vpop.permute.xlu2 %1204  ;;  %v4490_v52 = vld [vmem:[%s5059_s26 + $0xb4] sm:$0xff]  }
  0xe6   : > { %1284 = vst.msk [vmem:[#allocation2 + $0x4] sm:$0xf] %vm1282_vm8, %v1189_v54  ;;  %v1625_v54 = vor.u32 %v1624_v40, %v1621_v39  ;;  %v4502_v40 = vld [vmem:[%s5059_s26 + $0x38] sm:$0x1] }
  0xe7   : > { %1292 = vst.msk [vmem:[#allocation2 + $0x24] sm:$0xf] %vm1282_vm8, %v1205_v56  ;;  %v1656_v56 = vshrl.u32 %v4495_v45, 16 }
  0xe8   : > { %v1626_v8 = vrot.slane %v1625_v54, 4 }
  0xea   : > { %1474 = vrot.lane.b32.xlu1 %v1427_v55, %s4994_s29  ;;  %v1652_v55 = vshll.u32 %v4495_v45, 16  ;;  %v1631_v27 = vsel %vm5070_vm2, %v1626_v8, %v5542_v37  ;;  %v1696_v37 = vrot.slane %v1694_v19, 5  ;;  %v4504_v45 = vld [vmem:[%s5059_s26 + $0x40] sm:$0xf] }
  0xeb   : > { %1472 = vrot.lane.b32.xlu0 %v1426_v57, %s4994_s29  ;;  %1470 = vrot.lane.b32.xlu2 %v1425_v60, %s4994_s29  ;;  %v1439_v57 = vpack.c.b16 %v4872_v41, %v4872_v41  ;;  %v1672_v60 = vrot.slane %v1670_v44, 5  ;;  %v4506_v44 = vld [vmem:[%s5059_s26 + $0x48] sm:$0xf]  ;;  %v1981_v46 = vunpack.c.l.b16 %v1631_v27  ;;  %v4505_v27 = vld [vmem:[%s5059_s26 + $0x44] sm:$0x1] }
  0xec   : > { %v1197_v63 = vpop.permute.xlu1 %1196 }
  0xed   : > { %1288 = vst.msk [vmem:[#allocation2 + $0x14] sm:$0xf] %vm1282_vm8, %v1197_v63  ;;  %v1195_v2 = vpop.permute.xlu0 %1194  ;;  %v1211_v4 = vpop.permute.xlu2 %1210  ;;  %v5565_v63 = vld [vmem:[%s5059_s26 + $0x28] sm:$0xf]  ;;  %v1673_v11 = vor.u32 %v1672_v60, %v1669_v59  ;;  %v1728_v59 = vshrl.u32 %v4504_v45, 16  ;;  %v2034_v0 = vpack.c.b16 %v1981_v46, %v1981_v46 }
  0xee   : > { %1287 = vst.msk [vmem:[#allocation2 + $0x10] sm:$0xf] %vm1282_vm8, %v1195_v2  ;;  %v1407_v2 = vunpack.c.h.b16 %v4490_v52  ;;  %v1680_v42 = vshrl.u32 %v5565_v63, 16 }
  0xef   : > { %1295 = vst.msk [vmem:[#allocation2 + $0x30] sm:$0xf] %vm1282_vm8, %v1211_v4  ;;  %v1636_v4 = vrot.slane %v1635_v50, 4 }
  0xf0   : > { %v1441_v22 = vpack.c.b16 %v1407_v2, %v1407_v2 }
  0xf2   : > { %1480 = vrot.lane.b32.xlu1 %v1430_v3, %s4994_s29  ;;  %v1437_v3 = vpack.c.b16 %v1403_v49, %v1403_v49 }
  0xf3   : > { %1478 = vrot.lane.b32.xlu0 %v1429_v5, %s4994_s29  ;;  %1476 = vrot.lane.b32.xlu2 %v1428_v7, %s4994_s29  ;;  %v4501_v5 = vld [vmem:[%s5059_s26 + $0x34] sm:$0xf]  ;;  %v1640_v7 = vrot.slane %v1638_v53, 5  ;;  %v1710_v53 = vshll.u32 %v4502_v40, 16 }
  0xf4   : > { %v1203_v10 = vpop.permute.xlu1 %1202  ;;  %v1700_v16 = vshll.u32 %v4501_v5, 16  ;;  %v1704_v17 = vshrl.u32 %v4501_v5, 16  ;;  %v4503_v5 = vld [vmem:[%s5059_s26 + $0x3c] sm:$0xf] }
  0xf5   : > { %1291 = vst.msk [vmem:[#allocation2 + $0x20] sm:$0xf] %vm1282_vm8, %v1203_v10  ;;  %v1201_v12 = vpop.permute.xlu0 %1200  ;;  %v1217_v14 = vpop.permute.xlu2 %1216  ;;  %v1646_v10 = vshll.u32 %v4494_v61, 16  ;;  %v1641_v26 = vsel %vm5070_vm2, %v1636_v4, %v1640_v7  ;;  %v4499_v4 = vld [vmem:[%s5059_s26 + $0x2c] sm:$0x1]  ;;  %v1712_v8 = vrot.slane %v1710_v53, 5 }
  0xf6   : > { %1290 = vst.msk [vmem:[#allocation2 + $0x1c] sm:$0xf] %vm1282_vm8, %v1201_v12  ;;  %v1676_v12 = vshll.u32 %v5565_v63, 16  ;;  %v5588_v35 = vrot.slane %v1700_v16, 5  ;;  %v1982_v41 = vunpack.c.l.b16 %v1641_v26  ;;  %v4510_v63 = vld [vmem:[%s5059_s26 + $0x58] sm:$0xf] }
  0xf7   : > { %1298 = vst.msk [vmem:[#allocation2 + $0x3c] sm:$0xf] %vm1282_vm8, %v1217_v14  ;;  %v1658_v14 = vrot.slane %v1656_v56, 4  ;;  %v1648_v29 = vrot.slane %v1646_v10, 5  ;;  %v1739_v56 = vshrl.u32 %v4506_v44, 16  ;;  %v1776_v19 = vshrl.u32 %v4510_v63, 16 }
  0xf8   : > { %v5616_v16 = vld [vmem:[%s5059_s26 + $0x4c] sm:$0xf] }
  0xfa   : > { %1486 = vrot.lane.b32.xlu1 %v1433_v13, %s4994_s29  ;;  %v5572_v13 = vrot.slane %v1652_v55, 5 }
  0xfb   : > { %1484 = vrot.lane.b32.xlu0 %v1432_v15, %s4994_s29  ;;  %1482 = vrot.lane.b32.xlu2 %v1431_v18, %s4994_s29  ;;  %v4496_v15 = vld [vmem:[%s5059_s26 + $0x20] sm:$0x1]  ;;  %v1691_v18 = vshrl.u32 %v4500_v6, 16 }
  0xfc   : > { %v1209_v23 = vpop.permute.xlu1 %1208  ;;  %v1662_v34 = vshll.u32 %v4496_v15, 16 }
  0xfd   : > { %1294 = vst.msk [vmem:[#allocation2 + $0x2c] sm:$0xf] %vm1282_vm8, %v1209_v23  ;;  %v1207_v28 = vpop.permute.xlu0 %1206  ;;  %v1223_v32 = vpop.permute.xlu2 %1222  ;;  %v1406_v23 = vunpack.c.l.b16 %v4490_v52  ;;  %v1693_v38 = vrot.slane %v1691_v18, 4  ;;  %v1686_v18 = vshll.u32 %v4499_v4, 16 }
  0xfe   : > { %1293 = vst.msk [vmem:[#allocation2 + $0x28] sm:$0xf] %vm1282_vm8, %v1207_v28  ;;  %v1645_v28 = vrot.slane %v1643_v9, 4  ;;  %v1664_v50 = vrot.slane %v1662_v34, 5 }
  0xff   : > { %1301 = vst.msk [vmem:[#allocation2 + $0x48] sm:$0xf] %vm1282_vm8, %v1223_v32  ;;  %v5584_v32 = vrot.slane %v1676_v12, 5  ;;  %v1440_v39 = vpack.c.b16 %v1406_v23, %v1406_v23  ;;  %v1697_v54 = vor.u32 %v1696_v37, %v1693_v38  ;;  %v1715_v12 = vshrl.u32 %v4503_v5, 16 }
 0x100   : > { %v1649_v43 = vor.u32 %v1648_v29, %v1645_v28  ;;  %v1730_v23 = vrot.slane %v1728_v59, 4  ;;  %v1688_v38 = vrot.slane %v1686_v18, 5  ;;  %v4513_v59 = vld [vmem:[%s5059_s26 + $0x64] sm:$0xf]  ;;  %v4512_v18 = vld [vmem:[%s5059_s26 + $0x60] sm:$0xf] }
 0x101   : > { %v1698_v9 = vrot.slane %v1697_v54, 4  ;;  %v4515_v54 = vld [vmem:[%s5059_s26 + $0x6c] sm:$0xf] }
 0x102   : > { %1492 = vrot.lane.b32.xlu1 %v1436_v31, %s4994_s29  ;;  %v1674_v31 = vrot.slane %v1673_v11, 4  ;;  %v1650_v61 = vrot.slane %v1649_v43, 4  ;;  %v1772_v11 = vshll.u32 %v4510_v63, 16  ;;  %v1734_v43 = vshll.u32 %v4505_v27, 16  ;;  %v4514_v27 = vld [vmem:[%s5059_s26 + $0x68] sm:$0x1] }
 0x103   : > { %1490 = vrot.lane.b32.xlu0 %v1435_v33, %s4994_s29  ;;  %1488 = vrot.lane.b32.xlu2 %v1434_v36, %s4994_s29  ;;  %v1659_v33 = vor.u32 %v1658_v14, %v5572_v13  ;;  %v1706_v36 = vrot.slane %v1704_v17, 4  ;;  %v1718_v14 = vshll.u32 %v4503_v5, 16  ;;  %v1703_v26 = vsel %vm5070_vm2, %v1698_v9, %v5588_v35 }
 0x104   : > { %v1215_v47 = vpop.permute.xlu1 %1214  ;;  %v1655_v15 = vsel %vm5070_vm2, %v1650_v61, %v5572_v13  ;;  %v5633_v37 = vrot.slane %v1772_v11, 5 }
 0x105   : > { %1297 = vst.msk [vmem:[#allocation2 + $0x38] sm:$0xf] %vm1282_vm8, %v1215_v47  ;;  %v1213_v51 = vpop.permute.xlu0 %1212  ;;  %v1229_v58 = vpop.permute.xlu2 %1228  ;;  %v1679_v47 = vsel %vm5070_vm2, %v1674_v31, %v5584_v32  ;;  %v1660_v49 = vrot.slane %v1659_v33, 4  ;;  %v1707_v52 = vor.u32 %v1706_v36, %v5588_v35  ;;  %v1983_v29 = vunpack.c.l.b16 %v1655_v15  ;;  %v4509_v31 = vld [vmem:[%s5059_s26 + $0x54] sm:$0xf] }
 0x106   : > { %1296 = vst.msk [vmem:[#allocation2 + $0x34] sm:$0xf] %vm1282_vm8, %v1213_v51  ;;  %v4876_v51 = vunpack.c.h.b16 %v5555_v48  ;;  %v2035_v48 = vpack.c.b16 %v1982_v41, %v1982_v41  ;;  %v5605_v2 = vunpack.c.l.b16 %v1679_v47  ;;  %v1720_v33 = vrot.slane %v1718_v14, 5 }
 0x107   : > { %1304 = vst.msk [vmem:[#allocation2 + $0x54] sm:$0xf] %vm1282_vm8, %v1229_v58  ;;  %v1724_v58 = vshll.u32 %v4504_v45, 16  ;;  %v1665_v6 = vsel %vm5070_vm2, %v1660_v49, %v1664_v50  ;;  %v1708_v7 = vrot.slane %v1707_v52, 4  ;;  %v1763_v47 = vshrl.u32 %v4509_v31, 16 }
 0x108   : > { %v1443_v10 = vpack.c.b16 %v4876_v51, %v4876_v51  ;;  %v2038_v35 = vpack.c.b16 %v5605_v2, %v5605_v2  ;;  %v1766_v49 = vshll.u32 %v4509_v31, 16  ;;  %v1987_v50 = vunpack.c.l.b16 %v1703_v26  ;;  %v5666_v26 = vld [vmem:[%s5059_s26 + $0x70] sm:$0xf] }
 0x109   : > { %v1713_v13 = vsel %vm5070_vm2, %v1708_v7, %v1712_v8  ;;  %v2036_v51 = vpack.c.b16 %v1983_v29, %v1983_v29  ;;  %v1765_v63 = vrot.slane %v1763_v47, 4  ;;  %v1814_v2 = vshll.u32 %v4515_v54, 16 }
 0x10a   : > { %1498 = vrot.lane.b32.xlu1 %v1439_v57, %s4994_s29  ;;  %v1742_v57 = vshll.u32 %v4506_v44, 16  ;;  %v4511_v44 = vld [vmem:[%s5059_s26 + $0x5c] sm:$0x1]  ;;  %v1988_v46 = vunpack.c.l.b16 %v1713_v13  ;;  %v1800_v7 = vshrl.u32 %v4513_v59, 16  ;;  %v2040_v14 = vpack.c.b16 %v1987_v50, %v1987_v50 }
 0x10b   : > { %1496 = vrot.lane.b32.xlu0 %v1438_v62, %s4994_s29  ;;  %1494 = vrot.lane.b32.xlu2 %v1437_v3, %s4994_s29  ;;  %v1682_v62 = vrot.slane %v1680_v42, 4 }
 0x10c   : > { %v1221_v20 = vpop.permute.xlu1 %1220  ;;  %v1802_v29 = vrot.slane %v1800_v7, 4 }
 0x10d   : > { %1300 = vst.msk [vmem:[#allocation2 + $0x44] sm:$0xf] %vm1282_vm8, %v1221_v20  ;;  %v1219_v24 = vpop.permute.xlu0 %1218  ;;  %v1235_v30 = vpop.permute.xlu2 %1234  ;;  %v1683_v17 = vor.u32 %v1682_v62, %v5584_v32  ;;  %v1741_v20 = vrot.slane %v1739_v56, 4  ;;  %v1717_v32 = vrot.slane %v1715_v12, 4  ;;  %v1736_v62 = vrot.slane %v1734_v43, 5 }
 0x10e   : > { %1299 = vst.msk [vmem:[#allocation2 + $0x40] sm:$0xf] %vm1282_vm8, %v1219_v24  ;;  %v1984_v24 = vunpack.c.l.b16 %v1665_v6  ;;  %v1796_v6 = vshll.u32 %v4513_v59, 16  ;;  %v2041_v12 = vpack.c.b16 %v1988_v46, %v1988_v46 }
 0x10f   : > { %1307 = vst.msk [vmem:[#allocation2 + $0x60] sm:$0xf] %vm1282_vm8, %v1235_v30  ;;  %v1748_v30 = vshll.u32 %v5616_v16, 16  ;;  %v1684_v36 = vrot.slane %v1683_v17, 4  ;;  %v1721_v53 = vor.u32 %v1720_v33, %v1717_v32  ;;  %v4508_v17 = vld [vmem:[%s5059_s26 + $0x50] sm:$0x1] }
 0x110   : > { %v2037_v45 = vpack.c.b16 %v1984_v24, %v1984_v24  ;;  %v1758_v31 = vshll.u32 %v4508_v17, 16  ;;  %v4519_v32 = vld [vmem:[%s5059_s26 + $0x7c] sm:$0xf]  ;;  %v1787_v33 = vshrl.u32 %v4512_v18, 16  ;;  %v4522_v17 = vld [vmem:[%s5059_s26 + $0x88] sm:$0xf] }
 0x111   : > { %v5641_v52 = vrot.slane %v1748_v30, 5  ;;  %v1689_v56 = vsel %vm5070_vm2, %v1684_v36, %v1688_v38  ;;  %v1722_v5 = vrot.slane %v1721_v53, 4  ;;  %v1844_v46 = vshll.u32 %v4519_v32, 16 }
 0x112   : > { %1504 = vrot.lane.b32.xlu1 %v1442_v21, %s4994_s29  ;;  %v1744_v21 = vrot.slane %v1742_v57, 5  ;;  %v1986_v4 = vunpack.c.l.b16 %v1689_v56  ;;  %v1848_v47 = vshrl.u32 %v4519_v32, 16 }
 0x113   : > { %1502 = vrot.lane.b32.xlu0 %v1441_v22, %s4994_s29  ;;  %1500 = vrot.lane.b32.xlu2 %v1440_v39, %s4994_s29  ;;  %v5620_v22 = vrot.slane %v1724_v58, 5  ;;  %v1778_v39 = vrot.slane %v1776_v19, 4  ;;  %v1782_v58 = vshll.u32 %v4511_v44, 16 }
 0x114   : > { %v1227_v55 = vpop.permute.xlu1 %1226  ;;  %v1745_v41 = vor.u32 %v1744_v21, %v1741_v20  ;;  %v2039_v24 = vpack.c.b16 %v1986_v4, %v1986_v4  ;;  %v4520_v4 = vld [vmem:[%s5059_s26 + $0x80] sm:$0x1] }
 0x115   : > { %1303 = vst.msk [vmem:[#allocation2 + $0x50] sm:$0xf] %vm1282_vm8, %v1227_v55  ;;  %v1225_v60 = vpop.permute.xlu0 %1224  ;;  %v1241_v3 = vpop.permute.xlu2 %1240  ;;  %v1731_v42 = vor.u32 %v1730_v23, %v5620_v22  ;;  %v1752_v55 = vshrl.u32 %v5616_v16, 16  ;;  %v1779_v57 = vor.u32 %v1778_v39, %v5633_v37  ;;  %v1816_v23 = vrot.slane %v1814_v2, 5 }
 0x116   : > { %1302 = vst.msk [vmem:[#allocation2 + $0x4c] sm:$0xf] %vm1282_vm8, %v1225_v60  ;;  %v1746_v60 = vrot.slane %v1745_v41, 4  ;;  %v1727_v13 = vsel %vm5070_vm2, %v1722_v5, %v5620_v22  ;;  %v1806_v41 = vshll.u32 %v4514_v27, 16  ;;  %v5693_v5 = vrot.slane %v1844_v46, 5 }
 0x117   : > { %1310 = vst.msk [vmem:[#allocation2 + $0x6c] sm:$0xf] %vm1282_vm8, %v1241_v3  ;;  %v1732_v61 = vrot.slane %v1731_v42, 4  ;;  %v1780_v9 = vrot.slane %v1779_v57, 4  ;;  %v1754_v11 = vrot.slane %v1752_v55, 4  ;;  %v1989_v44 = vunpack.c.l.b16 %v1727_v13 }
 0x118   : > { %v1751_v15 = vsel %vm5070_vm2, %v1746_v60, %v5641_v52  ;;  %v4518_v42 = vld [vmem:[%s5059_s26 + $0x78] sm:$0xf]  ;;  %v1808_v2 = vrot.slane %v1806_v41, 5 }
 0x119   : > { %v1737_v19 = vsel %vm5070_vm2, %v1732_v61, %v1736_v62  ;;  %v1755_v30 = vor.u32 %v1754_v11, %v5641_v52  ;;  %v1991_v36 = vunpack.c.l.b16 %v1751_v15  ;;  %v1789_v52 = vrot.slane %v1787_v33, 4 }
 0x11a   : > { %2068 = vrot.lane.b32.xlu1 %v2035_v48, %s4995_s9  ;;  %v1768_v48 = vrot.slane %v1766_v49, 5  ;;  %v1990_v38 = vunpack.c.l.b16 %v1737_v19  ;;  %v1835_v57 = vshrl.u32 %v4518_v42, 16  ;;  %v1824_v62 = vshrl.u32 %v5666_v26, 16 }
 0x11b   : > { %2066 = vrot.lane.b32.xlu0 %v2034_v0, %s4995_s9  ;;  %1506 = vrot.lane.b32.xlu2 %v1443_v10, %s4994_s29  ;;  %v1811_v0 = vshrl.u32 %v4515_v54, 16  ;;  %v1784_v10 = vrot.slane %v1782_v58, 5  ;;  %v1756_v50 = vrot.slane %v1755_v30, 4  ;;  %v2044_v54 = vpack.c.b16 %v1991_v36, %v1991_v36 }
 0x11c   : > { %v1233_v28 = vpop.permute.xlu1 %1232  ;;  %v1769_v20 = vor.u32 %v1768_v48, %v1765_v63  ;;  %v2043_v55 = vpack.c.b16 %v1990_v38, %v1990_v38  ;;  %v1838_v58 = vshll.u32 %v4518_v42, 16  ;;  %v2042_v63 = vpack.c.b16 %v1989_v44, %v1989_v44 }
 0x11d   : > { %1306 = vst.msk [vmem:[#allocation2 + $0x5c] sm:$0xf] %vm1282_vm8, %v1233_v28  ;;  %v1231_v34 = vpop.permute.xlu0 %1230  ;;  %v1247_v40 = vpop.permute.xlu2 %1246  ;;  %v1813_v21 = vrot.slane %v1811_v0, 4  ;;  %v5669_v28 = vrot.slane %v1796_v6, 5  ;;  %v1785_v22 = vsel %vm5070_vm2, %v1780_v9, %v1784_v10  ;;  %v1850_v6 = vrot.slane %v1848_v47, 4 }
 0x11e   : > { %1305 = vst.msk [vmem:[#allocation2 + $0x58] sm:$0xf] %vm1282_vm8, %v1231_v34  ;;  %v1790_v34 = vshll.u32 %v4512_v18, 16  ;;  %v1770_v39 = vrot.slane %v1769_v20, 4  ;;  %v1994_v59 = vunpack.c.l.b16 %v1785_v22  ;;  %v1840_v9 = vrot.slane %v1838_v58, 5 }
 0x11f   : > { %1313 = vst.msk [vmem:[#allocation2 + $0x78] sm:$0xf] %vm1282_vm8, %v1247_v40  ;;  %v1820_v40 = vshll.u32 %v5666_v26, 16  ;;  %v4524_v10 = vld [vmem:[%s5059_s26 + $0x90] sm:$0xf]  ;;  %v1851_v20 = vor.u32 %v1850_v6, %v5693_v5  ;;  %v1872_v36 = vshrl.u32 %v4522_v17, 16 }
 0x120   : > { %v1792_v53 = vrot.slane %v1790_v34, 5  ;;  %v1775_v60 = vsel %vm5070_vm2, %v1770_v39, %v5633_v37  ;;  %v2047_v19 = vpack.c.b16 %v1994_v59, %v1994_v59  ;;  %v1886_v30 = vshll.u32 %v4524_v10, 16 }
 0x121   : > { %v5687_v61 = vrot.slane %v1820_v40, 5  ;;  %v1993_v7 = vunpack.c.l.b16 %v1775_v60  ;;  %v1868_v34 = vshll.u32 %v4522_v17, 16  ;;  %v1852_v40 = vrot.slane %v1851_v20, 4  ;;  %v4529_v17 = vld [vmem:[%s5059_s26 + $0xa4] sm:$0x1] }
 0x122   : > { %2074 = vrot.lane.b32.xlu1 %v2038_v35, %s4995_s9  ;;  %v1817_v35 = vor.u32 %v1816_v23, %v1813_v21  ;;  %v1793_v37 = vor.u32 %v1792_v53, %v1789_v52  ;;  %v1826_v23 = vrot.slane %v1824_v62, 4  ;;  %v1888_v47 = vrot.slane %v1886_v30, 5  ;;  %v4528_v52 = vld [vmem:[%s5059_s26 + $0xa0] sm:$0xf] }
 0x123   : > { %2072 = vrot.lane.b32.xlu0 %v2037_v45, %s4995_s9  ;;  %2070 = vrot.lane.b32.xlu2 %v2036_v51, %s4995_s9  ;;  %v1803_v45 = vor.u32 %v1802_v29, %v5669_v28  ;;  %v1760_v51 = vrot.slane %v1758_v31, 5  ;;  %v2046_v13 = vpack.c.b16 %v1993_v7, %v1993_v7  ;;  %v1883_v29 = vshrl.u32 %v4524_v10, 16  ;;  %v4517_v31 = vld [vmem:[%s5059_s26 + $0x74] sm:$0x1] }
 0x124   : > { %v1239_v3 = vpop.permute.xlu1 %1238  ;;  %v1818_v48 = vrot.slane %v1817_v35, 4  ;;  %v1794_v21 = vrot.slane %v1793_v37, 4  ;;  %v1827_v42 = vor.u32 %v1826_v23, %v5687_v61 }
 0x125   : > { %1309 = vst.msk [vmem:[#allocation2 + $0x68] sm:$0xf] %vm1282_vm8, %v1239_v3  ;;  %v1237_v8 = vpop.permute.xlu0 %1236  ;;  %v1447_v16 = vpop.permute.xlu2 %1446  ;;  %v1804_v0 = vrot.slane %v1803_v45, 4  ;;  %v1761_v3 = vsel %vm5070_vm2, %v1756_v50, %v1760_v51  ;;  %v4525_v45 = vld [vmem:[%s5059_s26 + $0x94] sm:$0xf]  ;;  %v1885_v46 = vrot.slane %v1883_v29, 4 }
 0x126   : > { %1308 = vst.msk [vmem:[#allocation2 + $0x64] sm:$0xf] %vm1282_vm8, %v1237_v8  ;;  %v1837_v8 = vrot.slane %v1835_v57, 4  ;;  %v1992_v15 = vunpack.c.l.b16 %v1761_v3  ;;  %v1799_v41 = vsel %vm5070_vm2, %v1794_v21, %v5669_v28  ;;  %v5718_v50 = vrot.slane %v1868_v34, 5  ;;  %v4533_v29 = vld [vmem:[%s5059_s26 + $0xb4] sm:$0xf] }
 0x127   : > { %1542 = vst.msk [vmem:[#allocation2 + $0x4] sm:$0xf] %vm1540_vm9, %v1447_v16  ;;  %v1854_v16 = vshll.u32 %v4520_v4, 16  ;;  %v1874_v51 = vrot.slane %v1872_v36, 4  ;;  %v1828_v62 = vrot.slane %v1827_v42, 4  ;;  %v1916_v3 = vshll.u32 %v4528_v52, 16 }
 0x128   : > { %v1841_v27 = vor.u32 %v1840_v9, %v1837_v8  ;;  %v2045_v38 = vpack.c.b16 %v1992_v15, %v1992_v15  ;;  %v1920_v4 = vshrl.u32 %v4528_v52, 16 }
 0x129   : > { %v1856_v22 = vrot.slane %v1854_v16, 5  ;;  %v1875_v6 = vor.u32 %v1874_v51, %v5718_v50 }
 0x12a   : > { %2080 = vrot.lane.b32.xlu1 %v2041_v12, %s4995_s9  ;;  %v1823_v12 = vsel %vm5070_vm2, %v1818_v48, %v5687_v61  ;;  %v1842_v44 = vrot.slane %v1841_v27, 4  ;;  %v1892_v61 = vshll.u32 %v4525_v45, 16 }
 0x12b   : > { %2078 = vrot.lane.b32.xlu0 %v2040_v14, %s4995_s9  ;;  %2076 = vrot.lane.b32.xlu2 %v2039_v24, %s4995_s9  ;;  %v1809_v14 = vsel %vm5070_vm2, %v1804_v0, %v1808_v2  ;;  %v4521_v24 = vld [vmem:[%s5059_s26 + $0x84] sm:$0xf]  ;;  %v1997_v32 = vunpack.c.l.b16 %v1823_v12  ;;  %v1857_v60 = vsel %vm5070_vm2, %v1852_v40, %v1856_v22  ;;  %v1889_v2 = vor.u32 %v1888_v47, %v1885_v46  ;;  %v4530_v40 = vld [vmem:[%s5059_s26 + $0xa8] sm:$0xf] }
 0x12c   : > { %v1245_v43 = vpop.permute.xlu1 %1244  ;;  %v1996_v33 = vunpack.c.l.b16 %v1809_v14  ;;  %v1859_v39 = vshrl.u32 %v4521_v24, 16  ;;  %v1862_v35 = vshll.u32 %v4521_v24, 16  ;;  %v1847_v48 = vsel %vm5070_vm2, %v1842_v44, %v5693_v5 }
 0x12d   : > { %1312 = vst.msk [vmem:[#allocation2 + $0x74] sm:$0xf] %vm1282_vm8, %v1245_v43  ;;  %v1243_v49 = vpop.permute.xlu0 %1242  ;;  %v1453_v56 = vpop.permute.xlu2 %1452  ;;  %v1830_v43 = vshll.u32 %v4517_v31, 16  ;;  %v1999_v12 = vunpack.c.l.b16 %v1847_v48  ;;  %v1896_v14 = vshrl.u32 %v4525_v45, 16  ;;  %v1890_v15 = vrot.slane %v1889_v2, 4 }
 0x12e   : > { %1311 = vst.msk [vmem:[#allocation2 + $0x70] sm:$0xf] %vm1282_vm8, %v1243_v49  ;;  %v2050_v49 = vpack.c.b16 %v1997_v32, %v1997_v32  ;;  %v2049_v28 = vpack.c.b16 %v1996_v33, %v1996_v33  ;;  %v1861_v57 = vrot.slane %v1859_v39, 4  ;;  %v1864_v58 = vrot.slane %v1862_v35, 5  ;;  %v4531_v32 = vld [vmem:[%s5059_s26 + $0xac] sm:$0xf] }
 0x12f   : > { %1545 = vst.msk [vmem:[#allocation2 + $0x10] sm:$0xf] %vm1540_vm9, %v1453_v56  ;;  %v4527_v56 = vld [vmem:[%s5059_s26 + $0x9c] sm:$0xf]  ;;  %v1894_v16 = vrot.slane %v1892_v61, 5  ;;  %v1876_v20 = vrot.slane %v1875_v6, 4  ;;  %v2052_v36 = vpack.c.b16 %v1999_v12, %v1999_v12 }
 0x130   : > { %v1907_v7 = vshrl.u32 %v4527_v56, 16  ;;  %v1910_v8 = vshll.u32 %v4527_v56, 16  ;;  %v1865_v10 = vor.u32 %v1864_v58, %v1861_v57  ;;  %v1926_v31 = vshll.u32 %v4529_v17, 16  ;;  %v4526_v35 = vld [vmem:[%s5059_s26 + $0x98] sm:$0x1] }
 0x131   : > { %v1898_v33 = vrot.slane %v1896_v14, 4  ;;  %v1958_v44 = vshll.u32 %v4533_v29, 16  ;;  %v1940_v47 = vshll.u32 %v4531_v32, 16  ;;  %v1902_v52 = vshll.u32 %v4526_v35, 16  ;;  %v1980_v2 = vld [vmem:[%s5547_s8 + $0x8] sm:$0x1] }
 0x132   : > { %2086 = vrot.lane.b32.xlu1 %v2044_v54, %s4995_s9  ;;  %v1995_v54 = vunpack.c.l.b16 %v1799_v41  ;;  %v1909_v23 = vrot.slane %v1907_v7, 4  ;;  %v1912_v24 = vrot.slane %v1910_v8, 5  ;;  %v1866_v27 = vrot.slane %v1865_v10, 4 }
 0x133   : > { %2084 = vrot.lane.b32.xlu0 %v2043_v55, %s4995_s9  ;;  %2082 = vrot.lane.b32.xlu2 %v2042_v63, %s4995_s9  ;;  %v4523_v55 = vld [vmem:[%s5059_s26 + $0x8c] sm:$0x1]  ;;  %v1832_v63 = vrot.slane %v1830_v43, 5  ;;  %v1955_v43 = vshrl.u32 %v4533_v29, 16  ;;  %v1899_v51 = vor.u32 %v1898_v33, %v1894_v16  ;;  %v1928_v57 = vrot.slane %v1926_v31, 5 }
 0x134   : > { %v1445_v11 = vpop.permute.xlu1 %1444  ;;  %v1878_v37 = vshll.u32 %v4523_v55, 16  ;;  %v2048_v9 = vpack.c.b16 %v1995_v54, %v1995_v54  ;;  %v1913_v42 = vor.u32 %v1912_v24, %v1909_v23  ;;  %v1871_v46 = vsel %vm5070_vm2, %v1866_v27, %v5718_v50 }
 0x135   : > { %1541 = vst.msk [vmem:[#allocation2] sm:$0xf] %vm1540_vm9, %v1445_v11  ;;  %v1249_v18 = vpop.permute.xlu0 %1248  ;;  %v1459_v26 = vpop.permute.xlu2 %1458  ;;  %v2000_v11 = vunpack.c.l.b16 %v1857_v60  ;;  %v1833_v5 = vsel %vm5070_vm2, %v1828_v62, %v1832_v63  ;;  %v1957_v60 = vrot.slane %v1955_v43, 4  ;;  %v1960_v50 = vrot.slane %v1958_v44, 5  ;;  %v4532_v63 = vld [vmem:[%s5059_s26 + $0xb0] sm:$0x1] }
 0x136   : > { %1314 = vst.msk [vmem:[#allocation2 + $0x7c] sm:$0xf] %vm1282_vm8, %v1249_v18  ;;  %v5737_v18 = vrot.slane %v1916_v3, 5  ;;  %v1880_v21 = vrot.slane %v1878_v37, 5  ;;  %v1914_v58 = vrot.slane %v1913_v42, 4  ;;  %v2001_v62 = vunpack.c.l.b16 %v1871_v46 }
 0x137   : > { %1548 = vst.msk [vmem:[#allocation2 + $0x1c] sm:$0xf] %vm1540_vm9, %v1459_v26  ;;  %v1998_v26 = vunpack.c.l.b16 %v1833_v5  ;;  %v2053_v34 = vpack.c.b16 %v2000_v11, %v2000_v11  ;;  %v5761_v48 = vrot.slane %v1940_v47, 5  ;;  %v1904_v6 = vrot.slane %v1902_v52, 5 }
 0x138   : > { %v1881_v41 = vsel %vm5070_vm2, %v1876_v20, %v1880_v21  ;;  %v1919_v12 = vsel %vm5070_vm2, %v1914_v58, %v5737_v18  ;;  %v1961_v14 = vor.u32 %v1960_v50, %v1957_v60  ;;  %v2054_v17 = vpack.c.b16 %v2001_v62, %v2001_v62 }
 0x139   : > { %v2051_v45 = vpack.c.b16 %v1998_v26, %v1998_v26  ;;  %v2002_v55 = vunpack.c.l.b16 %v1881_v41  ;;  %v1950_v20 = vshll.u32 %v4532_v63, 16  ;;  %v2005_v26 = vunpack.c.l.b16 %v1919_v12  ;;  %v4535_v41 = vld [vmem:[%s5059_s26 + $0xbc] sm:$0x1] }
 0x13a   : > { %2092 = vrot.lane.b32.xlu1 %v2047_v19, %s4995_s9  ;;  %v1922_v19 = vrot.slane %v1920_v4, 4  ;;  %v1900_v4 = vrot.slane %v1899_v51, 4  ;;  %v1974_v52 = vshll.u32 %v4535_v41, 16 }
 0x13b   : > { %2090 = vrot.lane.b32.xlu0 %v2046_v13, %s4995_s9  ;;  %2088 = vrot.lane.b32.xlu2 %v2045_v38, %s4995_s9  ;;  %v1895_v38 = vsel %vm5070_vm2, %v1890_v15, %v1894_v16  ;;  %v4825_v15 = vld [vmem:[%s5547_s8] sm:$0xff]  ;;  %v2016_v16 = vunpack.c.l.b16 %v1980_v2  ;;  %v1952_v33 = vrot.slane %v1950_v20, 5  ;;  %v2058_v35 = vpack.c.b16 %v2005_v26, %v2005_v26  ;;  %v4543_v2 = vld [vmem:[%s5059_s26 + $0x18] sm:$0xe] }
 0x13c   : > { %v1451_v53 = vpop.permute.xlu1 %1450  ;;  %v1923_v39 = vor.u32 %v1922_v19, %v5737_v18  ;;  %v2003_v54 = vunpack.c.l.b16 %v1895_v38  ;;  %v1905_v23 = vsel %vm5070_vm2, %v1900_v4, %v1904_v6  ;;  %v1962_v18 = vrot.slane %v1961_v14, 4  ;;  %v4542_v6 = vld [vmem:[%s5059_s26 + $0x14] sm:$0x1] }
 0x13d   : > { %1544 = vst.msk [vmem:[#allocation2 + $0xc] sm:$0xf] %vm1540_vm9, %v1451_v53  ;;  %v1449_v59 = vpop.permute.xlu0 %1448  ;;  %v1465_v0 = vpop.permute.xlu2 %1464  ;;  %v1931_v53 = vshrl.u32 %v4530_v40, 16  ;;  %v2018_v29 = vpack.c.b16 %v2016_v16, %v2016_v16  ;;  %v2021_v43 = vshrl.u32 %v4825_v15, 16  ;;  %v1976_v50 = vrot.slane %v1974_v52, 5 }
 0x13e   : > { %1543 = vst.msk [vmem:[#allocation2 + $0x8] sm:$0xf] %vm1540_vm9, %v1449_v59  ;;  %v1924_v56 = vrot.slane %v1923_v39, 4  ;;  %v4534_v59 = vld [vmem:[%s5059_s26 + $0xb8] sm:$0xf]  ;;  %v2056_v8 = vpack.c.b16 %v2003_v54, %v2003_v54 }
 0x13f   : > { %1551 = vst.msk [vmem:[#allocation2 + $0x28] sm:$0xf] %vm1540_vm9, %v1465_v0  ;;  %v1933_v37 = vrot.slane %v1931_v53, 4  ;;  %v1964_v5 = vshll.u32 %v4534_v59, 16  ;;  %v1968_v21 = vshrl.u32 %v4534_v59, 16 }
 0x140   : > { %v1929_v10 = vsel %vm5070_vm2, %v1924_v56, %v1928_v57  ;;  %v4541_v59 = vld [vmem:[%s5059_s26 + $0x10] sm:$0xf]  ;;  %v4547_v16 = vld [vmem:[%s5059_s26 + $0x28] sm:$0xf]  ;;  %v4553_v52 = vld [vmem:[%s5059_s26 + $0x40] sm:$0xf] }
 0x141   : > { %v1966_v27 = vrot.slane %v1964_v5, 5  ;;  %v2287_v4 = vrot.slane %v4541_v59, 5  ;;  %v2290_v5 = vrot.slane %v4542_v6, 5  ;;  %v2315_v59 = vrot.slane %v4553_v52, 5 }
 0x142   : > { %2098 = vrot.lane.b32.xlu1 %v2050_v49, %s4995_s9  ;;  %v1944_v49 = vshrl.u32 %v4531_v32, 16 }
 0x143   : > { %2096 = vrot.lane.b32.xlu0 %v2049_v28, %s4995_s9  ;;  %2094 = vrot.lane.b32.xlu2 %v2048_v9, %s4995_s9  ;;  %v1934_v28 = vshll.u32 %v4530_v40, 16  ;;  %v2055_v9 = vpack.c.b16 %v2002_v55, %v2002_v55  ;;  %v1967_v42 = vsel %vm5070_vm2, %v1962_v18, %v1966_v27  ;;  %v2289_v14 = vrot.slane %v2287_v4, 4 }
 0x144   : > { %v1457_v13 = vpop.permute.xlu1 %1456  ;;  %v1946_v0 = vrot.slane %v1944_v49, 4  ;;  %v2009_v53 = vunpack.c.l.b16 %v1967_v42 }
 0x145   : > { %1547 = vst.msk [vmem:[#allocation2 + $0x18] sm:$0xf] %vm1540_vm9, %v1457_v13  ;;  %v1455_v30 = vpop.permute.xlu0 %1454  ;;  %v1471_v22 = vpop.permute.xlu2 %1470  ;;  %v1936_v7 = vrot.slane %v1934_v28, 5  ;;  %v2006_v13 = vunpack.c.l.b16 %v1929_v10  ;;  %v4586_v10 = vrot.slane %v4543_v2, 9  ;;  %v2291_v26 = vsel %vm5245_vm6, %v2289_v14, %v2290_v5  ;;  %v4554_v14 = vld [vmem:[%s5059_s26 + $0x44] sm:$0x1] }
 0x146   : > { %1546 = vst.msk [vmem:[#allocation2 + $0x14] sm:$0xf] %vm1540_vm9, %v1455_v30  ;;  %v1947_v19 = vor.u32 %v1946_v0, %v5761_v48  ;;  %v2023_v30 = vshll.u32 %v4825_v15, 16 }
 0x147   : > { %1554 = vst.msk [vmem:[#allocation2 + $0x34] sm:$0xf] %vm1540_vm9, %v1471_v22  ;;  %v1937_v24 = vor.u32 %v1936_v7, %v1933_v37  ;;  %v1970_v22 = vrot.slane %v1968_v21, 4  ;;  %v2059_v39 = vpack.c.b16 %v2006_v13, %v2006_v13  ;;  %v2301_v13 = vrot.slane %v4547_v16, 5 }
 0x148   : > { %v1948_v32 = vrot.slane %v1947_v19, 4  ;;  %v2025_v44 = vrot.slane %v2023_v30, 1 }
 0x149   : > { %v1938_v38 = vrot.slane %v1937_v24, 4  ;;  %v1971_v51 = vor.u32 %v1970_v22, %v1966_v27  ;;  %v4548_v27 = vld [vmem:[%s5059_s26 + $0x2c] sm:$0x1] }
 0x14a   : > { %2104 = vrot.lane.b32.xlu1 %v2053_v34, %s4995_s9  ;;  %v2004_v34 = vunpack.c.l.b16 %v1905_v23  ;;  %v1953_v46 = vsel %vm5070_vm2, %v1948_v32, %v1952_v33  ;;  %v2026_v54 = vor.u32 %v2025_v44, %v2021_v43  ;;  %v4545_v32 = vld [vmem:[%s5059_s26 + $0x20] sm:$0x1]  ;;  %v2394_v33 = vunpack.c.l.b16 %v2291_v26 }
 0x14b   : > { %2102 = vrot.lane.b32.xlu0 %v2052_v36, %s4995_s9  ;;  %2100 = vrot.lane.b32.xlu2 %v2051_v45, %s4995_s9  ;;  %v2028_v45 = vshll.u32 %v2018_v29, 16  ;;  %v1943_v49 = vsel %vm5070_vm2, %v1938_v38, %v5761_v48  ;;  %v2008_v28 = vunpack.c.l.b16 %v1953_v46  ;;  %v1972_v60 = vrot.slane %v1971_v51, 4  ;;  %v4546_v29 = vld [vmem:[%s5059_s26 + $0x24] sm:$0xe]  ;;  %v4552_v51 = vld [vmem:[%s5059_s26 + $0x3c] sm:$0xe] }
 0x14c   : > { %v1463_v61 = vpop.permute.xlu1 %1462  ;;  %v2057_v47 = vpack.c.b16 %v2004_v34, %v2004_v34  ;;  %v2007_v57 = vunpack.c.l.b16 %v1943_v49  ;;  %v2303_v34 = vrot.slane %v2301_v13, 4  ;;  %v4587_v22 = vrot.slane %v4546_v29, 9 }
 0x14d   : > { %1550 = vst.msk [vmem:[#allocation2 + $0x24] sm:$0xf] %vm1540_vm9, %v1463_v61  ;;  %v1461_v3 = vpop.permute.xlu0 %1460  ;;  %v1477_v11 = vpop.permute.xlu2 %1476  ;;  %v2030_v55 = vrot.slane %v2028_v45, 1  ;;  %v2062_v61 = vpack.c.b16 %v2009_v53, %v2009_v53  ;;  %v2061_v63 = vpack.c.b16 %v2008_v28, %v2008_v28  ;;  %v1977_v37 = vsel %vm5070_vm2, %v1972_v60, %v1976_v50  ;;  %v4551_v28 = vld [vmem:[%s5059_s26 + $0x38] sm:$0x1] }
 0x14e   : > { %1549 = vst.msk [vmem:[#allocation2 + $0x20] sm:$0xf] %vm1540_vm9, %v1461_v3  ;;  %v2060_v0 = vpack.c.b16 %v2007_v57, %v2007_v57  ;;  %v4544_v3 = vld [vmem:[%s5059_s26 + $0x1c] sm:$0xf]  ;;  %v2010_v15 = vunpack.c.l.b16 %v1977_v37  ;;  %v2297_v42 = vrot.slane %v4545_v32, 5  ;;  %v2438_v45 = vpack.c.b16 %v2394_v33, %v2394_v33 }
 0x14f   : > { %1557 = vst.msk [vmem:[#allocation2 + $0x40] sm:$0xf] %vm1540_vm9, %v1477_v11  ;;  %v2031_v48 = vsel %vm2019_vm10, %v2026_v54, %v2030_v55  ;;  %v2294_v11 = vrot.slane %v4544_v3, 5  ;;  %v4561_v32 = vld [vmem:[%s5059_s26 + $0x60] sm:$0xe] }
 0x150   : > { %v2033_v7 = vunpack.c.h.b16 %v2031_v48  ;;  %v2063_v18 = vpack.c.b16 %v2010_v15, %v2010_v15  ;;  %v4562_v33 = vld [vmem:[%s5059_s26 + $0x64] sm:$0xf] }
 0x151   : > { %v2295_v24 = vsel %vm5245_vm6, %v4586_v10, %v2294_v11  ;;  %v2296_v41 = vrot.slane %v2294_v11, 4  ;;  %v4555_v10 = vld [vmem:[%s5059_s26 + $0x48] sm:$0xe] }
 0x152   : > { %2110 = vrot.lane.b32.xlu1 %v2056_v8, %s4995_s9  ;;  %v4540_v8 = vld [vmem:[%s5059_s26 + $0xc] sm:$0xe]  ;;  %v2065_v20 = vpack.c.b16 %v2033_v7, %v2033_v7 }
 0x153   : > { %2108 = vrot.lane.b32.xlu0 %v2055_v9, %s4995_s9  ;;  %2106 = vrot.lane.b32.xlu2 %v2054_v17, %s4995_s9  ;;  %v2032_v9 = vunpack.c.l.b16 %v2031_v48  ;;  %v4585_v19 = vrot.slane %v4540_v8, 9  ;;  %v2298_v54 = vsel %vm5245_vm6, %v2296_v41, %v2297_v42  ;;  %v2336_v41 = vrot.slane %v4562_v33, 5 }
 0x154   : > { %v1469_v31 = vpop.permute.xlu1 %1468 }
 0x155   : > { %1553 = vst.msk [vmem:[#allocation2 + $0x30] sm:$0xf] %vm1540_vm9, %v1469_v31  ;;  %v1467_v36 = vpop.permute.xlu0 %1466  ;;  %v1483_v40 = vpop.permute.xlu2 %1482  ;;  %v2064_v23 = vpack.c.b16 %v2032_v9, %v2032_v9  ;;  %v2288_v30 = vsel %vm5245_vm6, %v4585_v19, %v2287_v4  ;;  %v2395_v31 = vunpack.c.l.b16 %v2295_v24  ;;  %v4557_v9 = vld [vmem:[%s5059_s26 + $0x50] sm:$0x1]  ;;  %v4590_v19 = vrot.slane %v4555_v10, 9 }
 0x156   : > { %1552 = vst.msk [vmem:[#allocation2 + $0x2c] sm:$0xf] %vm1540_vm9, %v1467_v36  ;;  %v2304_v36 = vrot.slane %v4548_v27, 5  ;;  %v2325_v16 = vrot.slane %v4557_v9, 5  ;;  %v2317_v24 = vrot.slane %v2315_v59, 4 }
 0x157   : > { %1560 = vst.msk [vmem:[#allocation2 + $0x4c] sm:$0xf] %vm1540_vm9, %v1483_v40  ;;  %v4550_v40 = vld [vmem:[%s5059_s26 + $0x34] sm:$0xf]  ;;  %v2439_v43 = vpack.c.b16 %v2395_v31, %v2395_v31 }
 0x158   : > { %v2305_v46 = vsel %vm5245_vm6, %v2303_v34, %v2304_v36  ;;  %v2308_v53 = vrot.slane %v4550_v40, 5  ;;  %v4560_v36 = vld [vmem:[%s5059_s26 + $0x5c] sm:$0x1]  ;;  %v4592_v40 = vrot.slane %v4561_v32, 9 }
 0x159   : > { %v2398_v55 = vunpack.c.l.b16 %v2305_v46  ;;  %v4565_v46 = vld [vmem:[%s5059_s26 + $0x70] sm:$0xf] }
 0x15a   : > { %2116 = vrot.lane.b32.xlu1 %v2059_v39, %s4995_s9  ;;  %v2393_v39 = vunpack.c.l.b16 %v2288_v30  ;;  %v2310_v50 = vrot.slane %v2308_v53, 4 }
 0x15b   : > { %2114 = vrot.lane.b32.xlu0 %v2058_v35, %s4995_s9  ;;  %2112 = vrot.lane.b32.xlu2 %v2057_v47, %s4995_s9  ;;  %v2302_v47 = vsel %vm5245_vm6, %v4587_v22, %v2301_v13  ;;  %v2442_v2 = vpack.c.b16 %v2398_v55, %v2398_v55  ;;  %v2318_v13 = vrot.slane %v4554_v14, 5  ;;  %v4570_v14 = vld [vmem:[%s5059_s26 + $0x84] sm:$0xe] }
 0x15c   : > { %v1475_v56 = vpop.permute.xlu1 %1474  ;;  %v2437_v49 = vpack.c.b16 %v2393_v39, %v2393_v39  ;;  %v2397_v57 = vunpack.c.l.b16 %v2302_v47  ;;  %v4558_v39 = vld [vmem:[%s5059_s26 + $0x54] sm:$0xe] }
 0x15d   : > { %1556 = vst.msk [vmem:[#allocation2 + $0x3c] sm:$0xf] %vm1540_vm9, %v1475_v56  ;;  %v1473_v58 = vpop.permute.xlu0 %1472  ;;  %v1489_v62 = vpop.permute.xlu2 %1488  ;;  %v4549_v56 = vld [vmem:[%s5059_s26 + $0x30] sm:$0xe] }
 0x15e   : > { %1555 = vst.msk [vmem:[#allocation2 + $0x38] sm:$0xf] %vm1540_vm9, %v1473_v58  ;;  %v4589_v58 = vrot.slane %v4552_v51, 9  ;;  %v2441_v4 = vpack.c.b16 %v2397_v57, %v2397_v57  ;;  %v4566_v57 = vld [vmem:[%s5059_s26 + $0x74] sm:$0x1] }
 0x15f   : > { %1563 = vst.msk [vmem:[#allocation2 + $0x58] sm:$0xf] %vm1540_vm9, %v1489_v62  ;;  %v2396_v62 = vunpack.c.l.b16 %v2298_v54  ;;  %v2343_v54 = vrot.slane %v4565_v46, 5 }
 0x160   : > { %v2316_v6 = vsel %vm5245_vm6, %v4589_v58, %v2315_v59  ;;  %v4564_v58 = vld [vmem:[%s5059_s26 + $0x6c] sm:$0xe] }
 0x161   : > { %v2440_v8 = vpack.c.b16 %v2396_v62, %v2396_v62  ;;  %v2345_v62 = vrot.slane %v2343_v54, 4 }
 0x162   : > { %2122 = vrot.lane.b32.xlu1 %v2062_v61, %s4995_s9  ;;  %v2311_v61 = vrot.slane %v4551_v28, 5  ;;  %v2337_v28 = vsel %vm5245_vm6, %v4592_v40, %v2336_v41  ;;  %v4573_v40 = vld [vmem:[%s5059_s26 + $0x90] sm:$0xe] }
 0x163   : > { %2120 = vrot.lane.b32.xlu0 %v2061_v63, %s4995_s9  ;;  %2118 = vrot.lane.b32.xlu2 %v2060_v0, %s4995_s9  ;;  %v4556_v63 = vld [vmem:[%s5059_s26 + $0x4c] sm:$0xf]  ;;  %v4588_v0 = vrot.slane %v4549_v56, 9 }
 0x164   : > { %v1481_v12 = vpop.permute.xlu1 %1480  ;;  %v2322_v37 = vrot.slane %v4556_v63, 5  ;;  %v2312_v7 = vsel %vm5245_vm6, %v2310_v50, %v2311_v61  ;;  %v4563_v50 = vld [vmem:[%s5059_s26 + $0x68] sm:$0x1]  ;;  %v2346_v63 = vrot.slane %v4566_v57, 5 }
 0x165   : > { %1559 = vst.msk [vmem:[#allocation2 + $0x48] sm:$0xf] %vm1540_vm9, %v1481_v12  ;;  %v1479_v17 = vpop.permute.xlu0 %1478  ;;  %v1495_v21 = vpop.permute.xlu2 %1494  ;;  %v2309_v11 = vsel %vm5245_vm6, %v4588_v0, %v2308_v53  ;;  %v2401_v12 = vunpack.c.l.b16 %v2316_v6  ;;  %v2400_v5 = vunpack.c.l.b16 %v2312_v7  ;;  %v4593_v0 = vrot.slane %v4564_v58, 9 }
 0x166   : > { %1558 = vst.msk [vmem:[#allocation2 + $0x44] sm:$0xf] %vm1540_vm9, %v1479_v17  ;;  %v2324_v15 = vrot.slane %v2322_v37, 4  ;;  %v2323_v30 = vsel %vm5245_vm6, %v4590_v19, %v2322_v37  ;;  %v2338_v6 = vrot.slane %v2336_v41, 4  ;;  %v2339_v37 = vrot.slane %v4563_v50, 5 }
 0x167   : > { %1566 = vst.msk [vmem:[#allocation2 + $0x64] sm:$0xf] %vm1540_vm9, %v1495_v21  ;;  %v2445_v26 = vpack.c.b16 %v2401_v12, %v2401_v12  ;;  %v2444_v27 = vpack.c.b16 %v2400_v5, %v2400_v5  ;;  %v2347_v10 = vsel %vm5245_vm6, %v2345_v62, %v2346_v63  ;;  %v4571_v5 = vld [vmem:[%s5059_s26 + $0x88] sm:$0xf]  ;;  %v4578_v63 = vld [vmem:[%s5059_s26 + $0xa4] sm:$0x1] }
 0x168   : > { %v2326_v29 = vsel %vm5245_vm6, %v2324_v15, %v2325_v16  ;;  %v4569_v16 = vld [vmem:[%s5059_s26 + $0x80] sm:$0x1]  ;;  %v2410_v19 = vunpack.c.l.b16 %v2347_v10  ;;  %v4579_v50 = vld [vmem:[%s5059_s26 + $0xa8] sm:$0xe]  ;;  %v4583_v10 = vld [vmem:[%s5059_s26 + $0xb8] sm:$0xf] }
 0x169   : > { %v2404_v22 = vunpack.c.l.b16 %v2326_v29  ;;  %v4574_v29 = vld [vmem:[%s5059_s26 + $0x94] sm:$0xf] }
 0x16a   : > { %2128 = vrot.lane.b32.xlu1 %v2065_v20, %s4995_s9  ;;  %v2399_v20 = vunpack.c.l.b16 %v2309_v11  ;;  %v2344_v11 = vsel %vm5245_vm6, %v4593_v0, %v2343_v54  ;;  %v2454_v32 = vpack.c.b16 %v2410_v19, %v2410_v19 }
 0x16b   : > { %2126 = vrot.lane.b32.xlu0 %v2064_v23, %s4995_s9  ;;  %2124 = vrot.lane.b32.xlu2 %v2063_v18, %s4995_s9  ;;  %v4559_v23 = vld [vmem:[%s5059_s26 + $0x58] sm:$0xf]  ;;  %v2448_v51 = vpack.c.b16 %v2404_v22, %v2404_v22 }
 0x16c   : > { %v1487_v38 = vpop.permute.xlu1 %1486  ;;  %v2443_v31 = vpack.c.b16 %v2399_v20, %v2399_v20  ;;  %v2329_v34 = vrot.slane %v4559_v23, 5  ;;  %v4567_v20 = vld [vmem:[%s5059_s26 + $0x78] sm:$0xe]  ;;  %v4595_v23 = vrot.slane %v4570_v14, 9 }
 0x16d   : > { %1562 = vst.msk [vmem:[#allocation2 + $0x54] sm:$0xf] %vm1540_vm9, %v1487_v38  ;;  %v1485_v35 = vpop.permute.xlu0 %1484  ;;  %v1501_v44 = vpop.permute.xlu2 %1500  ;;  %v2319_v38 = vsel %vm5245_vm6, %v2317_v24, %v2318_v13  ;;  %v2357_v24 = vrot.slane %v4571_v5, 5 }
 0x16e   : > { %1561 = vst.msk [vmem:[#allocation2 + $0x50] sm:$0xf] %vm1540_vm9, %v1485_v35  ;;  %v2403_v35 = vunpack.c.l.b16 %v2323_v30 }
 0x16f   : > { %1569 = vst.msk [vmem:[#allocation2 + $0x70] sm:$0xf] %vm1540_vm9, %v1501_v44  ;;  %v2332_v44 = vrot.slane %v4560_v36, 5  ;;  %v2358_v36 = vsel %vm5245_vm6, %v4595_v23, %v2357_v24  ;;  %v4582_v23 = vld [vmem:[%s5059_s26 + $0xb4] sm:$0xe] }
 0x170   : > { %v2447_v53 = vpack.c.b16 %v2403_v35, %v2403_v35  ;;  %v4575_v35 = vld [vmem:[%s5059_s26 + $0x98] sm:$0x1] }
 0x171   : > { %v2367_v46 = vrot.slane %v4575_v35, 5 }
 0x172   : > { %2473 = vrot.lane.b32.xlu1 %v2439_v43, %s4996_s10  ;;  %v2331_v43 = vrot.slane %v2329_v34, 4 }
 0x173   : > { %2471 = vrot.lane.b32.xlu0 %v2438_v45, %s4996_s10  ;;  %2469 = vrot.lane.b32.xlu2 %v2437_v49, %s4996_s10  ;;  %v2402_v45 = vunpack.c.l.b16 %v2319_v38  ;;  %v4591_v49 = vrot.slane %v4558_v39, 9  ;;  %v2364_v38 = vrot.slane %v4574_v29, 5 }
 0x174   : > { %v1493_v60 = vpop.permute.xlu1 %1492  ;;  %v2333_v55 = vsel %vm5245_vm6, %v2331_v43, %v2332_v44  ;;  %v4572_v43 = vld [vmem:[%s5059_s26 + $0x8c] sm:$0x1] }
 0x175   : > { %1565 = vst.msk [vmem:[#allocation2 + $0x60] sm:$0xf] %vm1540_vm9, %v1493_v60  ;;  %v1491_v48 = vpop.permute.xlu0 %1490  ;;  %v1507_v3 = vpop.permute.xlu2 %1506  ;;  %v2446_v56 = vpack.c.b16 %v2402_v45, %v2402_v45  ;;  %v2330_v59 = vsel %vm5245_vm6, %v4591_v49, %v2329_v34  ;;  %v2407_v60 = vunpack.c.l.b16 %v2337_v28  ;;  %v2406_v61 = vunpack.c.l.b16 %v2333_v55 }
 0x176   : > { %1564 = vst.msk [vmem:[#allocation2 + $0x5c] sm:$0xf] %vm1540_vm9, %v1491_v48  ;;  %v2366_v45 = vrot.slane %v2364_v38, 4  ;;  %v4596_v49 = vrot.slane %v4573_v40, 9  ;;  %v2359_v28 = vrot.slane %v2357_v24, 4  ;;  %v2360_v54 = vrot.slane %v4572_v43, 5 }
 0x177   : > { %1572 = vst.msk [vmem:[#allocation2 + $0x7c] sm:$0xf] %vm1540_vm9, %v1507_v3  ;;  %v2451_v7 = vpack.c.b16 %v2407_v60, %v2407_v60  ;;  %v2450_v9 = vpack.c.b16 %v2406_v61, %v2406_v61  ;;  %v4580_v61 = vld [vmem:[%s5059_s26 + $0xac] sm:$0xf] }
 0x178   : > { %v2368_v58 = vsel %vm5245_vm6, %v2366_v45, %v2367_v46 }
 0x179   : > { %v2416_v0 = vunpack.c.l.b16 %v2368_v58 }
 0x17a   : > { %2479 = vrot.lane.b32.xlu1 %v2442_v2, %s4996_s10  ;;  %v2405_v2 = vunpack.c.l.b16 %v2330_v59  ;;  %v2365_v59 = vsel %vm5245_vm6, %v4596_v49, %v2364_v38 }
 0x17b   : > { %2477 = vrot.lane.b32.xlu0 %v2441_v4, %s4996_s10  ;;  %2475 = vrot.lane.b32.xlu2 %v2440_v8, %s4996_s10  ;;  %v4568_v4 = vld [vmem:[%s5059_s26 + $0x7c] sm:$0xf]  ;;  %v2460_v14 = vpack.c.b16 %v2416_v0, %v2416_v0 }
 0x17c   : > { %v1499_v17 = vpop.permute.xlu1 %1498  ;;  %v2449_v12 = vpack.c.b16 %v2405_v2, %v2405_v2  ;;  %v2350_v15 = vrot.slane %v4568_v4, 5  ;;  %v4576_v2 = vld [vmem:[%s5059_s26 + $0x9c] sm:$0xe]  ;;  %v4598_v4 = vrot.slane %v4579_v50, 9 }
 0x17d   : > { %1568 = vst.msk [vmem:[#allocation2 + $0x6c] sm:$0xf] %vm1540_vm9, %v1499_v17  ;;  %v1497_v21 = vpop.permute.xlu0 %1496  ;;  %v2071_v18 = vpop.permute.xlu2 %2070  ;;  %v2340_v17 = vsel %vm5245_vm6, %v2338_v6, %v2339_v37  ;;  %v2378_v6 = vrot.slane %v4580_v61, 5 }
 0x17e   : > { %1567 = vst.msk [vmem:[#allocation2 + $0x68] sm:$0xf] %vm1540_vm9, %v1497_v21  ;;  %v2409_v21 = vunpack.c.l.b16 %v2344_v11 }
 0x17f   : > { %2165 = vst.msk [vmem:[#allocation2 + $0x8] sm:$0xf] %vm2162_vm11, %v2071_v18  ;;  %v2353_v18 = vrot.slane %v4569_v16, 5  ;;  %v2379_v16 = vsel %vm5245_vm6, %v4598_v4, %v2378_v6 }
 0x180   : > { %v2453_v34 = vpack.c.b16 %v2409_v21, %v2409_v21  ;;  %v4584_v21 = vld [vmem:[%s5059_s26 + $0xbc] sm:$0x1] }
 0x182   : > { %2485 = vrot.lane.b32.xlu1 %v2445_v26, %s4996_s10  ;;  %v2352_v26 = vrot.slane %v2350_v15, 4 }
 0x183   : > { %2483 = vrot.lane.b32.xlu0 %v2444_v27, %s4996_s10  ;;  %2481 = vrot.lane.b32.xlu2 %v2443_v31, %s4996_s10  ;;  %v2408_v27 = vunpack.c.l.b16 %v2340_v17  ;;  %v4594_v31 = vrot.slane %v4567_v20, 9  ;;  %v2385_v17 = vrot.slane %v4583_v10, 5 }
 0x184   : > { %v1505_v42 = vpop.permute.xlu1 %1504  ;;  %v2354_v22 = vsel %vm5245_vm6, %v2352_v26, %v2353_v18  ;;  %v2419_v26 = vunpack.c.l.b16 %v2379_v16  ;;  %v4581_v18 = vld [vmem:[%s5059_s26 + $0xb0] sm:$0x1]  ;;  %v4610_v16 = vld [vmem:[%s5059_s26 + $0x3c] sm:$0xff]  }
 0x185   : > { %1571 = vst.msk [vmem:[#allocation2 + $0x78] sm:$0xf] %vm1540_vm9, %v1505_v42  ;;  %v1503_v47 = vpop.permute.xlu0 %1502  ;;  %v2077_v52 = vpop.permute.xlu2 %2076  ;;  %v2452_v39 = vpack.c.b16 %v2408_v27, %v2408_v27  ;;  %v2351_v41 = vsel %vm5245_vm6, %v4594_v31, %v2350_v15  ;;  %v2413_v42 = vunpack.c.l.b16 %v2358_v36  ;;  %v2412_v44 = vunpack.c.l.b16 %v2354_v22  ;;  %v4826_v22 = vld [vmem:[%s5547_s8] sm:$0xf0] }
 0x186   : > { %1570 = vst.msk [vmem:[#allocation2 + $0x74] sm:$0xf] %vm1540_vm9, %v1503_v47  ;;  %v2387_v29 = vrot.slane %v2385_v17, 4  ;;  %v2381_v35 = vrot.slane %v4581_v18, 5  ;;  %v2463_v40 = vpack.c.b16 %v2419_v26, %v2419_v26 }
 0x187   : > { %2168 = vst.msk [vmem:[#allocation2 + $0x14] sm:$0xf] %vm2162_vm11, %v2077_v52  ;;  %v2457_v55 = vpack.c.b16 %v2413_v42, %v2413_v42  ;;  %v2456_v57 = vpack.c.b16 %v2412_v44, %v2412_v44 }
 0x18a   : > { %2491 = vrot.lane.b32.xlu1 %v2448_v51, %s4996_s10  ;;  %v2411_v51 = vunpack.c.l.b16 %v2351_v41 }
 0x18b   : > { %2489 = vrot.lane.b32.xlu0 %v2447_v53, %s4996_s10  ;;  %2487 = vrot.lane.b32.xlu2 %v2446_v56, %s4996_s10  ;;  %v4577_v53 = vld [vmem:[%s5059_s26 + $0xa0] sm:$0xf] }
 0x18c   : > { %v2069_v48 = vpop.permute.xlu1 %2068  ;;  %v2455_v60 = vpack.c.b16 %v2411_v51, %v2411_v51  ;;  %v2371_v62 = vrot.slane %v4577_v53, 5 }
 0x18d   : > { %2164 = vst.msk [vmem:[#allocation2 + $0x4] sm:$0xf] %vm2162_vm11, %v2069_v48  ;;  %v2067_v3 = vpop.permute.xlu0 %2066  ;;  %v2083_v8 = vpop.permute.xlu2 %2082  ;;  %v2361_v48 = vsel %vm5245_vm6, %v2359_v28, %v2360_v54 }
 0x18e   : > { %2163 = vst.msk [vmem:[#allocation2] sm:$0xf] %vm2162_vm11, %v2067_v3  ;;  %v2415_v3 = vunpack.c.l.b16 %v2365_v59 }
 0x18f   : > { %2171 = vst.msk [vmem:[#allocation2 + $0x20] sm:$0xf] %vm2162_vm11, %v2083_v8  ;;  %v2374_v8 = vrot.slane %v4578_v63, 5 }
 0x190   : > { %v2459_v15 = vpack.c.b16 %v2415_v3, %v2415_v3 }
 0x192   : > { %2497 = vrot.lane.b32.xlu1 %v2451_v7, %s4996_s10  ;;  %v2373_v7 = vrot.slane %v2371_v62, 4 }
 0x193   : > { %2495 = vrot.lane.b32.xlu0 %v2450_v9, %s4996_s10  ;;  %2493 = vrot.lane.b32.xlu2 %v2449_v12, %s4996_s10  ;;  %v2414_v9 = vunpack.c.l.b16 %v2361_v48  ;;  %v4597_v12 = vrot.slane %v4576_v2, 9 }
 0x194   : > { %v2075_v13 = vpop.permute.xlu1 %2074  ;;  %v2375_v19 = vsel %vm5245_vm6, %v2373_v7, %v2374_v8 }
 0x195   : > { %2167 = vst.msk [vmem:[#allocation2 + $0x10] sm:$0xf] %vm2162_vm11, %v2075_v13  ;;  %v2073_v30 = vpop.permute.xlu0 %2072  ;;  %v2089_v33 = vpop.permute.xlu2 %2088  ;;  %v2458_v20 = vpack.c.b16 %v2414_v9, %v2414_v9  ;;  %v2372_v24 = vsel %vm5245_vm6, %v4597_v12, %v2371_v62  ;;  %v2392_v13 = vld [vmem:[%s5547_s8 + $0x8] sm:$0x1]  ;;  %v2418_v27 = vunpack.c.l.b16 %v2375_v19 }
 0x196   : > { %2166 = vst.msk [vmem:[#allocation2 + $0xc] sm:$0xf] %vm2162_vm11, %v2073_v30  ;;  %v2388_v30 = vrot.slane %v4584_v21, 5  ;;  %v2428_v36 = vunpack.c.l.b16 %v2392_v13 }
 0x197   : > { %2174 = vst.msk [vmem:[#allocation2 + $0x2c] sm:$0xf] %vm2162_vm11, %v2089_v33  ;;  %v2417_v33 = vunpack.c.l.b16 %v2372_v24  ;;  %v2462_v42 = vpack.c.b16 %v2418_v27, %v2418_v27 }
 0x198   : > { %v2389_v43 = vsel %vm5245_vm6, %v2387_v29, %v2388_v30  ;;  %v4918_v29 = vld [vmem:[%s5059_s26 + $0x48] sm:$0xff]  }
 0x199   : > { %v2461_v45 = vpack.c.b16 %v2417_v33, %v2417_v33  ;;  %v2422_v51 = vunpack.c.l.b16 %v2389_v43  ;;  %v4887_v33 = vunpack.c.l.b16 %v4918_v29  ;;  %v4615_v43 = vld [vmem:[%s5059_s26 + $0x54] sm:$0xff]  }
 0x19a   : > { %2503 = vrot.lane.b32.xlu1 %v2454_v32, %s4996_s10  ;;  %v4599_v32 = vrot.slane %v4582_v23, 9 }
 0x19b   : > { %2501 = vrot.lane.b32.xlu0 %v2453_v34, %s4996_s10  ;;  %2499 = vrot.lane.b32.xlu2 %v2452_v39, %s4996_s10  ;;  %v4602_v34 = vld [vmem:[%s5547_s8] sm:$0xe]  ;;  %v2380_v39 = vrot.slane %v2378_v6, 4 }
 0x19c   : > { %v2081_v47 = vpop.permute.xlu1 %2080  ;;  %v2386_v44 = vsel %vm5245_vm6, %v4599_v32, %v2385_v17  ;;  %v4603_v46 = vor.u32 %v4826_v22, %v4602_v34  ;;  %v4917_v17 = vld [vmem:[%s5059_s26 + $0x30] sm:$0xff]   ;;  %v4656_v32 = vld [vmem:[%s5059_s26 + $0x78] sm:$0xf] }
 0x19d   : > { %2170 = vst.msk [vmem:[#allocation2 + $0x1c] sm:$0xf] %vm2162_vm11, %v2081_v47  ;;  %v2079_v52 = vpop.permute.xlu0 %2078  ;;  %v2095_v56 = vpop.permute.xlu2 %2094  ;;  %v2430_v47 = vpack.c.b16 %v2428_v36, %v2428_v36  ;;  %v2382_v49 = vsel %vm5245_vm6, %v2380_v39, %v2381_v35  ;;  %v4884_v21 = vunpack.c.h.b16 %v4917_v17  ;;  %v4883_v24 = vunpack.c.l.b16 %v4917_v17 }
 0x19e   : > { %2169 = vst.msk [vmem:[#allocation2 + $0x18] sm:$0xf] %vm2162_vm11, %v2079_v52  ;;  %v2421_v52 = vunpack.c.l.b16 %v2386_v44  ;;  %v2432_v28 = vrot.slane %v4603_v46, 1  ;;  %v2666_v36 = vunpack.c.h.b16 %v4610_v16  ;;  %v3091_v22 = vshrl.u32 %v4656_v32, 16 }
 0x19f   : > { %2177 = vst.msk [vmem:[#allocation2 + $0x38] sm:$0xf] %vm2162_vm11, %v2095_v56  ;;  %v2433_v54 = vrot.slane %v2430_v47, 1  ;;  %v2700_v27 = vpack.c.b16 %v4884_v21, %v4884_v21  ;;  %v2699_v30 = vpack.c.b16 %v4883_v24, %v4883_v24  ;;  %v3094_v39 = vshll.u32 %v4656_v32, 16  ;;  %v4658_v24 = vld [vmem:[%s5059_s26 + $0x80] sm:$0x1] }
 0x1a0   : > { %v2465_v59 = vpack.c.b16 %v2421_v52, %v2421_v52  ;;  %v2702_v44 = vpack.c.b16 %v2666_v36, %v2666_v36  ;;  %v3093_v46 = vrot.slane %v3091_v22, 4  ;;  %v4669_v52 = vld [vmem:[%s5059_s26 + $0xac] sm:$0xf] }
 0x1a1   : > { %v2434_v50 = vsel %vm2431_vm12, %v2432_v28, %v2433_v54  ;;  %v3096_v47 = vrot.slane %v3094_v39, 5  ;;  %v2669_v54 = vunpack.c.l.b16 %v4615_v43 }
 0x1a2   : > { %2509 = vrot.lane.b32.xlu1 %v2457_v55, %s4996_s10  ;;  %v2420_v55 = vunpack.c.l.b16 %v2382_v49  ;;  %v2436_v63 = vunpack.c.h.b16 %v2434_v50  ;;  %v2435_v0 = vunpack.c.l.b16 %v2434_v50  ;;  %v4657_v49 = vld [vmem:[%s5059_s26 + $0x7c] sm:$0xf]  ;;  %v3196_v50 = vshll.u32 %v4669_v52, 16 }
 0x1a3   : > { %2507 = vrot.lane.b32.xlu0 %v2456_v57, %s4996_s10  ;;  %2505 = vrot.lane.b32.xlu2 %v2455_v60, %s4996_s10  ;;  %v2466_v57 = vpack.c.b16 %v2422_v51, %v2422_v51  ;;  %v4916_v60 = vld [vmem:[%s5059_s26 + $0x18] sm:$0xff]   ;;  %v2670_v51 = vunpack.c.h.b16 %v4615_v43 }
 0x1a4   : > { %v2087_v37 = vpop.permute.xlu1 %2086  ;;  %v2464_v61 = vpack.c.b16 %v2420_v55, %v2420_v55  ;;  %v4879_v62 = vunpack.c.l.b16 %v4916_v60  ;;  %v2468_v6 = vpack.c.b16 %v2436_v63, %v2436_v63  ;;  %v2467_v7 = vpack.c.b16 %v2435_v0, %v2435_v0 }
 0x1a5   : > { %2173 = vst.msk [vmem:[#allocation2 + $0x28] sm:$0xf] %vm2162_vm11, %v2087_v37  ;;  %v2085_v11 = vpop.permute.xlu0 %2084  ;;  %v2101_v5 = vpop.permute.xlu2 %2100  ;;  %v4607_v37 = vld [vmem:[%s5059_s26 + $0x24] sm:$0xff]   ;;  %v2705_v0 = vpack.c.b16 %v2669_v54, %v2669_v54 }
 0x1a6   : > { %2172 = vst.msk [vmem:[#allocation2 + $0x24] sm:$0xf] %vm2162_vm11, %v2085_v11  ;;  %v2695_v3 = vpack.c.b16 %v4879_v62, %v4879_v62  ;;  %v2662_v8 = vunpack.c.h.b16 %v4607_v37  ;;  %v2661_v9 = vunpack.c.l.b16 %v4607_v37  ;;  %v4880_v11 = vunpack.c.h.b16 %v4916_v60 }
 0x1a7   : > { %2180 = vst.msk [vmem:[#allocation2 + $0x44] sm:$0xf] %vm2162_vm11, %v2101_v5  ;;  %v3198_v37 = vrot.slane %v3196_v50, 5 }
 0x1a8   : > { %v2696_v19 = vpack.c.b16 %v4880_v11, %v4880_v11  ;;  %v4670_v11 = vld [vmem:[%s5059_s26 + $0xb0] sm:$0x1] }
 0x1a9   : > { %v3206_v21 = vshll.u32 %v4670_v11, 16 }
 0x1aa   : > { %2515 = vrot.lane.b32.xlu1 %v2460_v14, %s4996_s10  ;;  %v2698_v14 = vpack.c.b16 %v2662_v8, %v2662_v8 }
 0x1ab   : > { %2513 = vrot.lane.b32.xlu0 %v2459_v15, %s4996_s10  ;;  %2511 = vrot.lane.b32.xlu2 %v2458_v20, %s4996_s10  ;;  %v2697_v15 = vpack.c.b16 %v2661_v9, %v2661_v9  ;;  %v2665_v20 = vunpack.c.l.b16 %v4610_v16 }
 0x1ac   : > { %v2093_v31 = vpop.permute.xlu1 %2092 }
 0x1ad   : > { %2176 = vst.msk [vmem:[#allocation2 + $0x34] sm:$0xf] %vm2162_vm11, %v2093_v31  ;;  %v2091_v38 = vpop.permute.xlu0 %2090  ;;  %v2107_v41 = vpop.permute.xlu2 %2106  ;;  %v2701_v26 = vpack.c.b16 %v2665_v20, %v2665_v20  ;;  %v4888_v31 = vunpack.c.h.b16 %v4918_v29  ;;  %v6030_v29 = vld [vmem:[%s5059_s26 + $0x7c] sm:$0xf] }
 0x1ae   : > { %2175 = vst.msk [vmem:[#allocation2 + $0x30] sm:$0xf] %vm2162_vm11, %v2091_v38  ;;  %v3623_v39 = vrot.slane %v6030_v29, 5 }
 0x1af   : > { %2183 = vst.msk [vmem:[#allocation2 + $0x50] sm:$0xf] %vm2162_vm11, %v2107_v41  ;;  %v2704_v35 = vpack.c.b16 %v4888_v31, %v4888_v31  ;;  %v3110_v31 = vshll.u32 %v4658_v24, 16 }
 0x1b2   : > { %2521 = vrot.lane.b32.xlu1 %v2463_v40, %s4996_s10  ;;  %v6002_v40 = vld [vmem:[%s5059_s26 + $0x60] sm:$0xff]  }
 0x1b3   : > { %2519 = vrot.lane.b32.xlu0 %v2462_v42, %s4996_s10  ;;  %2517 = vrot.lane.b32.xlu2 %v2461_v45, %s4996_s10  ;;  %v2703_v42 = vpack.c.b16 %v4887_v33, %v4887_v33  ;;  %v4891_v45 = vunpack.c.l.b16 %v6002_v40 }
 0x1b4   : > { %v2099_v53 = vpop.permute.xlu1 %2098 }
 0x1b5   : > { %2179 = vst.msk [vmem:[#allocation2 + $0x40] sm:$0xf] %vm2162_vm11, %v2099_v53  ;;  %v2097_v56 = vpop.permute.xlu0 %2096  ;;  %v2113_v58 = vpop.permute.xlu2 %2112  ;;  %v4668_v53 = vld [vmem:[%s5059_s26 + $0xa8] sm:$0xf] }
 0x1b6   : > { %2178 = vst.msk [vmem:[#allocation2 + $0x3c] sm:$0xf] %vm2162_vm11, %v2097_v56  ;;  %v2707_v56 = vpack.c.b16 %v4891_v45, %v4891_v45  ;;  %v3187_v62 = vshrl.u32 %v4668_v53, 16  ;;  %v3190_v63 = vshll.u32 %v4668_v53, 16  ;;  %v4700_v53 = vld [vmem:[%s5059_s26 + $0x80] sm:$0x1] }
 0x1b7   : > { %2186 = vst.msk [vmem:[#allocation2 + $0x5c] sm:$0xf] %vm2162_vm11, %v2113_v58  ;;  %v3097_v58 = vor.u32 %v3096_v47, %v3093_v46 }
 0x1b8   : > { %v3189_v8 = vrot.slane %v3187_v62, 4  ;;  %v3192_v9 = vrot.slane %v3190_v63, 5  ;;  %v3625_v62 = vrot.slane %v3623_v39, 4  ;;  %v3626_v63 = vrot.slane %v4700_v53, 5 }
 0x1ba   : > { %2527 = vrot.lane.b32.xlu1 %v2466_v57, %s4996_s10  ;;  %v4920_v57 = vld [vmem:[%s5059_s26 + $0x78] sm:$0xff]  }
 0x1bb   : > { %2525 = vrot.lane.b32.xlu0 %v2465_v59, %s4996_s10  ;;  %2523 = vrot.lane.b32.xlu2 %v2464_v61, %s4996_s10  ;;  %v3100_v59 = vshll.u32 %v4657_v49, 16  ;;  %v3200_v61 = vshrl.u32 %v4669_v52, 16  ;;  %v6046_v52 = vld [vmem:[%s5059_s26 + $0xac] sm:$0xf] }
 0x1bc   : > { %v2105_v48 = vpop.permute.xlu1 %2104 }
 0x1bd   : > { %2182 = vst.msk [vmem:[#allocation2 + $0x4c] sm:$0xf] %vm2162_vm11, %v2105_v48  ;;  %v2103_v2 = vpop.permute.xlu0 %2102  ;;  %v2119_v4 = vpop.permute.xlu2 %2118  ;;  %v2706_v48 = vpack.c.b16 %v2670_v51, %v2670_v51 }
 0x1be   : > { %2181 = vst.msk [vmem:[#allocation2 + $0x48] sm:$0xf] %vm2162_vm11, %v2103_v2  ;;  %v4896_v2 = vunpack.c.h.b16 %v4920_v57 }
 0x1bf   : > { %2189 = vst.msk [vmem:[#allocation2 + $0x68] sm:$0xf] %vm2162_vm11, %v2119_v4  ;;  %v3102_v4 = vrot.slane %v3100_v59, 5 }
 0x1c2   : > { %2727 = vrot.lane.b32.xlu1 %v2695_v3, %s4997_s11  ;;  %v3098_v3 = vrot.slane %v3097_v58, 4 }
 0x1c3   : > { %2531 = vrot.lane.b32.xlu0 %v2468_v6, %s4996_s10  ;;  %2529 = vrot.lane.b32.xlu2 %v2467_v7, %s4996_s10  ;;  %v3104_v6 = vshrl.u32 %v4657_v49, 16  ;;  %v3202_v7 = vrot.slane %v3200_v61, 4  ;;  %v3651_v61 = vrot.slane %v6046_v52, 5 }
 0x1c4   : > { %v2111_v10 = vpop.permute.xlu1 %2110  ;;  %v3103_v17 = vsel %vm5070_vm2, %v3098_v3, %v3102_v4 }
 0x1c5   : > { %2185 = vst.msk [vmem:[#allocation2 + $0x58] sm:$0xf] %vm2162_vm11, %v2111_v10  ;;  %v2109_v12 = vpop.permute.xlu0 %2108  ;;  %v2125_v5 = vpop.permute.xlu2 %2124  ;;  %v4895_v10 = vunpack.c.l.b16 %v4920_v57  ;;  %v3106_v16 = vrot.slane %v3104_v6, 4  ;;  %v3203_v20 = vor.u32 %v3202_v7, %v3198_v37 }
 0x1c6   : > { %2184 = vst.msk [vmem:[#allocation2 + $0x54] sm:$0xf] %vm2162_vm11, %v2109_v12 }
 0x1c7   : > { %2192 = vst.msk [vmem:[#allocation2 + $0x74] sm:$0xf] %vm2162_vm11, %v2125_v5  ;;  %v3204_v33 = vrot.slane %v3203_v20, 4 }
 0x1ca   : > { %2733 = vrot.lane.b32.xlu1 %v2698_v14, %s4997_s11  ;;  %v4892_v14 = vunpack.c.h.b16 %v6002_v40  ;;  %v4632_v40 = vld [vmem:[%s5059_s26 + $0x18] sm:$0xf] }
 0x1cb   : > { %2731 = vrot.lane.b32.xlu0 %v2697_v15, %s4997_s11  ;;  %2729 = vrot.lane.b32.xlu2 %v2696_v19, %s4997_s11  ;;  %v2712_v15 = vpack.c.b16 %v4896_v2, %v4896_v2 }
 0x1cc   : > { %v2117_v23 = vpop.permute.xlu1 %2116 }
 0x1cd   : > { %2188 = vst.msk [vmem:[#allocation2 + $0x64] sm:$0xf] %vm2162_vm11, %v2117_v23  ;;  %v2115_v13 = vpop.permute.xlu0 %2114  ;;  %v2470_v18 = vpop.permute.xlu2 %2469  ;;  %v3193_v23 = vor.u32 %v3192_v9, %v3189_v8  ;;  %v4645_v8 = vld [vmem:[%s5059_s26 + $0x4c] sm:$0xf] }
 0x1ce   : > { %2187 = vst.msk [vmem:[#allocation2 + $0x60] sm:$0xf] %vm2162_vm11, %v2115_v13  ;;  %v2711_v13 = vpack.c.b16 %v4895_v10, %v4895_v10 }
 0x1cf   : > { %2566 = vst.msk [vmem:[#allocation2] sm:$0xf] %vm2565_vm13, %v2470_v18  ;;  %v2708_v18 = vpack.c.b16 %v4892_v14, %v4892_v14  ;;  %v3194_v36 = vrot.slane %v3193_v23, 4  ;;  %v3008_v23 = vshrl.u32 %v4645_v8, 16 }
 0x1d1   : > { %v3199_v49 = vsel %vm5070_vm2, %v3194_v36, %v3198_v37  ;;  %v3010_v36 = vrot.slane %v3008_v23, 4 }
 0x1d2   : > { %2739 = vrot.lane.b32.xlu1 %v2701_v26, %s4997_s11  ;;  %v4922_v26 = vld [vmem:[%s5059_s26 + $0xa8] sm:$0xff]   ;;  %v3312_v59 = vunpack.c.l.b16 %v3199_v49 }
 0x1d3   : > { %2737 = vrot.lane.b32.xlu0 %v2700_v27, %s4997_s11  ;;  %2735 = vrot.lane.b32.xlu2 %v2699_v30, %s4997_s11  ;;  %v3304_v27 = vunpack.c.l.b16 %v3103_v17  ;;  %v3107_v30 = vor.u32 %v3106_v16, %v3102_v4  ;;  %v4904_v32 = vunpack.c.h.b16 %v4922_v26  ;;  %v4903_v22 = vunpack.c.l.b16 %v4922_v26  ;;  %v4644_v17 = vld [vmem:[%s5059_s26 + $0x48] sm:$0xf] }
 0x1d4   : > { %v2123_v34 = vpop.permute.xlu1 %2122  ;;  %v2995_v26 = vshrl.u32 %v4644_v17, 16 }
 0x1d5   : > { %2191 = vst.msk [vmem:[#allocation2 + $0x70] sm:$0xf] %vm2162_vm11, %v2123_v34  ;;  %v2121_v38 = vpop.permute.xlu0 %2120  ;;  %v2476_v41 = vpop.permute.xlu2 %2475  ;;  %v3208_v34 = vrot.slane %v3206_v21, 5  ;;  %v3108_v43 = vrot.slane %v3107_v30, 4  ;;  %v3336_v45 = vpack.c.b16 %v3304_v27, %v3304_v27  ;;  %v2720_v46 = vpack.c.b16 %v4904_v32, %v4904_v32 }
 0x1d6   : > { %2190 = vst.msk [vmem:[#allocation2 + $0x6c] sm:$0xf] %vm2162_vm11, %v2121_v38  ;;  %v2719_v57 = vpack.c.b16 %v4903_v22, %v4903_v22  ;;  %v3004_v21 = vshll.u32 %v4645_v8, 16 }
 0x1d7   : > { %2569 = vst.msk [vmem:[#allocation2 + $0xc] sm:$0xf] %vm2565_vm13, %v2476_v41  ;;  %v3209_v47 = vsel %vm5070_vm2, %v3204_v33, %v3208_v34 }
 0x1d8   : > { %v3313_v58 = vunpack.c.l.b16 %v3209_v47  ;;  %v6075_v34 = vrot.slane %v3004_v21, 5 }
 0x1da   : > { %2745 = vrot.lane.b32.xlu1 %v2704_v35, %s4997_s11  ;;  %v4633_v35 = vld [vmem:[%s5059_s26 + $0x1c] sm:$0xf]  ;;  %v3345_v10 = vpack.c.b16 %v3313_v58, %v3313_v58 }
 0x1db   : > { %2743 = vrot.lane.b32.xlu0 %v2703_v42, %s4997_s11  ;;  %2741 = vrot.lane.b32.xlu2 %v2702_v44, %s4997_s11  ;;  %v4710_v42 = vld [vmem:[%s5059_s26 + $0xa8] sm:$0xe]  ;;  %v3112_v44 = vrot.slane %v3110_v31, 5  ;;  %v2912_v54 = vshrl.u32 %v4633_v35, 16  ;;  %v4712_v31 = vld [vmem:[%s5059_s26 + $0xb0] sm:$0x1] }
 0x1dc   : > { %v2129_v28 = vpop.permute.xlu1 %2128  ;;  %v4728_v50 = vrot.slane %v4710_v42, 9  ;;  %v2997_v42 = vrot.slane %v2995_v26, 4 }
 0x1dd   : > { %2194 = vst.msk [vmem:[#allocation2 + $0x7c] sm:$0xf] %vm2162_vm11, %v2129_v28  ;;  %v2127_v55 = vpop.permute.xlu0 %2126  ;;  %v2482_v60 = vpop.permute.xlu2 %2481  ;;  %v2908_v28 = vshll.u32 %v4633_v35, 16  ;;  %v2914_v3 = vrot.slane %v2912_v54, 4  ;;  %v4675_v54 = vld [vmem:[%s5059_s26 + $0x1c] sm:$0xf] }
 0x1de   : > { %2193 = vst.msk [vmem:[#allocation2 + $0x78] sm:$0xf] %vm2162_vm11, %v2127_v55  ;;  %v2899_v55 = vshrl.u32 %v4632_v40, 16  ;;  %v3652_v14 = vsel %vm5245_vm6, %v4728_v50, %v3651_v61 }
 0x1df   : > { %2572 = vst.msk [vmem:[#allocation2 + $0x18] sm:$0xf] %vm2565_vm13, %v2482_v60  ;;  %v3113_v60 = vsel %vm5070_vm2, %v3108_v43, %v3112_v44  ;;  %v6057_v2 = vrot.slane %v2908_v28, 5  ;;  %v3713_v27 = vunpack.c.l.b16 %v3652_v14  ;;  %v4674_v28 = vld [vmem:[%s5059_s26 + $0x18] sm:$0xe] }
 0x1e0   : > { %v2901_v4 = vrot.slane %v2899_v55, 4  ;;  %v3305_v7 = vunpack.c.l.b16 %v3113_v60  ;;  %v3567_v60 = vrot.slane %v4675_v54, 5 }
 0x1e1   : > { %v3745_v44 = vpack.c.b16 %v3713_v27, %v3713_v27 }
 0x1e2   : > { %2751 = vrot.lane.b32.xlu1 %v2707_v56, %s4997_s11  ;;  %v2902_v56 = vshll.u32 %v4632_v40, 16  ;;  %v3337_v24 = vpack.c.b16 %v3305_v7, %v3305_v7  ;;  %v3653_v40 = vrot.slane %v3651_v61, 4  ;;  %v3569_v26 = vrot.slane %v3567_v60, 4 }
 0x1e3   : > { %2749 = vrot.lane.b32.xlu0 %v2706_v48, %s4997_s11  ;;  %2747 = vrot.lane.b32.xlu2 %v2705_v0, %s4997_s11  ;;  %v4698_v48 = vld [vmem:[%s5059_s26 + $0x78] sm:$0xe]  ;;  %v4634_v0 = vld [vmem:[%s5059_s26 + $0x20] sm:$0x1] }
 0x1e4   : > { %v2474_v12 = vpop.permute.xlu1 %2473  ;;  %v2904_v6 = vrot.slane %v2902_v56, 5  ;;  %v4724_v11 = vrot.slane %v4698_v48, 9  ;;  %v2918_v16 = vshll.u32 %v4634_v0, 16  ;;  %v4687_v48 = vld [vmem:[%s5059_s26 + $0x4c] sm:$0xf] }
 0x1e5   : > { %2568 = vst.msk [vmem:[#allocation2 + $0x8] sm:$0xf] %vm2565_vm13, %v2474_v12  ;;  %v2472_v5 = vpop.permute.xlu0 %2471  ;;  %v2488_v19 = vpop.permute.xlu2 %2487  ;;  %v3344_v12 = vpack.c.b16 %v3312_v59, %v3312_v59  ;;  %v4716_v59 = vrot.slane %v4674_v28, 9  ;;  %v3595_v8 = vrot.slane %v4687_v48, 5  ;;  %v6131_v28 = vld [vmem:[%s5059_s26 + $0xb4] sm:$0xff]  }
 0x1e6   : > { %2567 = vst.msk [vmem:[#allocation2 + $0x4] sm:$0xf] %vm2565_vm13, %v2472_v5  ;;  %v3627_v5 = vsel %vm5245_vm6, %v3625_v62, %v3626_v63  ;;  %v2905_v20 = vor.u32 %v2904_v6, %v2901_v4  ;;  %v2920_v30 = vrot.slane %v2918_v16, 5  ;;  %v2685_v48 = vunpack.c.l.b16 %v6131_v28 }
 0x1e7   : > { %2575 = vst.msk [vmem:[#allocation2 + $0x24] sm:$0xf] %vm2565_vm13, %v2488_v19  ;;  %v2915_v19 = vor.u32 %v2914_v3, %v6057_v2  ;;  %v3706_v29 = vunpack.c.l.b16 %v3627_v5  ;;  %v3597_v16 = vrot.slane %v3595_v8, 4 }
 0x1e8   : > { %v2906_v33 = vrot.slane %v2905_v20, 4  ;;  %v4660_v20 = vld [vmem:[%s5059_s26 + $0x88] sm:$0xf] }
 0x1e9   : > { %v2916_v32 = vrot.slane %v2915_v19, 4 }
 0x1ea   : > { %2761 = vrot.lane.b32.xlu1 %v2712_v15, %s4997_s11  ;;  %v2911_v49 = vsel %vm5070_vm2, %v2906_v33, %v6057_v2 }
 0x1eb   : > { %2759 = vrot.lane.b32.xlu0 %v2711_v13, %s4997_s11  ;;  %2753 = vrot.lane.b32.xlu2 %v2708_v18, %s4997_s11  ;;  %v3624_v13 = vsel %vm5245_vm6, %v4724_v11, %v3623_v39  ;;  %v2998_v18 = vshll.u32 %v4644_v17, 16  ;;  %v4646_v39 = vld [vmem:[%s5059_s26 + $0x50] sm:$0x1]  ;;  %v2921_v47 = vsel %vm5070_vm2, %v2916_v32, %v2920_v30  ;;  %v3288_v58 = vunpack.c.l.b16 %v2911_v49  ;;  %v4686_v11 = vld [vmem:[%s5059_s26 + $0x48] sm:$0xe] }
 0x1ec   : > { %v2480_v38 = vpop.permute.xlu1 %2479  ;;  %v3705_v22 = vunpack.c.l.b16 %v3624_v13  ;;  %v3014_v52 = vshll.u32 %v4646_v39, 16  ;;  %v4720_v19 = vrot.slane %v4686_v11, 9  ;;  %v3128_v32 = vshrl.u32 %v4660_v20, 16  ;;  %v4672_v49 = vld [vmem:[%s5059_s26 + $0xb8] sm:$0xf] }
 0x1ed   : > { %2571 = vst.msk [vmem:[#allocation2 + $0x14] sm:$0xf] %vm2565_vm13, %v2480_v38  ;;  %v2478_v41 = vpop.permute.xlu0 %2477  ;;  %v2494_v51 = vpop.permute.xlu2 %2493  ;;  %v3000_v43 = vrot.slane %v2998_v18, 5  ;;  %v3320_v6 = vpack.c.b16 %v3288_v58, %v3288_v58 }
 0x1ee   : > { %2570 = vst.msk [vmem:[#allocation2 + $0x10] sm:$0xf] %vm2565_vm13, %v2478_v41  ;;  %v3654_v41 = vrot.slane %v4712_v31, 5  ;;  %v3737_v53 = vpack.c.b16 %v3705_v22, %v3705_v22  ;;  %v3016_v61 = vrot.slane %v3014_v52, 5  ;;  %v3124_v31 = vshll.u32 %v4660_v20, 16 }
 0x1ef   : > { %2578 = vst.msk [vmem:[#allocation2 + $0x30] sm:$0xf] %vm2565_vm13, %v2494_v51  ;;  %v3011_v51 = vor.u32 %v3010_v36, %v6075_v34  ;;  %v3001_v56 = vor.u32 %v3000_v43, %v2997_v42  ;;  %v3130_v42 = vrot.slane %v3128_v32, 4  ;;  %v4714_v32 = vld [vmem:[%s5059_s26 + $0xb8] sm:$0xf] }
 0x1f0   : > { %v3655_v55 = vsel %vm5245_vm6, %v3653_v40, %v3654_v41  ;;  %v3126_v41 = vrot.slane %v3124_v31, 5 }
 0x1f1   : > { %v3012_v50 = vrot.slane %v3011_v51, 4  ;;  %v3714_v63 = vunpack.c.l.b16 %v3655_v55  ;;  %v3002_v2 = vrot.slane %v3001_v56, 4  ;;  %v4671_v56 = vld [vmem:[%s5059_s26 + $0xb4] sm:$0xf] }
 0x1f2   : > { %3384 = vrot.lane.b32.xlu1 %v3336_v45, %s4998_s12  ;;  %v3738_v45 = vpack.c.b16 %v3706_v29, %v3706_v29  ;;  %v3131_v55 = vor.u32 %v3130_v42, %v3126_v41  ;;  %v3658_v42 = vrot.slane %v4714_v32, 5 }
 0x1f3   : > { %2777 = vrot.lane.b32.xlu0 %v2720_v46, %s4997_s11  ;;  %2775 = vrot.lane.b32.xlu2 %v2719_v57, %s4997_s11  ;;  %v3289_v57 = vunpack.c.l.b16 %v2921_v47  ;;  %v3017_v7 = vsel %vm5070_vm2, %v3012_v50, %v3016_v61  ;;  %v4661_v47 = vld [vmem:[%s5059_s26 + $0x8c] sm:$0x1]  ;;  %v3224_v50 = vshrl.u32 %v4672_v49, 16 }
 0x1f4   : > { %v2486_v37 = vpop.permute.xlu1 %2485  ;;  %v3297_v5 = vunpack.c.l.b16 %v3017_v7  ;;  %v3134_v58 = vshll.u32 %v4661_v47, 16 }
 0x1f5   : > { %2574 = vst.msk [vmem:[#allocation2 + $0x20] sm:$0xf] %vm2565_vm13, %v2486_v37  ;;  %v2484_v9 = vpop.permute.xlu0 %2483  ;;  %v2500_v15 = vpop.permute.xlu2 %2499  ;;  %v3321_v3 = vpack.c.b16 %v3289_v57, %v3289_v57  ;;  %v3568_v37 = vsel %vm5245_vm6, %v4716_v59, %v3567_v60  ;;  %v4623_v57 = vld [vmem:[%s5059_s26 + $0x84] sm:$0xff]   ;;  %v3220_v60 = vshll.u32 %v4672_v49, 16 }
 0x1f6   : > { %2573 = vst.msk [vmem:[#allocation2 + $0x1c] sm:$0xf] %vm2565_vm13, %v2484_v9  ;;  %v3746_v9 = vpack.c.b16 %v3714_v63, %v3714_v63  ;;  %v3689_v14 = vunpack.c.l.b16 %v3568_v37  ;;  %v3329_v29 = vpack.c.b16 %v3297_v5, %v3297_v5  ;;  %v3214_v63 = vshll.u32 %v4671_v56, 16 }
 0x1f7   : > { %2581 = vst.msk [vmem:[#allocation2 + $0x3c] sm:$0xf] %vm2565_vm13, %v2500_v15  ;;  %v4676_v15 = vld [vmem:[%s5059_s26 + $0x20] sm:$0x1]  ;;  %v3226_v37 = vrot.slane %v3224_v50, 4 }
 0x1f8   : > { %v3570_v18 = vrot.slane %v4676_v15, 5  ;;  %v3721_v27 = vpack.c.b16 %v3689_v14, %v3689_v14  ;;  %v2721_v14 = vpack.c.b16 %v2685_v48, %v2685_v48 }
 0x1fa   : > { %3402 = vrot.lane.b32.xlu1 %v3345_v10, %s4998_s12  ;;  %v4688_v10 = vld [vmem:[%s5059_s26 + $0x50] sm:$0x1]  ;;  %v3571_v39 = vsel %vm5245_vm6, %v3569_v26, %v3570_v18 }
 0x1fb   : > { %3400 = vrot.lane.b32.xlu0 %v3344_v12, %s4998_s12  ;;  %3386 = vrot.lane.b32.xlu2 %v3337_v24, %s4998_s12  ;;  %v3007_v12 = vsel %vm5070_vm2, %v3002_v2, %v6075_v34  ;;  %v3598_v17 = vrot.slane %v4688_v10, 5  ;;  %v4659_v24 = vld [vmem:[%s5059_s26 + $0x84] sm:$0xf]  ;;  %v3596_v34 = vsel %vm5245_vm6, %v4720_v19, %v3595_v8  ;;  %v3132_v2 = vrot.slane %v3131_v55, 4 }
 0x1fc   : > { %v2492_v38 = vpop.permute.xlu1 %2491  ;;  %v3296_v23 = vunpack.c.l.b16 %v3007_v12  ;;  %v3115_v36 = vshrl.u32 %v4659_v24, 16  ;;  %v3697_v40 = vunpack.c.l.b16 %v3596_v34  ;;  %v2677_v8 = vunpack.c.l.b16 %v4623_v57 }
 0x1fd   : > { %2577 = vst.msk [vmem:[#allocation2 + $0x2c] sm:$0xf] %vm2565_vm13, %v2492_v38  ;;  %v2490_v35 = vpop.permute.xlu0 %2489  ;;  %v2506_v46 = vpop.permute.xlu2 %2505  ;;  %v3599_v33 = vsel %vm5245_vm6, %v3597_v16, %v3598_v17  ;;  %v3118_v38 = vshll.u32 %v4659_v24, 16  ;;  %v3216_v12 = vrot.slane %v3214_v63, 5  ;;  %v4702_v24 = vld [vmem:[%s5059_s26 + $0x88] sm:$0xf]  ;;  %v2686_v34 = vunpack.c.h.b16 %v6131_v28 }
 0x1fe   : > { %2576 = vst.msk [vmem:[#allocation2 + $0x28] sm:$0xf] %vm2565_vm13, %v2490_v35  ;;  %v3328_v22 = vpack.c.b16 %v3296_v23, %v3296_v23  ;;  %v3698_v35 = vunpack.c.l.b16 %v3599_v33  ;;  %v3117_v43 = vrot.slane %v3115_v36, 4  ;;  %v4701_v23 = vld [vmem:[%s5059_s26 + $0x84] sm:$0xe] }
 0x1ff   : > { %2584 = vst.msk [vmem:[#allocation2 + $0x48] sm:$0xf] %vm2565_vm13, %v2506_v46  ;;  %v3690_v46 = vunpack.c.l.b16 %v3571_v39  ;;  %v4647_v36 = vld [vmem:[%s5059_s26 + $0x54] sm:$0xf]  ;;  %v4636_v39 = vld [vmem:[%s5059_s26 + $0x28] sm:$0xf]  ;;  %v2722_v49 = vpack.c.b16 %v2686_v34, %v2686_v34 }
 0x200   : > { %v3730_v52 = vpack.c.b16 %v3698_v35, %v3698_v35  ;;  %v3022_v47 = vshll.u32 %v4647_v36, 16  ;;  %v2936_v28 = vshrl.u32 %v4636_v39, 16  ;;  %v4678_v34 = vld [vmem:[%s5059_s26 + $0x28] sm:$0xf] }
 0x201   : > { %v3722_v61 = vpack.c.b16 %v3690_v46, %v3690_v46  ;;  %v3019_v46 = vshrl.u32 %v4647_v36, 16 }
 0x202   : > { %3801 = vrot.lane.b32.xlu1 %v3745_v44, %s4999_s13  ;;  %v3120_v44 = vrot.slane %v3118_v38, 5  ;;  %v3024_v63 = vrot.slane %v3022_v47, 5  ;;  %v4677_v47 = vld [vmem:[%s5059_s26 + $0x24] sm:$0xe] }
 0x203   : > { %3787 = vrot.lane.b32.xlu0 %v3738_v45, %s4999_s13  ;;  %3785 = vrot.lane.b32.xlu2 %v3737_v53, %s4999_s13  ;;  %v3729_v53 = vpack.c.b16 %v3697_v40, %v3697_v40 }
 0x204   : > { %v2498_v62 = vpop.permute.xlu1 %2497  ;;  %v3121_v59 = vor.u32 %v3120_v44, %v3117_v43  ;;  %v4635_v43 = vld [vmem:[%s5059_s26 + $0x24] sm:$0xf] }
 0x205   : > { %2580 = vst.msk [vmem:[#allocation2 + $0x38] sm:$0xf] %vm2565_vm13, %v2498_v62  ;;  %v2496_v0 = vpop.permute.xlu0 %2495  ;;  %v2512_v4 = vpop.permute.xlu2 %2511  ;;  %v3211_v62 = vshrl.u32 %v4671_v56, 16  ;;  %v2923_v55 = vshrl.u32 %v4635_v43, 16  ;;  %v2926_v56 = vshll.u32 %v4635_v43, 16  ;;  %v3574_v43 = vrot.slane %v4678_v34, 5 }
 0x206   : > { %2579 = vst.msk [vmem:[#allocation2 + $0x34] sm:$0xf] %vm2565_vm13, %v2496_v0  ;;  %v2678_v0 = vunpack.c.h.b16 %v4623_v57 }
 0x207   : > { %2587 = vst.msk [vmem:[#allocation2 + $0x54] sm:$0xf] %vm2565_vm13, %v2512_v4  ;;  %v3122_v4 = vrot.slane %v3121_v59, 4  ;;  %v3213_v11 = vrot.slane %v3211_v62, 4  ;;  %v3660_v59 = vrot.slane %v3658_v42, 4  ;;  %v3021_v62 = vrot.slane %v3019_v46, 4 }
 0x208   : > { %v2714_v5 = vpack.c.b16 %v2678_v0, %v2678_v0  ;;  %v4679_v46 = vld [vmem:[%s5059_s26 + $0x2c] sm:$0x1] }
 0x209   : > { %v3127_v17 = vsel %vm5070_vm2, %v3122_v4, %v3126_v41 }
 0x20a   : > { %3354 = vrot.lane.b32.xlu1 %v3321_v3, %s4998_s12  ;;  %v3136_v3 = vrot.slane %v3134_v58, 5  ;;  %v3306_v18 = vunpack.c.l.b16 %v3127_v17 }
 0x20b   : > { %3352 = vrot.lane.b32.xlu0 %v3320_v6, %s4998_s12  ;;  %3803 = vrot.lane.b32.xlu2 %v3746_v9, %s4999_s13  ;;  %v6139_v6 = vrot.slane %v3220_v60, 5  ;;  %v4673_v9 = vld [vmem:[%s5059_s26 + $0xbc] sm:$0x1]  ;;  %v4703_v60 = vld [vmem:[%s5059_s26 + $0x8c] sm:$0x1] }
 0x20c   : > { %v2504_v21 = vpop.permute.xlu1 %2503  ;;  %v3137_v16 = vsel %vm5070_vm2, %v3132_v2, %v3136_v3  ;;  %v3230_v20 = vshll.u32 %v4673_v9, 16  ;;  %v3338_v40 = vpack.c.b16 %v3306_v18, %v3306_v18  ;;  %v4648_v2 = vld [vmem:[%s5059_s26 + $0x58] sm:$0xf]  ;;  %v4637_v3 = vld [vmem:[%s5059_s26 + $0x2c] sm:$0x1]  ;;  %v2925_v9 = vrot.slane %v2923_v55, 4 }
 0x20d   : > { %2583 = vst.msk [vmem:[#allocation2 + $0x44] sm:$0xf] %vm2565_vm13, %v2504_v21  ;;  %v2502_v13 = vpop.permute.xlu0 %2501  ;;  %v2518_v30 = vpop.permute.xlu2 %2517  ;;  %v3227_v19 = vor.u32 %v3226_v37, %v6139_v6  ;;  %v2713_v21 = vpack.c.b16 %v2677_v8, %v2677_v8  ;;  %v3307_v26 = vunpack.c.l.b16 %v3137_v16  ;;  %v3633_v8 = vrot.slane %v4703_v60, 5 }
 0x20e   : > { %2582 = vst.msk [vmem:[#allocation2 + $0x40] sm:$0xf] %vm2565_vm13, %v2502_v13  ;;  %v3217_v13 = vor.u32 %v3216_v12, %v3213_v11  ;;  %v3232_v31 = vrot.slane %v3230_v20, 5  ;;  %v3028_v16 = vshll.u32 %v4648_v2, 16  ;;  %v3577_v55 = vrot.slane %v4679_v46, 5 }
 0x20f   : > { %2590 = vst.msk [vmem:[#allocation2 + $0x60] sm:$0xf] %vm2565_vm13, %v2518_v30  ;;  %v3228_v30 = vrot.slane %v3227_v19, 4  ;;  %v3339_v35 = vpack.c.b16 %v3307_v26, %v3307_v26 }
 0x212   : > { %3753 = vrot.lane.b32.xlu1 %v3721_v27, %s4999_s13  ;;  %v4725_v27 = vrot.slane %v4701_v23, 9  ;;  %v3032_v23 = vshrl.u32 %v4648_v2, 16 }
 0x213   : > { %3370 = vrot.lane.b32.xlu0 %v3329_v29, %s4998_s12  ;;  %3368 = vrot.lane.b32.xlu2 %v3328_v22, %s4998_s12  ;;  %v3630_v29 = vrot.slane %v4702_v24, 5  ;;  %v3218_v22 = vrot.slane %v3217_v13, 4 }
 0x214   : > { %v2510_v45 = vpop.permute.xlu1 %2509 }
 0x215   : > { %2586 = vst.msk [vmem:[#allocation2 + $0x50] sm:$0xf] %vm2565_vm13, %v2510_v45  ;;  %v2508_v51 = vpop.permute.xlu0 %2507  ;;  %v2524_v54 = vpop.permute.xlu2 %2523  ;;  %v3631_v44 = vsel %vm5245_vm6, %v4725_v27, %v3630_v29  ;;  %v3233_v45 = vsel %vm5070_vm2, %v3228_v30, %v3232_v31 }
 0x216   : > { %2585 = vst.msk [vmem:[#allocation2 + $0x4c] sm:$0xf] %vm2565_vm13, %v2508_v51  ;;  %v4715_v51 = vld [vmem:[%s5059_s26 + $0xbc] sm:$0x1]  ;;  %v3707_v57 = vunpack.c.l.b16 %v3631_v44  ;;  %v3315_v58 = vunpack.c.l.b16 %v3233_v45 }
 0x217   : > { %2593 = vst.msk [vmem:[#allocation2 + $0x6c] sm:$0xf] %vm2565_vm13, %v2524_v54  ;;  %v3223_v54 = vsel %vm5070_vm2, %v3218_v22, %v6139_v6  ;;  %v3661_v50 = vrot.slane %v4715_v51, 5  ;;  %v2938_v6 = vrot.slane %v2936_v28, 4  ;;  %v3034_v22 = vrot.slane %v3032_v23, 4 }
 0x218   : > { %v3314_v0 = vunpack.c.l.b16 %v3223_v54  ;;  %v3739_v11 = vpack.c.b16 %v3707_v57, %v3707_v57  ;;  %v3576_v54 = vrot.slane %v3574_v43, 4  ;;  %v4717_v57 = vrot.slane %v4677_v47, 9 }
 0x21a   : > { %3771 = vrot.lane.b32.xlu1 %v3730_v52, %s4999_s13  ;;  %v4713_v52 = vld [vmem:[%s5059_s26 + $0xb4] sm:$0xe]  ;;  %v3346_v19 = vpack.c.b16 %v3314_v0, %v3314_v0  ;;  %v3578_v0 = vsel %vm5245_vm6, %v3576_v54, %v3577_v55  ;;  %v3918_v54 = vld [vmem:[%s6679_s2 + $0x10] sm:$0x3] }
 0x21b   : > { %3769 = vrot.lane.b32.xlu0 %v3729_v53, %s4999_s13  ;;  %3755 = vrot.lane.b32.xlu2 %v3722_v61, %s4999_s13  ;;  %v2932_v53 = vshll.u32 %v4636_v39, 16  ;;  %v4729_v61 = vrot.slane %v4713_v52, 9 }
 0x21c   : > { %v2516_v7 = vpop.permute.xlu1 %2515 }
 0x21d   : > { %2589 = vst.msk [vmem:[#allocation2 + $0x5c] sm:$0xf] %vm2565_vm13, %v2516_v7  ;;  %v2514_v10 = vpop.permute.xlu0 %2513  ;;  %v2530_v15 = vpop.permute.xlu2 %2529  ;;  %v6179_v4 = vrot.slane %v2932_v53, 5  ;;  %v3632_v7 = vrot.slane %v3630_v29, 4  ;;  %v3659_v17 = vsel %vm5245_vm6, %v4729_v61, %v3658_v42  ;;  %v3030_v29 = vrot.slane %v3028_v16, 5 }
 0x21e   : > { %2588 = vst.msk [vmem:[#allocation2 + $0x58] sm:$0xf] %vm2565_vm13, %v2514_v10  ;;  %v2928_v10 = vrot.slane %v2926_v56, 5  ;;  %v3715_v18 = vunpack.c.l.b16 %v3659_v17 }
 0x21f   : > { %2596 = vst.msk [vmem:[#allocation2 + $0x78] sm:$0xf] %vm2565_vm13, %v2530_v15  ;;  %v3025_v15 = vor.u32 %v3024_v63, %v3021_v62  ;;  %v2939_v20 = vor.u32 %v2938_v6, %v6179_v4  ;;  %v3634_v24 = vsel %vm5245_vm6, %v3632_v7, %v3633_v8  ;;  %v3035_v51 = vor.u32 %v3034_v22, %v3030_v29  ;;  %v3234_v6 = vld [vmem:[%s5547_s8] sm:$0xf]  ;;  %v4663_v8 = vld [vmem:[%s5059_s26 + $0x94] sm:$0xf] }
 0x220   : > { %v2929_v13 = vor.u32 %v2928_v10, %v2925_v9  ;;  %v3692_v9 = vunpack.c.l.b16 %v3578_v0  ;;  %v4689_v10 = vld [vmem:[%s5059_s26 + $0x54] sm:$0xe]  ;;  %v4664_v22 = vld [vmem:[%s5059_s26 + $0x98] sm:$0x1] }
 0x221   : > { %v3026_v27 = vrot.slane %v3025_v15, 4  ;;  %v2940_v31 = vrot.slane %v2939_v20, 4  ;;  %v3152_v20 = vshrl.u32 %v4663_v8, 16  ;;  %v4721_v23 = vrot.slane %v4689_v10, 9 }
 0x222   : > { %2779 = vrot.lane.b32.xlu1 %v2721_v14, %s4997_s11  ;;  %v3347_v14 = vpack.c.b16 %v3315_v58, %v3315_v58  ;;  %v3158_v47 = vshll.u32 %v4664_v22, 16  ;;  %v4843_v22 = vld [vmem:[%s6679_s2] sm:$0xff] }
 0x223   : > { %2765 = vrot.lane.b32.xlu0 %v2714_v5, %s4997_s11  ;;  %2763 = vrot.lane.b32.xlu2 %v2713_v21, %s4997_s11  ;;  %v3662_v5 = vsel %vm5245_vm6, %v3660_v59, %v3661_v50  ;;  %v2942_v21 = vshll.u32 %v4637_v3, 16  ;;  %v3031_v42 = vsel %vm5070_vm2, %v3026_v27, %v3030_v29  ;;  %v4690_v59 = vld [vmem:[%s5059_s26 + $0x58] sm:$0xf]  ;;  %v3036_v50 = vrot.slane %v3035_v51, 4  ;;  %v6232_v27 = vld [vmem:[%s5059_s26 + $0x90] sm:$0xff]  }
 0x224   : > { %v2522_v33 = vpop.permute.xlu1 %2521  ;;  %v3716_v26 = vunpack.c.l.b16 %v3662_v5  ;;  %v3298_v53 = vunpack.c.l.b16 %v3031_v42  ;;  %v3602_v2 = vrot.slane %v4690_v59, 5  ;;  %v3575_v3 = vsel %vm5245_vm6, %v4717_v57, %v3574_v43 }
 0x225   : > { %2592 = vst.msk [vmem:[#allocation2 + $0x68] sm:$0xf] %vm2565_vm13, %v2522_v33  ;;  %v2520_v38 = vpop.permute.xlu0 %2519  ;;  %v2730_v41 = vpop.permute.xlu2 %2729  ;;  %v2944_v32 = vrot.slane %v2942_v21, 5  ;;  %v3708_v33 = vunpack.c.l.b16 %v3634_v24  ;;  %v3244_v5 = vshll.u32 %v3234_v6, 16  ;;  %v3724_v24 = vpack.c.b16 %v3692_v9, %v3692_v9 }
 0x226   : > { %2591 = vst.msk [vmem:[#allocation2 + $0x64] sm:$0xf] %vm2565_vm13, %v2520_v38  ;;  %v2930_v38 = vrot.slane %v2929_v13, 4  ;;  %v3748_v39 = vpack.c.b16 %v3716_v26, %v3716_v26  ;;  %v3330_v62 = vpack.c.b16 %v3298_v53, %v3298_v53  ;;  %v4662_v26 = vld [vmem:[%s5059_s26 + $0x90] sm:$0xf]  ;;  %v3154_v34 = vrot.slane %v3152_v20, 4 }
 0x227   : > { %2825 = vst.msk [vmem:[#allocation2 + $0x4] sm:$0xf] %vm2823_vm14, %v2730_v41  ;;  %v3747_v41 = vpack.c.b16 %v3715_v18, %v3715_v18  ;;  %v2945_v44 = vsel %vm5070_vm2, %v2940_v31, %v2944_v32  ;;  %v3740_v45 = vpack.c.b16 %v3708_v33, %v3708_v33  ;;  %v4900_v9 = vunpack.c.h.b16 %v6232_v27  ;;  %v3236_v20 = vld [vmem:[%s5547_s8 + $0x8] sm:$0x1] }
 0x228   : > { %v3291_v28 = vunpack.c.l.b16 %v2945_v44 }
 0x22a   : > { %3390 = vrot.lane.b32.xlu1 %v3339_v35, %s4998_s12 }
 0x22b   : > { %3388 = vrot.lane.b32.xlu0 %v3338_v40, %s4998_s12  ;;  %2781 = vrot.lane.b32.xlu2 %v2722_v49, %s4997_s11  ;;  %v4649_v40 = vld [vmem:[%s5059_s26 + $0x5c] sm:$0x1]  ;;  %v2935_v49 = vsel %vm5070_vm2, %v2930_v38, %v6179_v4  ;;  %v3235_v38 = vld [vmem:[%s5547_s8 + $0x4] sm:$0xf] }
 0x22c   : > { %v2528_v48 = vpop.permute.xlu1 %2527  ;;  %v3038_v52 = vshll.u32 %v4649_v40, 16  ;;  %v3290_v58 = vunpack.c.l.b16 %v2935_v49  ;;  %v4899_v40 = vunpack.c.l.b16 %v6232_v27 }
 0x22d   : > { %2595 = vst.msk [vmem:[#allocation2 + $0x74] sm:$0xf] %vm2565_vm13, %v2528_v48  ;;  %v2526_v37 = vpop.permute.xlu0 %2525  ;;  %v2736_v12 = vpop.permute.xlu2 %2735  ;;  %v3323_v48 = vpack.c.b16 %v3291_v28, %v3291_v28 }
 0x22e   : > { %2594 = vst.msk [vmem:[#allocation2 + $0x70] sm:$0xf] %vm2565_vm13, %v2526_v37  ;;  %v3040_v61 = vrot.slane %v3038_v52, 5  ;;  %v3322_v4 = vpack.c.b16 %v3290_v58, %v3290_v58  ;;  %v4691_v37 = vld [vmem:[%s5059_s26 + $0x5c] sm:$0x1]  ;;  %v2715_v53 = vpack.c.b16 %v4899_v40, %v4899_v40  ;;  %v4012_v58 = vunpack.c.l.b16 %v3918_v54 }
 0x22f   : > { %2828 = vst.msk [vmem:[#allocation2 + $0x10] sm:$0xf] %vm2823_vm14, %v2736_v12  ;;  %v3604_v12 = vrot.slane %v3602_v2, 4  ;;  %v3605_v16 = vrot.slane %v4691_v37, 5  ;;  %v4651_v40 = vld [vmem:[%s5059_s26 + $0x64] sm:$0xf] }
 0x230   : > { %v3041_v7 = vsel %vm5070_vm2, %v3036_v50, %v3040_v61  ;;  %v3160_v61 = vrot.slane %v3158_v47, 5  ;;  %v3052_v54 = vshll.u32 %v4651_v40, 16 }
 0x231   : > { %v3299_v17 = vunpack.c.l.b16 %v3041_v7  ;;  %v3606_v31 = vsel %vm5245_vm6, %v3604_v12, %v3605_v16 }
 0x232   : > { %3789 = vrot.lane.b32.xlu1 %v3739_v11, %s4999_s13  ;;  %v3691_v11 = vunpack.c.l.b16 %v3575_v3  ;;  %v4638_v3 = vld [vmem:[%s5059_s26 + $0x30] sm:$0xf] }
 0x233   : > { %3406 = vrot.lane.b32.xlu0 %v3347_v14, %s4998_s12  ;;  %3404 = vrot.lane.b32.xlu2 %v3346_v19, %s4998_s12  ;;  %v3241_v14 = vshrl.u32 %v3234_v6, 16  ;;  %v3148_v19 = vshll.u32 %v4663_v8, 16  ;;  %v3331_v32 = vpack.c.b16 %v3299_v17, %v3299_v17  ;;  %v2950_v17 = vshll.u32 %v4638_v3, 16 }
 0x234   : > { %v2728_v30 = vpop.permute.xlu1 %2727  ;;  %v3723_v18 = vpack.c.b16 %v3691_v11, %v3691_v11 }
 0x235   : > { %2824 = vst.msk [vmem:[#allocation2] sm:$0xf] %vm2823_vm14, %v2728_v30  ;;  %v2532_v36 = vpop.permute.xlu0 %2531  ;;  %v2742_v35 = vpop.permute.xlu2 %2741  ;;  %v3243_v29 = vrot.slane %v3241_v14, 4  ;;  %v3246_v30 = vrot.slane %v3244_v5, 5  ;;  %v6237_v33 = vrot.slane %v3148_v19, 5  ;;  %v2947_v14 = vshrl.u32 %v4638_v3, 16 }
 0x236   : > { %2597 = vst.msk [vmem:[#allocation2 + $0x7c] sm:$0xf] %vm2565_vm13, %v2532_v36  ;;  %v3603_v36 = vsel %vm5245_vm6, %v4721_v23, %v3602_v2  ;;  %v6259_v2 = vld [vmem:[%s5059_s26 + $0x94] sm:$0xf]  ;;  %v4844_v19 = vld [vmem:[%s6679_s2 + $0x8] sm:$0xff]  ;;  %v3054_v3 = vrot.slane %v3052_v54, 5 }
 0x237   : > { %2831 = vst.msk [vmem:[#allocation2 + $0x1c] sm:$0xf] %vm2823_vm14, %v2742_v35  ;;  %v3142_v35 = vshll.u32 %v4662_v26, 16  ;;  %v3247_v42 = vor.u32 %v3246_v30, %v3243_v29  ;;  %v3699_v44 = vunpack.c.l.b16 %v3603_v36  ;;  %v3155_v46 = vor.u32 %v3154_v34, %v6237_v33  ;;  %v4706_v23 = vld [vmem:[%s5059_s26 + $0x98] sm:$0x1] }
 0x238   : > { %v3637_v11 = vrot.slane %v6259_v2, 5  ;;  %v2949_v36 = vrot.slane %v2947_v14, 4  ;;  %v3663_v2 = vld [vmem:[%s5547_s8] sm:$0xe] }
 0x239   : > { %v3144_v52 = vrot.slane %v3142_v35, 5  ;;  %v3248_v57 = vrot.slane %v3247_v42, 4  ;;  %v3731_v59 = vpack.c.b16 %v3699_v44, %v3699_v44  ;;  %v3156_v50 = vrot.slane %v3155_v46, 4 }
 0x23a   : > { %3807 = vrot.lane.b32.xlu1 %v3748_v39, %s4999_s13  ;;  %v3139_v39 = vshrl.u32 %v4662_v26, 16  ;;  %v3639_v27 = vrot.slane %v3637_v11, 4  ;;  %v4730_v14 = vrot.slane %v3663_v2, 9 }
 0x23b   : > { %3805 = vrot.lane.b32.xlu0 %v3747_v41, %s4999_s13  ;;  %3791 = vrot.lane.b32.xlu2 %v3740_v45, %s4999_s13  ;;  %v3700_v41 = vunpack.c.l.b16 %v3606_v31  ;;  %v3250_v45 = vshll.u32 %v3235_v38, 16  ;;  %v3161_v8 = vsel %vm5070_vm2, %v3156_v50, %v3160_v61  ;;  %v3260_v31 = vshll.u32 %v3236_v20, 16  ;;  %v3665_v50 = vld [vmem:[%s5547_s8 + $0x8] sm:$0x1] }
 0x23c   : > { %v2734_v56 = vpop.permute.xlu1 %2733  ;;  %v3141_v51 = vrot.slane %v3139_v39, 4  ;;  %v3309_v26 = vunpack.c.l.b16 %v3161_v8 }
 0x23d   : > { %2827 = vst.msk [vmem:[#allocation2 + $0xc] sm:$0xf] %vm2823_vm14, %v2734_v56  ;;  %v2732_v60 = vpop.permute.xlu0 %2731  ;;  %v2748_v63 = vpop.permute.xlu2 %2747  ;;  %v3732_v55 = vpack.c.b16 %v3700_v41, %v3700_v41  ;;  %v4906_v56 = vld [vmem:[%s5547_s8] sm:$0xff]   ;;  %v3262_v47 = vrot.slane %v3260_v31, 5 }
 0x23e   : > { %2826 = vst.msk [vmem:[#allocation2 + $0x8] sm:$0xf] %vm2823_vm14, %v2732_v60  ;;  %v6255_v60 = vrot.slane %v3250_v45, 5  ;;  %v4908_v0 = vunpack.c.h.b16 %v4906_v56  ;;  %v4650_v41 = vld [vmem:[%s5059_s26 + $0x60] sm:$0xf]  ;;  %v3341_v44 = vpack.c.b16 %v3309_v26, %v3309_v26 }
 0x23f   : > { %2834 = vst.msk [vmem:[#allocation2 + $0x28] sm:$0xf] %vm2823_vm14, %v2748_v63  ;;  %v3145_v63 = vor.u32 %v3144_v52, %v3141_v51  ;;  %v3664_v45 = vld [vmem:[%s5547_s8 + $0x4] sm:$0xf] }
 0x240   : > { %v3253_v7 = vsel %vm5070_vm2, %v3248_v57, %v6255_v60  ;;  %v3046_v57 = vshll.u32 %v4650_v41, 16 }
 0x241   : > { %v3146_v12 = vrot.slane %v3145_v63, 4 }
 0x242   : > { %3372 = vrot.lane.b32.xlu1 %v3330_v62, %s4998_s12  ;;  %v3254_v62 = vshrl.u32 %v3235_v38, 16  ;;  %v2952_v38 = vrot.slane %v2950_v17, 5 }
 0x243   : > { %3358 = vrot.lane.b32.xlu0 %v3323_v48, %s4998_s12  ;;  %3356 = vrot.lane.b32.xlu2 %v3322_v4, %s4998_s12  ;;  %v4015_v48 = vpack.c.b16 %v4012_v58, %v4012_v58  ;;  %v4907_v4 = vunpack.c.l.b16 %v4906_v56  ;;  %v3151_v29 = vsel %vm5070_vm2, %v3146_v12, %v6237_v33  ;;  %v4639_v33 = vld [vmem:[%s5059_s26 + $0x34] sm:$0xf]  ;;  %v3043_v56 = vshrl.u32 %v4650_v41, 16 }
 0x244   : > { %v2740_v15 = vpop.permute.xlu1 %2739  ;;  %v3256_v5 = vrot.slane %v3254_v62, 4  ;;  %v3308_v35 = vunpack.c.l.b16 %v3151_v29 }
 0x245   : > { %2830 = vst.msk [vmem:[#allocation2 + $0x18] sm:$0xf] %vm2823_vm14, %v2740_v15  ;;  %v2738_v21 = vpop.permute.xlu0 %2737  ;;  %v2754_v13 = vpop.permute.xlu2 %2753  ;;  %v4069_v6 = vsel %vm4067_vm15, %v4015_v48, 0  ;;  %v2724_v15 = vpack.c.b16 %v4908_v0, %v4908_v0 }
 0x246   : > { %2829 = vst.msk [vmem:[#allocation2 + $0x14] sm:$0xf] %vm2823_vm14, %v2738_v21  ;;  %4924 = vmatpush.bf16.msra.mxu2 %v4069_v6  ;;  %4925 = vmatpush.bf16.msra.mxu3 %v4069_v6  ;;  %v2723_v21 = vpack.c.b16 %v4907_v4, %v4907_v4  ;;  %v3257_v30 = vor.u32 %v3256_v5, %v6255_v60  ;;  %v2960_v60 = vshrl.u32 %v4639_v33, 16 }
 0x247   : > { %2837 = vst.msk [vmem:[#allocation2 + $0x34] sm:$0xf] %vm2823_vm14, %v2754_v13  ;;  %4076 = vmatpush.bf16.msra.mxu0 %v4069_v6  ;;  %4923 = vmatpush.bf16.msra.mxu1 %v4069_v6  ;;  %v3316_v13 = vunpack.c.l.b16 %v3253_v7  ;;  %v3340_v58 = vpack.c.b16 %v3308_v35, %v3308_v35  ;;  %v3045_v6 = vrot.slane %v3043_v56, 4 }
 0x248   : > { %v3258_v46 = vrot.slane %v3257_v30, 4  ;;  %v2962_v5 = vrot.slane %v2960_v60, 4 }
 0x24a   : > { %3759 = vrot.lane.b32.xlu1 %v3724_v24, %s4999_s13  ;;  %v4704_v24 = vld [vmem:[%s5059_s26 + $0x90] sm:$0xe]  ;;  %4927 = vmatpush.bf16.msra.mxu2 %v4844_v19  ;;  %v3263_v61 = vsel %vm5070_vm2, %v3258_v46, %v3262_v47  ;;  %v4692_v46 = vld [vmem:[%s5059_s26 + $0x60] sm:$0xe] }
 0x24b   : > { %3757 = vrot.lane.b32.xlu0 %v3723_v18, %s4999_s13  ;;  %3374 = vrot.lane.b32.xlu2 %v3331_v32, %s4998_s12  ;;  %v2716_v18 = vpack.c.b16 %v4900_v9, %v4900_v9  ;;  %v3640_v32 = vrot.slane %v4706_v23, 5  ;;  %v4726_v34 = vrot.slane %v4704_v24, 9  ;;  %v3680_v9 = vrot.slane %v3665_v50, 5 }
 0x24c   : > { %v2746_v43 = vpop.permute.xlu1 %2745  ;;  %4928 = vmatpush.bf16.msra.mxu3 %v4844_v19  ;;  %4077 = vmatpush.bf16.msra.mxu0 %v4844_v19  ;;  %v4722_v56 = vrot.slane %v4692_v46, 9 }
 0x24d   : > { %2833 = vst.msk [vmem:[#allocation2 + $0x24] sm:$0xf] %vm2823_vm14, %v2746_v43  ;;  %v2744_v49 = vpop.permute.xlu0 %2743  ;;  %v2776_v28 = vpop.permute.xlu2 %2775  ;;  %4926 = vmatpush.bf16.msra.mxu1 %v4844_v19  ;;  %v3348_v43 = vpack.c.b16 %v3316_v13, %v3316_v13  ;;  %v3638_v51 = vsel %vm5245_vm6, %v4726_v34, %v3637_v11  ;;  %v4652_v11 = vld [vmem:[%s5059_s26 + $0x68] sm:$0x1]  ;;  %v4640_v19 = vld [vmem:[%s5059_s26 + $0x38] sm:$0x1] }
 0x24e   : > { %2832 = vst.msk [vmem:[#allocation2 + $0x20] sm:$0xf] %vm2823_vm14, %v2744_v49  ;;  %4930 = vmatpush.bf16.msra.mxu2 %v4843_v22  ;;  %v3641_v49 = vsel %vm5245_vm6, %v3639_v27, %v3640_v32  ;;  %v3709_v63 = vunpack.c.l.b16 %v3638_v51  ;;  %v3062_v23 = vshll.u32 %v4652_v11, 16  ;;  %v2966_v29 = vshll.u32 %v4640_v19, 16  ;;  %v4693_v51 = vld [vmem:[%s5059_s26 + $0x64] sm:$0xf] }
 0x24f   : > { %2848 = vst.msk [vmem:[#allocation2 + $0x60] sm:$0xf] %vm2823_vm14, %v2776_v28  ;;  %v2956_v28 = vshll.u32 %v4639_v33, 16  ;;  %v3710_v62 = vunpack.c.l.b16 %v3641_v49  ;;  %v4681_v33 = vld [vmem:[%s5059_s26 + $0x34] sm:$0xf] }
 0x250   : > { %4931 = vmatpush.bf16.msra.mxu3 %v4843_v22  ;;  %4078 = vmatpush.bf16.msra.mxu0 %v4843_v22  ;;  %v3064_v34 = vrot.slane %v3062_v23, 5  ;;  %v3581_v47 = vrot.slane %v4681_v33, 5  ;;  %v4694_v11 = vld [vmem:[%s5059_s26 + $0x68] sm:$0x1]  ;;  %v3238_v19 = vld [vmem:[%s5547_s8 + $0x10] sm:$0xf] }
 0x251   : > { %4929 = vmatpush.bf16.msra.mxu1 %v4843_v22  ;;  %v2958_v0 = vrot.slane %v2956_v28, 5 }
 0x252   : > { %2767 = vrot.lane.b32.xlu1 %v2715_v53, %s4997_s11  ;;  %v2953_v53 = vor.u32 %v2952_v38, %v2949_v36 }
 0x253   : > { %3775 = vrot.lane.b32.xlu0 %v3732_v55, %s4999_s13  ;;  %3773 = vrot.lane.b32.xlu2 %v3731_v59, %s4999_s13  ;;  %v3056_v55 = vshrl.u32 %v4651_v40, 16  ;;  %v3677_v59 = vrot.slane %v3664_v45, 5  ;;  %v2963_v27 = vor.u32 %v2962_v5, %v2958_v0  ;;  %v2968_v40 = vrot.slane %v2966_v29, 5  ;;  %v4627_v29 = vld [vmem:[%s5059_s26 + $0x9c] sm:$0xff]  }
 0x254   : > { %v2752_v37 = vpop.permute.xlu1 %2751  ;;  %v2954_v48 = vrot.slane %v2953_v53, 4 }
 0x255   : > { %2836 = vst.msk [vmem:[#allocation2 + $0x30] sm:$0xf] %vm2823_vm14, %v2752_v37  ;;  %v2750_v10 = vpop.permute.xlu0 %2749  ;;  %v3387_v16 = vpop.permute.xlu2 %3386  ;;  %v3058_v4 = vrot.slane %v3056_v55, 4  ;;  %v3048_v37 = vrot.slane %v3046_v57, 5  ;;  %v3679_v8 = vrot.slane %v3677_v59, 4  ;;  %v2964_v35 = vrot.slane %v2963_v27, 4 }
 0x256   : > { %2835 = vst.msk [vmem:[#allocation2 + $0x2c] sm:$0xf] %vm2823_vm14, %v2750_v10  ;;  %v3317_v10 = vunpack.c.l.b16 %v3263_v61  ;;  %v2959_v20 = vsel %vm5070_vm2, %v2954_v48, %v2958_v0  ;;  %v4680_v55 = vld [vmem:[%s5059_s26 + $0x30] sm:$0xe]  ;;  %v3609_v57 = vrot.slane %v4693_v51, 5 }
 0x257   : > { %v3049_v24 = vor.u32 %v3048_v37, %v3045_v6  ;;  %v3681_v13 = vsel %vm5245_vm6, %v3679_v8, %v3680_v9  ;;  %v3292_v30 = vunpack.c.l.b16 %v2959_v20  ;;  %v2969_v53 = vsel %vm5070_vm2, %v2964_v35, %v2968_v40  ;;  %v4665_v61 = vld [vmem:[%s5059_s26 + $0x9c] sm:$0xf]  ;;  %v3237_v20 = vld [vmem:[%s5547_s8 + $0xc] sm:$0xf] }
 0x258   : > { %v3349_v26 = vpack.c.b16 %v3317_v10, %v3317_v10  ;;  %v3718_v31 = vunpack.c.l.b16 %v3681_v13  ;;  %v3293_v50 = vunpack.c.l.b16 %v2969_v53  ;;  %v3163_v6 = vshrl.u32 %v4665_v61, 16 }
 0x259   : > { %v3050_v36 = vrot.slane %v3049_v24, 4  ;;  %v3324_v41 = vpack.c.b16 %v3292_v30, %v3292_v30  ;;  %v3166_v37 = vshll.u32 %v4665_v61, 16  ;;  %v3611_v24 = vrot.slane %v3609_v57, 4 }
 0x25a   : > { %2785 = vrot.lane.b32.xlu1 %v2724_v15, %s4997_s11  ;;  %v3742_v15 = vpack.c.b16 %v3710_v62, %v3710_v62  ;;  %v3612_v13 = vrot.slane %v4694_v11, 5  ;;  %v2682_v35 = vunpack.c.h.b16 %v4627_v29  ;;  %v2681_v40 = vunpack.c.l.b16 %v4627_v29 }
 0x25b   : > { %2783 = vrot.lane.b32.xlu0 %v2723_v21, %s4997_s11  ;;  %2769 = vrot.lane.b32.xlu2 %v2716_v18, %s4997_s11  ;;  %v3059_v21 = vor.u32 %v3058_v4, %v3054_v3  ;;  %v3678_v18 = vsel %vm5245_vm6, %v4730_v14, %v3677_v59  ;;  %v3055_v45 = vsel %vm5070_vm2, %v3050_v36, %v3054_v3  ;;  %v3165_v14 = vrot.slane %v3163_v6, 4 }
 0x25c   : > { %v2762_v39 = vpop.permute.xlu1 %2761  ;;  %v3717_v22 = vunpack.c.l.b16 %v3678_v18  ;;  %v3300_v54 = vunpack.c.l.b16 %v3055_v45  ;;  %v3610_v3 = vsel %vm5245_vm6, %v4722_v56, %v3609_v57  ;;  %v3168_v5 = vrot.slane %v3166_v37, 5 }
 0x25d   : > { %2841 = vst.msk [vmem:[#allocation2 + $0x44] sm:$0xf] %vm2823_vm14, %v2762_v39  ;;  %v2760_v42 = vpop.permute.xlu0 %2759  ;;  %v3786_v52 = vpop.permute.xlu2 %3785  ;;  %v3060_v32 = vrot.slane %v3059_v21, 4  ;;  %v3701_v9 = vunpack.c.l.b16 %v3610_v3  ;;  %v2717_v56 = vpack.c.b16 %v2681_v40, %v2681_v40 }
 0x25e   : > { %2840 = vst.msk [vmem:[#allocation2 + $0x40] sm:$0xf] %vm2823_vm14, %v2760_v42  ;;  %v3749_v49 = vpack.c.b16 %v3717_v22, %v3717_v22  ;;  %v3332_v0 = vpack.c.b16 %v3300_v54, %v3300_v54  ;;  %v3169_v30 = vor.u32 %v3168_v5, %v3165_v14  ;;  %v3268_v22 = vshll.u32 %v3237_v20, 16 }
 0x25f   : > { %3466 = vst.msk [vmem:[#allocation2 + $0x44] sm:$0xf] %vm3448_vm0, %v3387_v16  ;;  %v3741_v16 = vpack.c.b16 %v3709_v63, %v3709_v63  ;;  %v4718_v63 = vrot.slane %v4680_v55, 9  ;;  %v4667_v55 = vld [vmem:[%s5059_s26 + $0xa4] sm:$0x1] }
 0x260   : > { %v3270_v51 = vrot.slane %v3268_v22, 5 }
 0x261   : > { %v3582_v8 = vsel %vm5245_vm6, %v4718_v63, %v3581_v47  ;;  %v3182_v63 = vshll.u32 %v4667_v55, 16 }
 0x262   : > { %3408 = vrot.lane.b32.xlu1 %v3348_v43, %s4998_s12  ;;  %v3750_v43 = vpack.c.b16 %v3718_v31, %v3718_v31 }
 0x263   : > { %3394 = vrot.lane.b32.xlu0 %v3341_v44, %s4998_s12  ;;  %3392 = vrot.lane.b32.xlu2 %v3340_v58, %s4998_s12  ;;  %v3065_v44 = vsel %vm5070_vm2, %v3060_v32, %v3064_v34  ;;  %v3583_v58 = vrot.slane %v3581_v47, 4  ;;  %v3274_v32 = vshll.u32 %v3238_v19, 16  ;;  %v3278_v34 = vshrl.u32 %v3238_v19, 16  ;;  %v3239_v47 = vld [vmem:[%s5547_s8 + $0x14] sm:$0x1] }
 0x264   : > { %v3385_v7 = vpop.permute.xlu1 %3384  ;;  %v3301_v28 = vunpack.c.l.b16 %v3065_v44  ;;  %v3184_v11 = vrot.slane %v3182_v63, 5  ;;  %v3666_v19 = vld [vmem:[%s5547_s8 + $0xc] sm:$0xe] }
 0x265   : > { %3465 = vst.msk [vmem:[#allocation2 + $0x40] sm:$0xf] %vm3448_vm0, %v3385_v7  ;;  %v2778_v12 = vpop.permute.xlu0 %2777  ;;  %v3804_v17 = vpop.permute.xlu2 %3803  ;;  %v3325_v7 = vpack.c.b16 %v3293_v50, %v3293_v50  ;;  %v3280_v44 = vrot.slane %v3278_v34, 4 }
 0x266   : > { %2849 = vst.msk [vmem:[#allocation2 + $0x64] sm:$0xf] %vm2823_vm14, %v2778_v12  ;;  %v3333_v48 = vpack.c.b16 %v3301_v28, %v3301_v28  ;;  %v4666_v12 = vld [vmem:[%s5059_s26 + $0xa0] sm:$0xf]  ;;  %v2718_v28 = vpack.c.b16 %v2682_v35, %v2682_v35 }
 0x267   : > { %3866 = vst.msk [vmem:[#allocation2 + $0x40] sm:$0xf] %vm3849_vm1, %v3786_v52  ;;  %v4682_v52 = vld [vmem:[%s5059_s26 + $0x38] sm:$0x1]  ;;  %v3172_v31 = vshll.u32 %v4666_v12, 16  ;;  %v3176_v33 = vshrl.u32 %v4666_v12, 16 }
 0x268   : > { %v3584_v59 = vrot.slane %v4682_v52, 5 }
 0x269   : > { %v3178_v53 = vrot.slane %v3176_v33, 4 }
 0x26a   : > { %3795 = vrot.lane.b32.xlu1 %v3742_v15, %s4999_s13  ;;  %v3585_v4 = vsel %vm5245_vm6, %v3583_v58, %v3584_v59  ;;  %v3284_v59 = vshll.u32 %v3239_v47, 16 }
 0x26b   : > { %3793 = vrot.lane.b32.xlu0 %v3741_v16, %s4999_s13  ;;  %3410 = vrot.lane.b32.xlu2 %v3349_v26, %s4998_s12  ;;  %v3694_v10 = vunpack.c.l.b16 %v3585_v4  ;;  %v3733_v26 = vpack.c.b16 %v3701_v9, %v3701_v9  ;;  %v4708_v9 = vld [vmem:[%s5059_s26 + $0xa0] sm:$0xf] }
 0x26c   : > { %v3403_v38 = vpop.permute.xlu1 %3402  ;;  %v3286_v3 = vrot.slane %v3284_v59, 5  ;;  %v4643_v59 = vld [vmem:[%s5059_s26 + $0x44] sm:$0x1] }
 0x26d   : > { %3474 = vst.msk [vmem:[#allocation2 + $0x64] sm:$0xf] %vm3448_vm0, %v3403_v38  ;;  %v3401_v39 = vpop.permute.xlu0 %3400  ;;  %v3369_v42 = vpop.permute.xlu2 %3368  ;;  %v3726_v18 = vpack.c.b16 %v3694_v10, %v3694_v10  ;;  %v3265_v38 = vshrl.u32 %v3237_v20, 16  ;;  %v3667_v20 = vld [vmem:[%s5547_s8 + $0x10] sm:$0xf] }
 0x26e   : > { %3473 = vst.msk [vmem:[#allocation2 + $0x60] sm:$0xf] %vm3448_vm0, %v3401_v39  ;;  %v3613_v39 = vsel %vm5245_vm6, %v3611_v24, %v3612_v13  ;;  %v3684_v29 = vrot.slane %v3667_v20, 5 }
 0x26f   : > { %3875 = vst.msk [vmem:[#allocation2 + $0x64] sm:$0xf] %vm3849_vm1, %v3804_v17  ;;  %v3693_v17 = vunpack.c.l.b16 %v3582_v8  ;;  %v3702_v46 = vunpack.c.l.b16 %v3613_v39  ;;  %v4642_v39 = vld [vmem:[%s5059_s26 + $0x40] sm:$0xf] }
 0x270   : > { %3457 = vst.msk [vmem:[#allocation2 + $0x20] sm:$0xf] %vm3448_vm0, %v3369_v42  ;;  %v3174_v42 = vrot.slane %v3172_v31, 5  ;;  %v2980_v47 = vshll.u32 %v4642_v39, 16 }
 0x271   : > { %v3725_v36 = vpack.c.b16 %v3693_v17, %v3693_v17  ;;  %v3734_v50 = vpack.c.b16 %v3702_v46, %v3702_v46 }
 0x272   : > { %3360 = vrot.lane.b32.xlu1 %v3324_v41, %s4998_s12  ;;  %v3170_v41 = vrot.slane %v3169_v30, 4 }
 0x273   : > { %3811 = vrot.lane.b32.xlu0 %v3750_v43, %s4999_s13  ;;  %3809 = vrot.lane.b32.xlu2 %v3749_v49, %s4999_s13  ;;  %v3276_v43 = vrot.slane %v3274_v32, 5  ;;  %v3267_v49 = vrot.slane %v3265_v38, 4 }
 0x274   : > { %v3802_v60 = vpop.permute.xlu1 %3801  ;;  %v3175_v57 = vsel %vm5070_vm2, %v3170_v41, %v3174_v42 }
 0x275   : > { %3874 = vst.msk [vmem:[#allocation2 + $0x60] sm:$0xf] %vm3849_vm1, %v3802_v60  ;;  %v3788_v62 = vpop.permute.xlu0 %3787  ;;  %v3756_v2 = vpop.permute.xlu2 %3755  ;;  %v3281_v58 = vor.u32 %v3280_v44, %v3276_v43  ;;  %v2630_v60 = vld [vmem:[%s5547_s8 + $0xc] sm:$0xff]   ;;  %v3271_v61 = vor.u32 %v3270_v51, %v3267_v49  ;;  %v2984_v49 = vshrl.u32 %v4642_v39, 16 }
 0x276   : > { %3867 = vst.msk [vmem:[#allocation2 + $0x44] sm:$0xf] %vm3849_vm1, %v3788_v62  ;;  %v3179_v62 = vor.u32 %v3178_v53, %v3174_v42  ;;  %v3668_v53 = vld [vmem:[%s5547_s8 + $0x14] sm:$0x1] }
 0x277   : > { %v3272_v37 = vrot.slane %v3271_v61, 4  ;;  %v3687_v63 = vrot.slane %v3668_v53, 5 }
 0x278   : > { %v3180_v10 = vrot.slane %v3179_v62, 4  ;;  %v3686_v62 = vrot.slane %v3684_v29, 4 }
 0x27a   : > { %3378 = vrot.lane.b32.xlu1 %v3333_v48, %s4998_s12  ;;  %v3310_v48 = vunpack.c.l.b16 %v3175_v57  ;;  %v3185_v24 = vsel %vm5070_vm2, %v3180_v10, %v3184_v11 }
 0x27b   : > { %3376 = vrot.lane.b32.xlu0 %v3332_v0, %s4998_s12  ;;  %3362 = vrot.lane.b32.xlu2 %v3325_v7, %s4998_s12  ;;  %v2694_v0 = vunpack.c.h.b16 %v2630_v60  ;;  %v2693_v7 = vunpack.c.l.b16 %v2630_v60  ;;  %v3311_v34 = vunpack.c.l.b16 %v3185_v24  ;;  %v6413_v60 = vrot.slane %v2980_v47, 5 }
 0x27c   : > { %v3355_v15 = vpop.permute.xlu1 %3354  ;;  %v4839_v16 = vld [vmem:[#allocation2 + $0x60] sm:$0xff]  ;;  %v3342_v12 = vpack.c.b16 %v3310_v48, %v3310_v48  ;;  %v4641_v48 = vld [vmem:[%s5059_s26 + $0x3c] sm:$0xf] }
 0x27d   : > { %3450 = vst.msk [vmem:[#allocation2 + $0x4] sm:$0xf] %vm3448_vm0, %v3355_v15  ;;  %v3353_v21 = vpop.permute.xlu0 %3352  ;;  %v4835_v23 = vld [vmem:[#allocation2 + $0x40] sm:$0xff]  ;;  %4816 = vmatmul.msk.bf16.vlgmr.msra.gmra.mxu3 %vm4018_vm3, %v4839_v16  ;;  %v2764_v27 = vpop.permute.xlu2 %2763  ;;  %v2726_v5 = vpack.c.b16 %v2694_v0, %v2694_v0  ;;  %v3277_v16 = vsel %vm5070_vm2, %v3272_v37, %v3276_v43  ;;  %v2725_v17 = vpack.c.b16 %v2693_v7, %v2693_v7  ;;  %v4619_v37 = vld [vmem:[%s5059_s26 + $0x6c] sm:$0xff]  }
 0x27e   : > { %3449 = vst.msk [vmem:[#allocation2] sm:$0xf] %vm3448_vm0, %v3353_v21  ;;  %4812 = vmatmul.msk.bf16.vlgmr.msra.gmra.mxu2 %vm4018_vm3, %v4835_v23  ;;  %v3644_v21 = vrot.slane %v4708_v9, 5  ;;  %v4709_v23 = vld [vmem:[%s5059_s26 + $0xa4] sm:$0x1]  ;;  %v3343_v46 = vpack.c.b16 %v3311_v34, %v3311_v34  ;;  %v2990_v9 = vshll.u32 %v4643_v59, 16 }
 0x27f   : > { %3851 = vst.msk [vmem:[#allocation2 + $0x4] sm:$0xf] %vm3849_vm1, %v3756_v2  ;;  %v3282_v2 = vrot.slane %v3281_v58, 4  ;;  %v3647_v32 = vrot.slane %v4709_v23, 5  ;;  %v4654_v58 = vld [vmem:[%s5059_s26 + $0x70] sm:$0xf] }
 0x280   : > { %2842 = vst.msk [vmem:[#allocation2 + $0x48] sm:$0xf] %vm2823_vm14, %v2764_v27  ;;  %v4731_v27 = vrot.slane %v3666_v19, 9  ;;  %v3646_v31 = vrot.slane %v3644_v21, 4  ;;  %v3080_v23 = vshrl.u32 %v4654_v58, 16 }
 0x281   : > { %v3287_v15 = vsel %vm5070_vm2, %v3282_v2, %v3286_v3  ;;  %v2971_v3 = vshrl.u32 %v4641_v48, 16 }
 0x282   : > { %3777 = vrot.lane.b32.xlu1 %v3733_v26, %s4999_s13  ;;  %v3319_v13 = vunpack.c.l.b16 %v3287_v15  ;;  %v4707_v26 = vld [vmem:[%s5059_s26 + $0x9c] sm:$0xe]  ;;  %v3685_v42 = vsel %vm5245_vm6, %v4731_v27, %v3684_v29  ;;  %v2674_v15 = vunpack.c.h.b16 %v4619_v37  ;;  %v3082_v39 = vrot.slane %v3080_v23, 4 }
 0x283   : > { %3763 = vrot.lane.b32.xlu0 %v3726_v18, %s4999_s13  ;;  %3761 = vrot.lane.b32.xlu2 %v3725_v36, %s4999_s13  ;;  %v3318_v18 = vunpack.c.l.b16 %v3277_v16  ;;  %v4653_v36 = vld [vmem:[%s5059_s26 + $0x6c] sm:$0xf]  ;;  %v4727_v33 = vrot.slane %v4707_v26, 9 }
 0x284   : > { %v3754_v45 = vpop.permute.xlu1 %3753  ;;  %v3351_v35 = vpack.c.b16 %v3319_v13, %v3319_v13  ;;  %v3067_v43 = vshrl.u32 %v4653_v36, 16  ;;  %v3070_v44 = vshll.u32 %v4653_v36, 16  ;;  %v2992_v13 = vrot.slane %v2990_v9, 5 }
 0x285   : > { %3850 = vst.msk [vmem:[#allocation2] sm:$0xf] %vm3849_vm1, %v3754_v45  ;;  %v3371_v52 = vpop.permute.xlu0 %3370  ;;  %v2782_v54 = vpop.permute.xlu2 %2781  ;;  %v3350_v41 = vpack.c.b16 %v3318_v18, %v3318_v18  ;;  %v3648_v45 = vsel %vm5245_vm6, %v3646_v31, %v3647_v32  ;;  %v3645_v51 = vsel %vm5245_vm6, %v4727_v33, %v3644_v21  ;;  %v4684_v18 = vld [vmem:[%s5059_s26 + $0x40] sm:$0xf]  ;;  %v4685_v33 = vld [vmem:[%s5059_s26 + $0x44] sm:$0x1] }
 0x286   : > { %3458 = vst.msk [vmem:[#allocation2 + $0x24] sm:$0xf] %vm3448_vm0, %v3371_v52  ;;  %v3719_v52 = vunpack.c.l.b16 %v3685_v42  ;;  %v3072_v55 = vrot.slane %v3070_v44, 5  ;;  %v3711_v57 = vunpack.c.l.b16 %v3645_v51  ;;  %v3588_v36 = vrot.slane %v4684_v18, 5 }
 0x287   : > { %2851 = vst.msk [vmem:[#allocation2 + $0x6c] sm:$0xf] %vm2823_vm14, %v2782_v54  ;;  %v3069_v54 = vrot.slane %v3067_v43, 4  ;;  %v3591_v47 = vrot.slane %v4685_v33, 5 }
 0x288   : > { %v3751_v0 = vpack.c.b16 %v3719_v52, %v3719_v52  ;;  %v3743_v10 = vpack.c.b16 %v3711_v57, %v3711_v57 }
 0x289   : > { %v3073_v7 = vor.u32 %v3072_v55, %v3069_v54  ;;  %v4696_v54 = vld [vmem:[%s5059_s26 + $0x70] sm:$0xf] }
 0x28a   : > { %2773 = vrot.lane.b32.xlu1 %v2718_v28, %s4997_s11  ;;  %v3712_v28 = vunpack.c.l.b16 %v3648_v45 }
 0x28b   : > { %2771 = vrot.lane.b32.xlu0 %v2717_v56, %s4997_s11  ;;  %3779 = vrot.lane.b32.xlu2 %v3734_v50, %s4999_s13  ;;  %v2986_v50 = vrot.slane %v2984_v49, 4  ;;  %v3074_v19 = vrot.slane %v3073_v7, 4 }
 0x28c   : > { %v3772_v4 = vpop.permute.xlu1 %3771  ;;  %v4827_v6 = vld [vmem:[#allocation2] sm:$0xff] }
 0x28d   : > { %3859 = vst.msk [vmem:[#allocation2 + $0x24] sm:$0xf] %vm3849_vm1, %v3772_v4  ;;  %v3770_v8 = vpop.permute.xlu0 %3769  ;;  %4804 = vmatmul.msk.bf16.vlgmr.msra.gmra.mxu0 %vm4018_vm3, %v4827_v6  ;;  %v3405_v14 = vpop.permute.xlu2 %3404  ;;  %v2974_v4 = vshll.u32 %v4641_v48, 16  ;;  %v3744_v6 = vpack.c.b16 %v3712_v28, %v3712_v28  ;;  %v2987_v11 = vor.u32 %v2986_v50, %v6413_v60 }
 0x28e   : > { %3858 = vst.msk [vmem:[#allocation2 + $0x20] sm:$0xf] %vm3849_vm1, %v3770_v8  ;;  %v3076_v8 = vshll.u32 %v4654_v58, 16 }
 0x28f   : > { %v2988_v24 = vrot.slane %v2987_v11, 4 }
 0x290   : > { %v3078_v20 = vrot.slane %v3076_v8, 5 }
 0x292   : > { %3396 = vrot.lane.b32.xlu1 %v3342_v12, %s4998_s12  ;;  %v2973_v12 = vrot.slane %v2971_v3, 4  ;;  %v3079_v34 = vsel %vm5070_vm2, %v3074_v19, %v3078_v20  ;;  %v3083_v43 = vor.u32 %v3082_v39, %v3078_v20  ;;  %v4695_v3 = vld [vmem:[%s5059_s26 + $0x6c] sm:$0xe] }
 0x293   : > { %2789 = vrot.lane.b32.xlu0 %v2726_v5, %s4997_s11  ;;  %2787 = vrot.lane.b32.xlu2 %v2725_v17, %s4997_s11  ;;  %v3688_v5 = vsel %vm5245_vm6, %v3686_v62, %v3687_v63  ;;  %v2673_v17 = vunpack.c.l.b16 %v4619_v37  ;;  %v3302_v42 = vunpack.c.l.b16 %v3079_v34  ;;  %v4697_v63 = vld [vmem:[%s5059_s26 + $0x74] sm:$0x1] }
 0x294   : > { %v2780_v30 = vpop.permute.xlu1 %2779  ;;  %v3720_v26 = vunpack.c.l.b16 %v3688_v5  ;;  %v3084_v55 = vrot.slane %v3083_v43, 4  ;;  %v3619_v37 = vrot.slane %v4697_v63, 5 }
 0x295   : > { %2850 = vst.msk [vmem:[#allocation2 + $0x68] sm:$0xf] %vm2823_vm14, %v2780_v30  ;;  %v2766_v38 = vpop.permute.xlu0 %2765  ;;  %v4831_v22 = vld [vmem:[#allocation2 + $0x20] sm:$0xff]  ;;  %v3792_v40 = vpop.permute.xlu2 %3791  ;;  %v2710_v30 = vpack.c.b16 %v2674_v15, %v2674_v15  ;;  %v2709_v32 = vpack.c.b16 %v2673_v17, %v2673_v17  ;;  %v3334_v57 = vpack.c.b16 %v3302_v42, %v3302_v42 }
 0x296   : > { %2843 = vst.msk [vmem:[#allocation2 + $0x4c] sm:$0xf] %vm2823_vm14, %v2766_v38  ;;  %4808 = vmatmul.msk.bf16.vlgmr.msra.gmra.mxu1 %vm4018_vm3, %v4831_v22  ;;  %v2993_v38 = vsel %vm5070_vm2, %v2988_v24, %v2992_v13  ;;  %v3752_v22 = vpack.c.b16 %v3720_v26, %v3720_v26 }
 0x297   : > { %3475 = vst.msk [vmem:[#allocation2 + $0x68] sm:$0xf] %vm3448_vm0, %v3405_v14  ;;  %v2976_v14 = vrot.slane %v2974_v4, 5  ;;  %v3295_v45 = vunpack.c.l.b16 %v2993_v38 }
 0x299   : > { %v2977_v16 = vor.u32 %v2976_v14, %v2973_v12  ;;  %v3327_v59 = vpack.c.b16 %v3295_v45, %v3295_v45 }
 0x29a   : > { %3414 = vrot.lane.b32.xlu1 %v3351_v35, %s4998_s12  ;;  %v4683_v35 = vld [vmem:[%s5059_s26 + $0x3c] sm:$0xe] }
 0x29b   : > { %3412 = vrot.lane.b32.xlu0 %v3350_v41, %s4998_s12  ;;  %3398 = vrot.lane.b32.xlu2 %v3343_v46, %s4998_s12  ;;  %v2978_v29 = vrot.slane %v2977_v16, 4  ;;  %v4655_v41 = vld [vmem:[%s5059_s26 + $0x74] sm:$0x1]  ;;  %v3590_v46 = vrot.slane %v3588_v36, 4  ;;  %v4719_v52 = vrot.slane %v4683_v35, 9  ;;  %s4824_s26 = sshll.u32 %s6692_s20, 7 }
 0x29c   : > { %v3391_v56 = vpop.permute.xlu1 %3390  ;;  %v3086_v44 = vshll.u32 %v4655_v41, 16  ;;  %s6522_s29 = scalar_lea.vmem %s6682_s5, %s4824_s26 }
 0x29d   : > { %3468 = vst.msk [vmem:[#allocation2 + $0x4c] sm:$0xf] %vm3448_vm0, %v3391_v56  ;;  %v3389_v61 = vpop.permute.xlu0 %3388  ;;  %v3357_v2 = vpop.permute.xlu2 %3356  ;;  %v3589_v50 = vsel %vm5245_vm6, %v4719_v52, %v3588_v36 }
 0x29e   : > { %3467 = vst.msk [vmem:[#allocation2 + $0x48] sm:$0xf] %vm3448_vm0, %v3389_v61  ;;  %v3088_v56 = vrot.slane %v3086_v44, 5  ;;  %v3616_v61 = vrot.slane %v4696_v54, 5 }
 0x29f   : > { %3869 = vst.msk [vmem:[#allocation2 + $0x4c] sm:$0xf] %vm3849_vm1, %v3792_v40  ;;  %v2983_v40 = vsel %vm5070_vm2, %v2978_v29, %v6413_v60  ;;  %v3592_v60 = vsel %vm5245_vm6, %v3590_v46, %v3591_v47 }
 0x2a0   : > { %3451 = vst.msk [vmem:[#allocation2 + $0x8] sm:$0xf] %vm3448_vm0, %v3357_v2  ;;  %v3294_v53 = vunpack.c.l.b16 %v2983_v40  ;;  %v3089_v48 = vsel %vm5070_vm2, %v3084_v55, %v3088_v56  ;;  %v3695_v2 = vunpack.c.l.b16 %v3589_v50  ;;  %v6507_v55 = vld [vmem:[%s6680_s3] ss:$0 sm:$0xff] }
 0x2a1   : > { %v3303_v7 = vunpack.c.l.b16 %v3089_v48 }
 0x2a2   : > { %3813 = vrot.lane.b32.xlu1 %v3751_v0, %s4999_s13  ;;  %v3326_v62 = vpack.c.b16 %v3294_v53, %v3294_v53  ;;  %v3696_v0 = vunpack.c.l.b16 %v3592_v60  ;;  %v3727_v12 = vpack.c.b16 %v3695_v2, %v3695_v2 }
 0x2a3   : > { %3799 = vrot.lane.b32.xlu0 %v3744_v6, %s4999_s13  ;;  %3797 = vrot.lane.b32.xlu2 %v3743_v10, %s4999_s13  ;;  %v3618_v6 = vrot.slane %v3616_v61, 4  ;;  %v4723_v10 = vrot.slane %v4695_v3, 9  ;;  %v3335_v5 = vpack.c.b16 %v3303_v7, %v3303_v7 }
 0x2a4   : > { %v3790_v21 = vpop.permute.xlu1 %3789  ;;  %v3728_v25 = vpack.c.b16 %v3696_v0, %v3696_v0 }
 0x2a5   : > { %3868 = vst.msk [vmem:[#allocation2 + $0x48] sm:$0xf] %vm3849_vm1, %v3790_v21  ;;  %v3407_v27 = vpop.permute.xlu0 %3406  ;;  %v3375_v31 = vpop.permute.xlu2 %3374  ;;  %v3620_v14 = vsel %vm5245_vm6, %v3618_v6, %v3619_v37  ;;  %v3617_v15 = vsel %vm5245_vm6, %v4723_v10, %v3616_v61 }
 0x2a6   : > { %3476 = vst.msk [vmem:[#allocation2 + $0x6c] sm:$0xf] %vm3448_vm0, %v3407_v27  ;;  %v3704_v16 = vunpack.c.l.b16 %v3620_v14  ;;  %v3703_v19 = vunpack.c.l.b16 %v3617_v15 }
 0x2a7   : > { %3460 = vst.msk [vmem:[#allocation2 + $0x2c] sm:$0xf] %vm3448_vm0, %v3375_v31 }
 0x2a8   : > { %v3736_v23 = vpack.c.b16 %v3704_v16, %v3704_v16  ;;  %v3735_v24 = vpack.c.b16 %v3703_v19, %v3703_v19 }
 0x2aa   : > { %2757 = vrot.lane.b32.xlu1 %v2710_v30, %s4997_s11 }
 0x2ab   : > { %2755 = vrot.lane.b32.xlu0 %v2709_v32, %s4997_s11  ;;  %3815 = vrot.lane.b32.xlu2 %v3752_v22, %s4999_s13 }
 0x2ac   : > { %v3808_v49 = vpop.permute.xlu1 %3807  ;;  %v4836_v51 = vld [vmem:[#allocation2 + $0x48] sm:$0xff] }
 0x2ad   : > { %3877 = vst.msk [vmem:[#allocation2 + $0x6c] sm:$0xf] %vm3849_vm1, %v3808_v49  ;;  %v3806_v28 = vpop.permute.xlu0 %3805  ;;  %4813 = vmatmul.msk.bf16.gmra.mxu2 %vm4018_vm3, %v4836_v51  ;;  %v3774_v58 = vpop.permute.xlu2 %3773 }
 0x2ae   : > { %3876 = vst.msk [vmem:[#allocation2 + $0x68] sm:$0xf] %vm3849_vm1, %v3806_v28 }
 0x2b2   : > { %3380 = vrot.lane.b32.xlu1 %v3334_v57, %s4998_s12 }
 0x2b3   : > { %3366 = vrot.lane.b32.xlu0 %v3327_v59, %s4998_s12  ;;  %3364 = vrot.lane.b32.xlu2 %v3326_v62, %s4998_s12 }
 0x2b4   : > { %v3373_v4 = vpop.permute.xlu1 %3372 }
 0x2b5   : > { %3459 = vst.msk [vmem:[#allocation2 + $0x28] sm:$0xf] %vm3448_vm0, %v3373_v4  ;;  %v3359_v8 = vpop.permute.xlu0 %3358  ;;  %v4840_v9 = vld [vmem:[#allocation2 + $0x68] sm:$0xff]  ;;  %v2770_v11 = vpop.permute.xlu2 %2769 }
 0x2b6   : > { %3452 = vst.msk [vmem:[#allocation2 + $0xc] sm:$0xf] %vm3448_vm0, %v3359_v8  ;;  %4817 = vmatmul.msk.bf16.gmra.mxu3 %vm4018_vm3, %v4840_v9 }
 0x2b7   : > { %3860 = vst.msk [vmem:[#allocation2 + $0x28] sm:$0xf] %vm3849_vm1, %v3774_v58  ;;  %v6510_v58 = vstv %s4160_s23 }
 0x2b8   : > { %2845 = vst.msk [vmem:[#allocation2 + $0x54] sm:$0xf] %vm2823_vm14, %v2770_v11 }
 0x2ba   : > { %3767 = vrot.lane.b32.xlu1 %v3728_v25, %s4999_s13 }
 0x2bb   : > { %3765 = vrot.lane.b32.xlu0 %v3727_v12, %s4999_s13  ;;  %3382 = vrot.lane.b32.xlu2 %v3335_v5, %s4998_s12 }
 0x2bc   : > { %v3760_v17 = vpop.permute.xlu1 %3759 }
 0x2bd   : > { %3853 = vst.msk [vmem:[#allocation2 + $0xc] sm:$0xf] %vm3849_vm1, %v3760_v17  ;;  %v3758_v20 = vpop.permute.xlu0 %3757  ;;  %v3393_v21 = vpop.permute.xlu2 %3392 }
 0x2be   : > { %3852 = vst.msk [vmem:[#allocation2 + $0x8] sm:$0xf] %vm3849_vm1, %v3758_v20 }
 0x2c3   : > { %3783 = vrot.lane.b32.xlu0 %v3736_v23, %s4999_s13  ;;  %3781 = vrot.lane.b32.xlu2 %v3735_v24, %s4999_s13 }
 0x2c4   : > { %v2768_v1 = vpop.permute.xlu1 %2767 }
 0x2c5   : > { %2844 = vst.msk [vmem:[#allocation2 + $0x50] sm:$0xf] %vm2823_vm14, %v2768_v1  ;;  %v3776_v13 = vpop.permute.xlu0 %3775  ;;  %v4828_v26 = vld [vmem:[#allocation2 + $0x8] sm:$0xff]  ;;  %v3411_v18 = vpop.permute.xlu2 %3410 }
 0x2c6   : > { %3861 = vst.msk [vmem:[#allocation2 + $0x2c] sm:$0xf] %vm3849_vm1, %v3776_v13  ;;  %4805 = vmatmul.msk.bf16.gmra.mxu0 %vm4018_vm3, %v4828_v26 }
 0x2c7   : > { %3469 = vst.msk [vmem:[#allocation2 + $0x50] sm:$0xf] %vm3448_vm0, %v3393_v21 }
 0x2cc   : > { %v2786_v27 = vpop.permute.xlu1 %2785 }
 0x2cd   : > { %2853 = vst.msk [vmem:[#allocation2 + $0x74] sm:$0xf] %vm2823_vm14, %v2786_v27  ;;  %v2784_v29 = vpop.permute.xlu0 %2783  ;;  %v4832_v30 = vld [vmem:[#allocation2 + $0x28] sm:$0xff]  ;;  %v3810_v31 = vpop.permute.xlu2 %3809 }
 0x2ce   : > { %2852 = vst.msk [vmem:[#allocation2 + $0x70] sm:$0xf] %vm2823_vm14, %v2784_v29  ;;  %4809 = vmatmul.msk.bf16.gmra.mxu1 %vm4018_vm3, %v4832_v30 }
 0x2cf   : > { %3478 = vst.msk [vmem:[#allocation2 + $0x74] sm:$0xf] %vm3448_vm0, %v3411_v18 }
 0x2d4   : > { %v3409_v32 = vpop.permute.xlu1 %3408 }
 0x2d5   : > { %3477 = vst.msk [vmem:[#allocation2 + $0x70] sm:$0xf] %vm3448_vm0, %v3409_v32  ;;  %v3395_v34 = vpop.permute.xlu0 %3394  ;;  %v3363_v36 = vpop.permute.xlu2 %3362 }
 0x2d6   : > { %3470 = vst.msk [vmem:[#allocation2 + $0x54] sm:$0xf] %vm3448_vm0, %v3395_v34 }
 0x2d7   : > { %3878 = vst.msk [vmem:[#allocation2 + $0x70] sm:$0xf] %vm3849_vm1, %v3810_v31 }
 0x2d8   : > { %3454 = vst.msk [vmem:[#allocation2 + $0x14] sm:$0xf] %vm3448_vm0, %v3363_v36 }
 0x2dc   : > { %v3796_v38 = vpop.permute.xlu1 %3795 }
 0x2dd   : > { %3871 = vst.msk [vmem:[#allocation2 + $0x54] sm:$0xf] %vm3849_vm1, %v3796_v38  ;;  %v3794_v22 = vpop.permute.xlu0 %3793  ;;  %v3762_v33 = vpop.permute.xlu2 %3761 }
 0x2de   : > { %3870 = vst.msk [vmem:[#allocation2 + $0x50] sm:$0xf] %vm3849_vm1, %v3794_v22 }
 0x2e4   : > { %v3361_v39 = vpop.permute.xlu1 %3360 }
 0x2e5   : > { %3453 = vst.msk [vmem:[#allocation2 + $0x10] sm:$0xf] %vm3448_vm0, %v3361_v39  ;;  %v3812_v35 = vpop.permute.xlu0 %3811  ;;  %v4837_v40 = vld [vmem:[#allocation2 + $0x50] sm:$0xff]  ;;  %v3780_v41 = vpop.permute.xlu2 %3779 }
 0x2e6   : > { %3879 = vst.msk [vmem:[#allocation2 + $0x74] sm:$0xf] %vm3849_vm1, %v3812_v35  ;;  %4814 = vmatmul.msk.bf16.gmra.mxu2 %vm4018_vm3, %v4837_v40 }
 0x2e7   : > { %3854 = vst.msk [vmem:[#allocation2 + $0x10] sm:$0xf] %vm3849_vm1, %v3762_v33 }
 0x2ec   : > { %v3379_v42 = vpop.permute.xlu1 %3378 }
 0x2ed   : > { %3462 = vst.msk [vmem:[#allocation2 + $0x34] sm:$0xf] %vm3448_vm0, %v3379_v42  ;;  %v3377_v43 = vpop.permute.xlu0 %3376  ;;  %v4841_v44 = vld [vmem:[#allocation2 + $0x70] sm:$0xff]  ;;  %v2788_v45 = vpop.permute.xlu2 %2787 }
 0x2ee   : > { %3461 = vst.msk [vmem:[#allocation2 + $0x30] sm:$0xf] %vm3448_vm0, %v3377_v43  ;;  %4818 = vmatmul.msk.bf16.gmra.mxu3 %vm4018_vm3, %v4841_v44 }
 0x2ef   : > { %3863 = vst.msk [vmem:[#allocation2 + $0x34] sm:$0xf] %vm3849_vm1, %v3780_v41 }
 0x2f0   : > { %2854 = vst.msk [vmem:[#allocation2 + $0x78] sm:$0xf] %vm2823_vm14, %v2788_v45 }
 0x2f4   : > { %v3778_v46 = vpop.permute.xlu1 %3777 }
 0x2f5   : > { %3862 = vst.msk [vmem:[#allocation2 + $0x30] sm:$0xf] %vm3849_vm1, %v3778_v46  ;;  %v3764_v47 = vpop.permute.xlu0 %3763  ;;  %v3399_v49 = vpop.permute.xlu2 %3398 }
 0x2f6   : > { %3855 = vst.msk [vmem:[#allocation2 + $0x14] sm:$0xf] %vm3849_vm1, %v3764_v47 }
 0x2fc   : > { %v2774_v51 = vpop.permute.xlu1 %2773  ;;  %v4833_v52 = vld [vmem:[#allocation2 + $0x30] sm:$0xff] }
 0x2fd   : > { %2847 = vst.msk [vmem:[#allocation2 + $0x5c] sm:$0xf] %vm2823_vm14, %v2774_v51  ;;  %v2772_v53 = vpop.permute.xlu0 %2771  ;;  %v4829_v28 = vld [vmem:[#allocation2 + $0x10] sm:$0xff]  ;;  %4810 = vmatmul.msk.bf16.gmra.mxu1 %vm4018_vm3, %v4833_v52  ;;  %v3798_v54 = vpop.permute.xlu2 %3797 }
 0x2fe   : > { %2846 = vst.msk [vmem:[#allocation2 + $0x58] sm:$0xf] %vm2823_vm14, %v2772_v53  ;;  %4806 = vmatmul.msk.bf16.gmra.mxu0 %vm4018_vm3, %v4829_v28 }
 0x2ff   : > { %3472 = vst.msk [vmem:[#allocation2 + $0x5c] sm:$0xf] %vm3448_vm0, %v3399_v49 }
 0x300   : > { %v4140_v56 = vpop.f32.mrf.mxu3 }
 0x301   : > { %v4120_v57 = vpop.f32.mrf.mxu2  ;;  %v4141_v59 = vadd.f32 %v6507_v55, %v4140_v56 }
 0x302   : > { %v4121_v60 = vadd.f32 %v6507_v55, %v4120_v57 }
 0x303   : > { %vm4185_vm2 = vcmp.ge.f32.partialorder %v4141_v59, 0.0  ;;  %v4218_v50 = vmul.f32 %v6510_v58, %v4141_v59 }
 0x304   : > { %v3397_v61 = vpop.permute.xlu1 %3396  ;;  %vm4177_vm4 = vcmp.ge.f32.partialorder %v4121_v60, 0.0  ;;  %v4210_v62 = vmul.f32 %v6510_v58, %v4121_v60 }
 0x305   : > { %3471 = vst.msk [vmem:[#allocation2 + $0x58] sm:$0xf] %vm3448_vm0, %v3397_v61  ;;  %v2790_v63 = vpop.permute.xlu0 %2789  ;;  %v4250_v48 = vsel %vm4185_vm2, %v4141_v59, %v4218_v50  ;;  %v3816_v0 = vpop.permute.xlu2 %3815 }
 0x306   : > { %2855 = vst.msk [vmem:[#allocation2 + $0x7c] sm:$0xf] %vm2823_vm14, %v2790_v63  ;;  %v4242_v2 = vsel %vm4177_vm4, %v4121_v60, %v4210_v62  ;;  %v4282_v3 = vpack.c.bf16 %v4250_v48, %v4250_v48 }
 0x307   : > { %3872 = vst.msk [vmem:[#allocation2 + $0x58] sm:$0xf] %vm3849_vm1, %v3798_v54  ;;  %v4274_v4 = vpack.c.bf16 %v4242_v2, %v4242_v2 }
 0x308   : > { %4315 = vst.msk [vmem:[%s6522_s29 + $0x60] sm:$0xf] %vm4290_vm5, %v4282_v3  ;;  %v4142_v6 = vpop.f32.mrf.mxu3 }
 0x309   : > { %4307 = vst.msk [vmem:[%s6522_s29 + $0x40] sm:$0xf] %vm4290_vm5, %v4274_v4  ;;  %v4122_v37 = vpop.f32.mrf.mxu2  ;;  %v4143_v7 = vadd.f32 %v6507_v55, %v4142_v6 }
 0x30a   : > { %v4123_v8 = vadd.f32 %v6507_v55, %v4122_v37  ;;  %v4080_v9 = vpop.f32.mrf.mxu0 }
 0x30b   : > { %vm4186_vm6 = vcmp.ge.f32.partialorder %v4143_v7, 0.0  ;;  %v4219_v10 = vmul.f32 %v6510_v58, %v4143_v7  ;;  %v4081_v11 = vadd.f32 %v6507_v55, %v4080_v9 }
 0x30c   : > { %v3415_v25 = vpop.permute.xlu1 %3414  ;;  %vm4178_vm7 = vcmp.ge.f32.partialorder %v4123_v8, 0.0  ;;  %v4211_v12 = vmul.f32 %v6510_v58, %v4123_v8 }
 0x30d   : > { %3480 = vst.msk [vmem:[#allocation2 + $0x7c] sm:$0xf] %vm3448_vm0, %v3415_v25  ;;  %v3413_v14 = vpop.permute.xlu0 %3412  ;;  %v4251_v5 = vsel %vm4186_vm6, %v4143_v7, %v4219_v10  ;;  %vm4161_vm8 = vcmp.ge.f32.partialorder %v4081_v11, 0.0  ;;  %v4194_v15 = vmul.f32 %v6510_v58, %v4081_v11  ;;  %v3365_v16 = vpop.permute.xlu2 %3364 }
 0x30e   : > { %3479 = vst.msk [vmem:[#allocation2 + $0x78] sm:$0xf] %vm3448_vm0, %v3413_v14  ;;  %v4243_v17 = vsel %vm4178_vm7, %v4123_v8, %v4211_v12  ;;  %v4283_v19 = vpack.c.bf16 %v4251_v5, %v4251_v5 }
 0x30f   : > { %3881 = vst.msk [vmem:[#allocation2 + $0x7c] sm:$0xf] %vm3849_vm1, %v3816_v0  ;;  %v4275_v20 = vpack.c.bf16 %v4243_v17, %v4243_v17  ;;  %v4226_v21 = vsel %vm4161_vm8, %v4081_v11, %v4194_v15 }
 0x310   : > { %3455 = vst.msk [vmem:[#allocation2 + $0x18] sm:$0xf] %vm3448_vm0, %v3365_v16  ;;  %v4258_v23 = vpack.c.bf16 %v4226_v21, %v4226_v21 }
 0x311   : > { %4316 = vst.msk [vmem:[%s6522_s29 + $0x64] sm:$0xf] %vm4290_vm5, %v4283_v19 }
 0x312   : > { %4308 = vst.msk [vmem:[%s6522_s29 + $0x44] sm:$0xf] %vm4290_vm5, %v4275_v20  ;;  %v4082_v24 = vpop.f32.mrf.mxu0 }
 0x313   : > { %4291 = vst.msk [vmem:[%s6522_s29] sm:$0xf] %vm4290_vm5, %v4258_v23  ;;  %v4083_v13 = vadd.f32 %v6507_v55, %v4082_v24  ;;  %v4100_v26 = vpop.f32.mrf.mxu1 }
 0x314   : > { %v3814_v1 = vpop.permute.xlu1 %3813  ;;  %v4101_v27 = vadd.f32 %v6507_v55, %v4100_v26 }
 0x315   : > { %3880 = vst.msk [vmem:[#allocation2 + $0x78] sm:$0xf] %vm3849_vm1, %v3814_v1  ;;  %v3800_v18 = vpop.permute.xlu0 %3799  ;;  %vm4162_vm9 = vcmp.ge.f32.partialorder %v4083_v13, 0.0  ;;  %v4195_v29 = vmul.f32 %v6510_v58, %v4083_v13  ;;  %v3383_v38 = vpop.permute.xlu2 %3382 }
 0x316   : > { %3873 = vst.msk [vmem:[#allocation2 + $0x5c] sm:$0xf] %vm3849_vm1, %v3800_v18  ;;  %vm4169_vm10 = vcmp.ge.f32.partialorder %v4101_v27, 0.0  ;;  %v4202_v30 = vmul.f32 %v6510_v58, %v4101_v27 }
 0x317   : > { %v4227_v31 = vsel %vm4162_vm9, %v4083_v13, %v4195_v29 }
 0x318   : > { %v4259_v32 = vpack.c.bf16 %v4227_v31, %v4227_v31  ;;  %v4234_v34 = vsel %vm4169_vm10, %v4101_v27, %v4202_v30 }
 0x319   : > { %v4266_v36 = vpack.c.bf16 %v4234_v34, %v4234_v34 }
 0x31a   : > { %4292 = vst.msk [vmem:[%s6522_s29 + $0x4] sm:$0xf] %vm4290_vm5, %v4259_v32 }
 0x31b   : > { %4299 = vst.msk [vmem:[%s6522_s29 + $0x20] sm:$0xf] %vm4290_vm5, %v4266_v36  ;;  %v4102_v33 = vpop.f32.mrf.mxu1 }
 0x31c   : > { %v2758_v22 = vpop.permute.xlu1 %2757  ;;  %v4842_v39 = vld [vmem:[#allocation2 + $0x78] sm:$0xff]  ;;  %v4103_v40 = vadd.f32 %v6507_v55, %v4102_v33 }
 0x31d   : > { %2839 = vst.msk [vmem:[#allocation2 + $0x3c] sm:$0xf] %vm2823_vm14, %v2758_v22  ;;  %v2756_v35 = vpop.permute.xlu0 %2755  ;;  %v4838_v41 = vld [vmem:[#allocation2 + $0x58] sm:$0xff]  ;;  %4819 = vmatmul.msk.bf16.gmra.mxu3 %vm4018_vm3, %v4842_v39  ;;  %v3782_v46 = vpop.permute.xlu2 %3781 }
 0x31e   : > { %2838 = vst.msk [vmem:[#allocation2 + $0x38] sm:$0xf] %vm2823_vm14, %v2756_v35  ;;  %vm4170_vm11 = vcmp.ge.f32.partialorder %v4103_v40, 0.0  ;;  %v4203_v42 = vmul.f32 %v6510_v58, %v4103_v40  ;;  %4815 = vmatmul.msk.bf16.gmra.mxu2 %vm4018_vm3, %v4838_v41 }
 0x31f   : > { %3464 = vst.msk [vmem:[#allocation2 + $0x3c] sm:$0xf] %vm3448_vm0, %v3383_v38 }
 0x320   : > { %v4235_v43 = vsel %vm4170_vm11, %v4103_v40, %v4203_v42 }
 0x321   : > { %v4267_v44 = vpack.c.bf16 %v4235_v43, %v4235_v43 }
 0x323   : > { %4300 = vst.msk [vmem:[%s6522_s29 + $0x24] sm:$0xf] %vm4290_vm5, %v4267_v44 }
 0x324   : > { %v3381_v45 = vpop.permute.xlu1 %3380 }
 0x325   : > { %3463 = vst.msk [vmem:[#allocation2 + $0x38] sm:$0xf] %vm3448_vm0, %v3381_v45  ;;  %v3367_v47 = vpop.permute.xlu0 %3366 }
 0x326   : > { %3456 = vst.msk [vmem:[#allocation2 + $0x1c] sm:$0xf] %vm3448_vm0, %v3367_v47 }
 0x327   : > { %3864 = vst.msk [vmem:[#allocation2 + $0x38] sm:$0xf] %vm3849_vm1, %v3782_v46 }
 0x32c   : > { %v3768_v49 = vpop.permute.xlu1 %3767 }
 0x32d   : > { %3857 = vst.msk [vmem:[#allocation2 + $0x1c] sm:$0xf] %vm3849_vm1, %v3768_v49  ;;  %v3766_v51 = vpop.permute.xlu0 %3765 }
 0x32e   : > { %3856 = vst.msk [vmem:[#allocation2 + $0x18] sm:$0xf] %vm3849_vm1, %v3766_v51 }
 0x330   : > { %v4125_v52 = vpop.f32.mrf.mxu2 }
 0x331   : > { %v4126_v53 = vadd.f32 %v6507_v55, %v4125_v52 }
 0x333   : > { %vm4179_vm12 = vcmp.ge.f32.partialorder %v4126_v53, 0.0  ;;  %v4212_v28 = vmul.f32 %v6510_v58, %v4126_v53 }
 0x335   : > { %v3784_v54 = vpop.permute.xlu0 %3783  ;;  %v4830_v56 = vld [vmem:[#allocation2 + $0x18] sm:$0xff]  ;;  %v4244_v57 = vsel %vm4179_vm12, %v4126_v53, %v4212_v28 }
 0x336   : > { %3865 = vst.msk [vmem:[#allocation2 + $0x3c] sm:$0xf] %vm3849_vm1, %v3784_v54  ;;  %v4276_v59 = vpack.c.bf16 %v4244_v57, %v4244_v57  ;;  %4807 = vmatmul.msk.bf16.gmra.mxu0 %vm4018_vm3, %v4830_v56 }
 0x338   : > { %4309 = vst.msk [vmem:[%s6522_s29 + $0x48] sm:$0xf] %vm4290_vm5, %v4276_v59  ;;  %v4127_v60 = vpop.f32.mrf.mxu2 }
 0x339   : > { %v4128_v50 = vadd.f32 %v6507_v55, %v4127_v60  ;;  %v4145_v61 = vpop.f32.mrf.mxu3 }
 0x33a   : > { %v4146_v62 = vadd.f32 %v6507_v55, %v4145_v61 }
 0x33b   : > { %vm4180_vm13 = vcmp.ge.f32.partialorder %v4128_v50, 0.0  ;;  %v4213_v63 = vmul.f32 %v6510_v58, %v4128_v50 }
 0x33c   : > { %vm4187_vm14 = vcmp.ge.f32.partialorder %v4146_v62, 0.0  ;;  %v4220_v48 = vmul.f32 %v6510_v58, %v4146_v62 }
 0x33d   : > { %v4834_v0 = vld [vmem:[#allocation2 + $0x38] sm:$0xff]  ;;  %v4245_v2 = vsel %vm4180_vm13, %v4128_v50, %v4213_v63 }
 0x33e   : > { %v4277_v3 = vpack.c.bf16 %v4245_v2, %v4245_v2  ;;  %v4252_v4 = vsel %vm4187_vm14, %v4146_v62, %v4220_v48  ;;  %4811 = vmatmul.msk.bf16.gmra.mxu1 %vm4018_vm3, %v4834_v0 }
 0x33f   : > { %v4284_v6 = vpack.c.bf16 %v4252_v4, %v4252_v4 }
 0x340   : > { %4310 = vst.msk [vmem:[%s6522_s29 + $0x4c] sm:$0xf] %vm4290_vm5, %v4277_v3 }
 0x341   : > { %4317 = vst.msk [vmem:[%s6522_s29 + $0x68] sm:$0xf] %vm4290_vm5, %v4284_v6  ;;  %v4147_v37 = vpop.f32.mrf.mxu3 }
 0x342   : > { %v4148_v7 = vadd.f32 %v6507_v55, %v4147_v37 }
 0x343   : > { %v4085_v8 = vpop.f32.mrf.mxu0 }
 0x344   : > { %vm4188_vm15 = vcmp.ge.f32.partialorder %v4148_v7, 0.0  ;;  %v4221_v9 = vmul.f32 %v6510_v58, %v4148_v7  ;;  %v4086_v10 = vadd.f32 %v6507_v55, %v4085_v8 }
 0x346   : > { %v4253_v25 = vsel %vm4188_vm15, %v4148_v7, %v4221_v9  ;;  %vm4163_vm0 = vcmp.ge.f32.partialorder %v4086_v10, 0.0  ;;  %v4196_v11 = vmul.f32 %v6510_v58, %v4086_v10 }
 0x347   : > { %v4285_v12 = vpack.c.bf16 %v4253_v25, %v4253_v25 }
 0x348   : > { %v4228_v14 = vsel %vm4163_vm0, %v4086_v10, %v4196_v11 }
 0x349   : > { %4318 = vst.msk [vmem:[%s6522_s29 + $0x6c] sm:$0xf] %vm4290_vm5, %v4285_v12  ;;  %v4260_v5 = vpack.c.bf16 %v4228_v14, %v4228_v14 }
 0x34b   : > { %4293 = vst.msk [vmem:[%s6522_s29 + $0x8] sm:$0xf] %vm4290_vm5, %v4260_v5  ;;  %v4087_v15 = vpop.f32.mrf.mxu0  ;;  %v4105_v16 = vpop.f32.mrf.mxu1 }
 0x34c   : > { %v4088_v17 = vadd.f32 %v6507_v55, %v4087_v15  ;;  %v4106_v19 = vadd.f32 %v6507_v55, %v4105_v16 }
 0x34e   : > { %vm4164_vm1 = vcmp.ge.f32.partialorder %v4088_v17, 0.0  ;;  %v4197_v20 = vmul.f32 %v6510_v58, %v4088_v17  ;;  %vm4171_vm3 = vcmp.ge.f32.partialorder %v4106_v19, 0.0  ;;  %v4204_v21 = vmul.f32 %v6510_v58, %v4106_v19 }
 0x350   : > { %v4229_v23 = vsel %vm4164_vm1, %v4088_v17, %v4197_v20  ;;  %v4236_v24 = vsel %vm4171_vm3, %v4106_v19, %v4204_v21 }
 0x351   : > { %v4261_v1 = vpack.c.bf16 %v4229_v23, %v4229_v23  ;;  %v4268_v13 = vpack.c.bf16 %v4236_v24, %v4236_v24 }
 0x353   : > { %4294 = vst.msk [vmem:[%s6522_s29 + $0xc] sm:$0xf] %vm4290_vm5, %v4261_v1  ;;  %v4107_v26 = vpop.f32.mrf.mxu1 }
 0x354   : > { %4301 = vst.msk [vmem:[%s6522_s29 + $0x28] sm:$0xf] %vm4290_vm5, %v4268_v13  ;;  %v4108_v18 = vadd.f32 %v6507_v55, %v4107_v26 }
 0x356   : > { %vm4172_vm2 = vcmp.ge.f32.partialorder %v4108_v18, 0.0  ;;  %v4205_v27 = vmul.f32 %v6510_v58, %v4108_v18 }
 0x358   : > { %v4237_v29 = vsel %vm4172_vm2, %v4108_v18, %v4205_v27 }
 0x359   : > { %v4269_v30 = vpack.c.bf16 %v4237_v29, %v4237_v29 }
 0x35b   : > { %4302 = vst.msk [vmem:[%s6522_s29 + $0x2c] sm:$0xf] %vm4290_vm5, %v4269_v30 }
 0x369   : > { %v4130_v31 = vpop.f32.mrf.mxu2 }
 0x36a   : > { %v4131_v32 = vadd.f32 %v6507_v55, %v4130_v31 }
 0x36c   : > { %vm4181_vm4 = vcmp.ge.f32.partialorder %v4131_v32, 0.0  ;;  %v4214_v34 = vmul.f32 %v6510_v58, %v4131_v32 }
 0x36e   : > { %v4246_v36 = vsel %vm4181_vm4, %v4131_v32, %v4214_v34 }
 0x36f   : > { %v4278_v38 = vpack.c.bf16 %v4246_v36, %v4246_v36 }
 0x371   : > { %4311 = vst.msk [vmem:[%s6522_s29 + $0x50] sm:$0xf] %vm4290_vm5, %v4278_v38  ;;  %v4132_v22 = vpop.f32.mrf.mxu2  ;;  %v4150_v33 = vpop.f32.mrf.mxu3 }
 0x372   : > { %v4133_v39 = vadd.f32 %v6507_v55, %v4132_v22  ;;  %v4151_v35 = vadd.f32 %v6507_v55, %v4150_v33 }
 0x374   : > { %vm4182_vm6 = vcmp.ge.f32.partialorder %v4133_v39, 0.0  ;;  %v4215_v40 = vmul.f32 %v6510_v58, %v4133_v39  ;;  %vm4189_vm7 = vcmp.ge.f32.partialorder %v4151_v35, 0.0  ;;  %v4222_v41 = vmul.f32 %v6510_v58, %v4151_v35 }
 0x376   : > { %v4247_v42 = vsel %vm4182_vm6, %v4133_v39, %v4215_v40  ;;  %v4254_v43 = vsel %vm4189_vm7, %v4151_v35, %v4222_v41 }
 0x377   : > { %v4279_v44 = vpack.c.bf16 %v4247_v42, %v4247_v42  ;;  %v4286_v45 = vpack.c.bf16 %v4254_v43, %v4254_v43 }
 0x379   : > { %4312 = vst.msk [vmem:[%s6522_s29 + $0x54] sm:$0xf] %vm4290_vm5, %v4279_v44  ;;  %v4152_v46 = vpop.f32.mrf.mxu3 }
 0x37a   : > { %4319 = vst.msk [vmem:[%s6522_s29 + $0x70] sm:$0xf] %vm4290_vm5, %v4286_v45  ;;  %v4153_v47 = vadd.f32 %v6507_v55, %v4152_v46  ;;  %v4110_v49 = vpop.f32.mrf.mxu1 }
 0x37b   : > { %v4090_v51 = vpop.f32.mrf.mxu0  ;;  %v4111_v52 = vadd.f32 %v6507_v55, %v4110_v49 }
 0x37c   : > { %vm4190_vm8 = vcmp.ge.f32.partialorder %v4153_v47, 0.0  ;;  %v4223_v53 = vmul.f32 %v6510_v58, %v4153_v47  ;;  %v4091_v28 = vadd.f32 %v6507_v55, %v4090_v51 }
 0x37d   : > { %vm4173_vm9 = vcmp.ge.f32.partialorder %v4111_v52, 0.0  ;;  %v4206_v54 = vmul.f32 %v6510_v58, %v4111_v52 }
 0x37e   : > { %v4255_v56 = vsel %vm4190_vm8, %v4153_v47, %v4223_v53  ;;  %vm4165_vm10 = vcmp.ge.f32.partialorder %v4091_v28, 0.0  ;;  %v4198_v57 = vmul.f32 %v6510_v58, %v4091_v28 }
 0x37f   : > { %v4287_v59 = vpack.c.bf16 %v4255_v56, %v4255_v56  ;;  %v4238_v60 = vsel %vm4173_vm9, %v4111_v52, %v4206_v54 }
 0x380   : > { %v4230_v50 = vsel %vm4165_vm10, %v4091_v28, %v4198_v57  ;;  %v4270_v61 = vpack.c.bf16 %v4238_v60, %v4238_v60 }
 0x381   : > { %4320 = vst.msk [vmem:[%s6522_s29 + $0x74] sm:$0xf] %vm4290_vm5, %v4287_v59  ;;  %v4262_v62 = vpack.c.bf16 %v4230_v50, %v4230_v50 }
 0x382   : > { %4303 = vst.msk [vmem:[%s6522_s29 + $0x30] sm:$0xf] %vm4290_vm5, %v4270_v61  ;;  %v4112_v63 = vpop.f32.mrf.mxu1 }
 0x383   : > { %4295 = vst.msk [vmem:[%s6522_s29 + $0x10] sm:$0xf] %vm4290_vm5, %v4262_v62  ;;  %v4092_v48 = vpop.f32.mrf.mxu0  ;;  %v4113_v0 = vadd.f32 %v6507_v55, %v4112_v63 }
 0x384   : > { %v4093_v2 = vadd.f32 %v6507_v55, %v4092_v48 }
 0x385   : > { %vm4174_vm11 = vcmp.ge.f32.partialorder %v4113_v0, 0.0  ;;  %v4207_v3 = vmul.f32 %v6510_v58, %v4113_v0 }
 0x386   : > { %vm4166_vm12 = vcmp.ge.f32.partialorder %v4093_v2, 0.0  ;;  %v4199_v4 = vmul.f32 %v6510_v58, %v4093_v2 }
 0x387   : > { %v4239_v6 = vsel %vm4174_vm11, %v4113_v0, %v4207_v3 }
 0x388   : > { %v4231_v37 = vsel %vm4166_vm12, %v4093_v2, %v4199_v4  ;;  %v4271_v7 = vpack.c.bf16 %v4239_v6, %v4239_v6 }
 0x389   : > { %v4263_v8 = vpack.c.bf16 %v4231_v37, %v4231_v37 }
 0x38a   : > { %4304 = vst.msk [vmem:[%s6522_s29 + $0x34] sm:$0xf] %vm4290_vm5, %v4271_v7 }
 0x38b   : > { %4296 = vst.msk [vmem:[%s6522_s29 + $0x14] sm:$0xf] %vm4290_vm5, %v4263_v8 }
 0x3a0   : > { %v4155_v9 = vpop.f32.mrf.mxu3 }
 0x3a1   : > { %v4135_v10 = vpop.f32.mrf.mxu2  ;;  %v4156_v25 = vadd.f32 %v6507_v55, %v4155_v9 }
 0x3a2   : > { %v4136_v11 = vadd.f32 %v6507_v55, %v4135_v10 }
 0x3a3   : > { %vm4191_vm13 = vcmp.ge.f32.partialorder %v4156_v25, 0.0  ;;  %v4224_v12 = vmul.f32 %v6510_v58, %v4156_v25 }
 0x3a4   : > { %vm4183_vm14 = vcmp.ge.f32.partialorder %v4136_v11, 0.0  ;;  %v4216_v14 = vmul.f32 %v6510_v58, %v4136_v11 }
 0x3a5   : > { %v4256_v5 = vsel %vm4191_vm13, %v4156_v25, %v4224_v12 }
 0x3a6   : > { %v4248_v15 = vsel %vm4183_vm14, %v4136_v11, %v4216_v14  ;;  %v4288_v16 = vpack.c.bf16 %v4256_v5, %v4256_v5 }
 0x3a7   : > { %v4280_v17 = vpack.c.bf16 %v4248_v15, %v4248_v15 }
 0x3a8   : > { %4321 = vst.msk [vmem:[%s6522_s29 + $0x78] sm:$0xf] %vm4290_vm5, %v4288_v16  ;;  %v4157_v19 = vpop.f32.mrf.mxu3 }
 0x3a9   : > { %4313 = vst.msk [vmem:[%s6522_s29 + $0x58] sm:$0xf] %vm4290_vm5, %v4280_v17  ;;  %v4137_v20 = vpop.f32.mrf.mxu2  ;;  %v4158_v21 = vadd.f32 %v6507_v55, %v4157_v19 }
 0x3aa   : > { %v4138_v23 = vadd.f32 %v6507_v55, %v4137_v20 }
 0x3ab   : > { %vm4192_vm15 = vcmp.ge.f32.partialorder %v4158_v21, 0.0  ;;  %v4225_v24 = vmul.f32 %v6510_v58, %v4158_v21 }
 0x3ac   : > { %vm4184_vm0 = vcmp.ge.f32.partialorder %v4138_v23, 0.0  ;;  %v4217_v1 = vmul.f32 %v6510_v58, %v4138_v23 }
 0x3ad   : > { %v4257_v13 = vsel %vm4192_vm15, %v4158_v21, %v4225_v24 }
 0x3ae   : > { %v4249_v26 = vsel %vm4184_vm0, %v4138_v23, %v4217_v1  ;;  %v4289_v18 = vpack.c.bf16 %v4257_v13, %v4257_v13 }
 0x3af   : > { %v4281_v27 = vpack.c.bf16 %v4249_v26, %v4249_v26 }
 0x3b0   : > { %4322 = vst.msk [vmem:[%s6522_s29 + $0x7c] sm:$0xf] %vm4290_vm5, %v4289_v18 }
 0x3b1   : > { %4314 = vst.msk [vmem:[%s6522_s29 + $0x5c] sm:$0xf] %vm4290_vm5, %v4281_v27 }
 0x3b3   : > { %v4095_v29 = vpop.f32.mrf.mxu0 }
 0x3b4   : > { %v4096_v30 = vadd.f32 %v6507_v55, %v4095_v29 }
 0x3b6   : > { %vm4167_vm1 = vcmp.ge.f32.partialorder %v4096_v30, 0.0  ;;  %v4200_v31 = vmul.f32 %v6510_v58, %v4096_v30 }
 0x3b8   : > { %v4232_v32 = vsel %vm4167_vm1, %v4096_v30, %v4200_v31 }
 0x3b9   : > { %v4264_v34 = vpack.c.bf16 %v4232_v32, %v4232_v32 }
 0x3bb   : > { %4297 = vst.msk [vmem:[%s6522_s29 + $0x18] sm:$0xf] %vm4290_vm5, %v4264_v34  ;;  %v4097_v36 = vpop.f32.mrf.mxu0  ;;  %v4115_v38 = vpop.f32.mrf.mxu1 }
 0x3bc   : > { %v4098_v22 = vadd.f32 %v6507_v55, %v4097_v36  ;;  %v4116_v33 = vadd.f32 %v6507_v55, %v4115_v38 }
 0x3be   : > { %vm4168_vm3 = vcmp.ge.f32.partialorder %v4098_v22, 0.0  ;;  %v4201_v39 = vmul.f32 %v6510_v58, %v4098_v22  ;;  %vm4175_vm2 = vcmp.ge.f32.partialorder %v4116_v33, 0.0  ;;  %v4208_v35 = vmul.f32 %v6510_v58, %v4116_v33 }
 0x3c0   : > { %v4233_v40 = vsel %vm4168_vm3, %v4098_v22, %v4201_v39  ;;  %v4240_v41 = vsel %vm4175_vm2, %v4116_v33, %v4208_v35 }
 0x3c1   : > { %v4265_v42 = vpack.c.bf16 %v4233_v40, %v4233_v40  ;;  %v4272_v43 = vpack.c.bf16 %v4240_v41, %v4240_v41 }
 0x3c3   : > { %4298 = vst.msk [vmem:[%s6522_s29 + $0x1c] sm:$0xf] %vm4290_vm5, %v4265_v42  ;;  %v4117_v44 = vpop.f32.mrf.mxu1 }
 0x3c4   : > { %4305 = vst.msk [vmem:[%s6522_s29 + $0x38] sm:$0xf] %vm4290_vm5, %v4272_v43  ;;  %v4118_v45 = vadd.f32 %v6507_v55, %v4117_v44 }
 0x3c6   : > { %vm4176_vm4 = vcmp.ge.f32.partialorder %v4118_v45, 0.0  ;;  %v4209_v46 = vmul.f32 %v6510_v58, %v4118_v45 }
 0x3c8   : > { %v4241_v47 = vsel %vm4176_vm4, %v4118_v45, %v4209_v46 }
 0x3c9   : > { %v4273_v49 = vpack.c.bf16 %v4241_v47, %v4241_v47 }
 0x3cb   : > { %4306 = vst.msk [vmem:[%s6522_s29 + $0x3c] sm:$0xf] %vm4290_vm5, %v4273_v49 }
 0x3cc PF: > { %s16_s22 = sadd.s32 1, %s4990_s22   ;;  %s6687_s20 = smov %s4986_s21 }
 0x3cd   : > { %p13_p5 = scmp.ge.s32.totalorder %s16_s22, 4   ;;  %s6688_s21 = smov %s6690_s4 }
 0x3cf   :  { %15 = sbr.rel (!%p13_p5) target bundleno = 2 (0x2), region = 75 }

</bundles_post_ra>
